<compile_context>
chip_gen: v7x
topology: tpu7x:2x2x1
jax: 0.10.0
libtpu: 0.0.40
codegen_flags: <defaults>
</compile_context>

<pallas_src>
import math

import jax
import jax.numpy as jnp
from jax.experimental import pallas as pl
from jax.experimental.pallas import tpu as pltpu

BN_EPS = 1e-5


# ---------------------------------------------------------------------------
# reference-only helpers (pure JAX, complex64)
# ---------------------------------------------------------------------------
def _sigmoid(v):
    return 1.0 / (1.0 + jnp.exp(-v))


def _complex_bn(yr, yi, w_rr, w_ii, w_ri, b_r, b_i):
    """ComplexBatchNorm2d(num_features=1), training mode (batch statistics)."""
    mr = jnp.mean(yr)
    mi = jnp.mean(yi)
    cr = yr - mr
    ci = yi - mi
    crr = jnp.mean(cr * cr) + BN_EPS
    cii = jnp.mean(ci * ci) + BN_EPS
    cri = jnp.mean(cr * ci)
    det = crr * cii - cri * cri
    s = jnp.sqrt(det)
    t = jnp.sqrt(cii + crr + 2.0 * s)
    inv_st = 1.0 / (s * t)
    rrr = (cii + s) * inv_st
    rii = (crr + s) * inv_st
    rri = -cri * inv_st
    nr = rrr * cr + rri * ci
    ni = rii * ci + rri * cr
    out_r = w_rr * nr + w_ri * ni + b_r
    out_i = w_ri * nr + w_ii * ni + b_i
    return out_r, out_i


# ---------------------------------------------------------------------------
# Pallas kernel
# ---------------------------------------------------------------------------
def _bngru_kernel(bn_ref, xri_ref, hri_ref, wx_ref, wh_ref, b_ref, out_ref):
    # BN affine parameters from SMEM: [Wrr, Wii, Wri, Br, Bi, 0, 0, 0]
    w_rr = bn_ref[0]
    w_ii = bn_ref[1]
    w_ri = bn_ref[2]
    b_r = bn_ref[3]
    b_i = bn_ref[4]

    M = xri_ref.shape[0]
    H = out_ref.shape[1] // 6
    inv_mh = 1.0 / float(M * H)
    f32 = jnp.float32

    # --- 2 fused MXU matmuls: all 3 gates' complex linears per path at once ---
    # columns of the (M, 6H) slabs: [yr_g | yi_g] for gate g in {0,1,2}.
    # TODO(synk): cast operands to bf16 (f32 accumulation) at production M.
    xs = jnp.dot(xri_ref[...], wx_ref[...],
                 preferred_element_type=f32) + b_ref[0:1, :]
    hs = jnp.dot(hri_ref[...], wh_ref[...],
                 preferred_element_type=f32) + b_ref[1:2, :]

    # --- batched BN statistics: one ones(1,M) MXU dot per slab ---------------
    ones_row = jnp.ones((1, M), f32)

    def slab_moments(slab):
        # slab: (M, 6H).  payload columns: [ slab | slab^2 | slab[:,j]*slab[:,j+H] ]
        # so per gate g the raw sums live at lane groups
        #   sum yr  -> 2gH, sum yi -> (2g+1)H,
        #   sum yr2 -> 6H+2gH, sum yi2 -> 6H+(2g+1)H, sum yr*yi -> 12H+2gH.
        cross = slab[:, : 5 * H] * slab[:, H:]
        payload = jnp.concatenate([slab, slab * slab, cross], axis=1)  # (M,17H)
        return jnp.dot(ones_row, payload, preferred_element_type=f32)   # (1,17H)

    mom_x = slab_moments(xs)
    mom_h = slab_moments(hs)

    def lane_sum(row, start):
        return jnp.sum(row[:, start:start + H])

    def fold_bn(s_r, s_i, s_rr, s_ii, s_ri):
        # raw sums -> folded whitening + affine: out_r = a_rr*yr + a_ri*yi + c_r
        # NOTE: one-pass (E[x^2]-E[x]^2) covariance; fine at these scales but
        # would need compensated accumulation for a much tighter tolerance.
        mr = s_r * inv_mh
        mi = s_i * inv_mh
        crr = s_rr * inv_mh - mr * mr + BN_EPS
        cii = s_ii * inv_mh - mi * mi + BN_EPS
        cri = s_ri * inv_mh - mr * mi
        det = crr * cii - cri * cri
        s = jnp.sqrt(det)
        t = jnp.sqrt(crr + cii + 2.0 * s)
        inv_st = 1.0 / (s * t)            # scalar; 7 of these in the whole kernel
        rrr = (cii + s) * inv_st
        rii = (crr + s) * inv_st
        rri = -cri * inv_st
        a_rr = w_rr * rrr + w_ri * rri    # coeff of yr in out_r
        a_ri = w_rr * rri + w_ri * rii    # coeff of yi in out_r
        a_ir = w_ri * rrr + w_ii * rri    # coeff of yr in out_i
        a_ii = w_ri * rri + w_ii * rii    # coeff of yi in out_i
        c_r = b_r - (a_rr * mr + a_ri * mi)
        c_i = b_i - (a_ir * mr + a_ii * mi)
        return a_rr, a_ri, a_ir, a_ii, c_r, c_i

    def gate_coeffs(mom, g):
        return fold_bn(lane_sum(mom, 2 * g * H),
                       lane_sum(mom, (2 * g + 1) * H),
                       lane_sum(mom, 6 * H + 2 * g * H),
                       lane_sum(mom, 6 * H + (2 * g + 1) * H),
                       lane_sum(mom, 12 * H + 2 * g * H))

    def gate_planes(slab, g):
        yr = slab[:, 2 * g * H:(2 * g + 1) * H]
        yi = slab[:, (2 * g + 1) * H:(2 * g + 2) * H]
        return yr, yi

    def apply_bn(slab, mom, g):
        a_rr, a_ri, a_ir, a_ii, c_r, c_i = gate_coeffs(mom, g)
        yr, yi = gate_planes(slab, g)
        return a_rr * yr + a_ri * yi + c_r, a_ir * yr + a_ii * yi + c_i

    def sigm(v):
        # sigmoid(v) == 0.5*(tanh(v/2)+1): lives on the EUP, no VPU divide.
        return 0.5 * (jnp.tanh(0.5 * v) + 1.0)

    # --- reset gate: r = csigmoid(bn(W1 x) + bn(R1 h)) ---
    bx1r, bx1i = apply_bn(xs, mom_x, 0)
    bh1r, bh1i = apply_bn(hs, mom_h, 0)
    rr = sigm(bx1r + bh1r)
    ri = sigm(bx1i + bh1i)

    # --- update gate: z = csigmoid(bn(R2 h) + bn(W2 x)) ---
    bx2r, bx2i = apply_bn(xs, mom_x, 1)
    bh2r, bh2i = apply_bn(hs, mom_h, 1)
    zr = sigm(bh2r + bx2r)
    zi = sigm(bh2i + bx2i)

    # --- candidate: n = ctanh(bn(bn(W3 x) + r * bn(R3 h))) ---
    bx3r, bx3i = apply_bn(xs, mom_x, 2)
    bh3r, bh3i = apply_bn(hs, mom_h, 2)
    tr = bx3r + rr * bh3r - ri * bh3i        # complex product r * bn(R3 h)
    ti = bx3i + rr * bh3i + ri * bh3r

    # outer BN stats for the candidate: one more ones(1,M) MXU dot.
    payload_t = jnp.concatenate([tr, ti, tr * tr, ti * ti, tr * ti], axis=1)
    mom_t = jnp.dot(ones_row, payload_t, preferred_element_type=f32)  # (1, 5H)
    a_rr, a_ri, a_ir, a_ii, c_r, c_i = fold_bn(
        lane_sum(mom_t, 0), lane_sum(mom_t, H),
        lane_sum(mom_t, 2 * H), lane_sum(mom_t, 3 * H), lane_sum(mom_t, 4 * H))
    nr = jnp.tanh(a_rr * tr + a_ri * ti + c_r)
    ni = jnp.tanh(a_ir * tr + a_ii * ti + c_i)

    # single lane-dense output slab: [rr | ri | zr | zi | nr | ni]  (M, 6H) bf16
    out_ref[...] = jnp.concatenate(
        [rr, ri, zr, zi, nr, ni], axis=1).astype(out_ref.dtype)


# ---------------------------------------------------------------------------
# wrapper: packing + pallas_call + unpacking
# ---------------------------------------------------------------------------
def _pack_weights(wr, wi):
    """(3, In, H) complex-linear weights -> fused real block weight (2*In, 6H).

    Per gate the block is [[Wr, Wi], [-Wi, Wr]], so that
    [ar | ai] @ block = [ar@Wr - ai@Wi | ar@Wi + ai@Wr] = [yr | yi].
    Gates are stacked along the output (lane) axis.
    """
    n_in, h = wr.shape[1], wr.shape[2]
    top = jnp.concatenate([wr, wi], axis=2)        # (3, In, 2H)
    bot = jnp.concatenate([-wi, wr], axis=2)       # (3, In, 2H)
    blk = jnp.concatenate([top, bot], axis=1)      # (3, 2In, 2H)
    return jnp.transpose(blk, (1, 0, 2)).reshape(2 * n_in, 6 * h)


def _pack_bias(br, bi):
    """(3, 1, H) effective real/imag biases -> one (1, 6H) row."""
    h = br.shape[2]
    cat = jnp.concatenate([br, bi], axis=2)        # (3, 1, 2H)
    return jnp.transpose(cat, (1, 0, 2)).reshape(1, 6 * h)


def complex_bn_gru_cell(x, h, params):
    """x: (B,1,T,F_in) complex64, h: (B,1,T,H) complex64 -> (r, z, n) complex64.

    NOTE: the original torch forward() computes r, z, n and returns None; we
    return the three gate tensors so the computation is observable.
    TODO(synk): in a full GRU loop, keep activations in the packed (M,2H) /
    (M,6H) real layout between steps to avoid the pack/unpack HBM round trips.
    """
    (wx_r, wx_i, bx_r, bx_i, wh_r, wh_i, bh_r, bh_i, bn_vec) = params
    B, C, T, F = x.shape
    H = h.shape[-1]
    M = B * C * T

    # lane-packed inputs: [re | im] on the lane axis, rows = B*C*T
    xri = jnp.concatenate(
        [jnp.real(x).reshape(M, F), jnp.imag(x).reshape(M, F)], axis=1
    ).astype(jnp.float32)                                   # (M, 2F)
    hri = jnp.concatenate(
        [jnp.real(h).reshape(M, H), jnp.imag(h).reshape(M, H)], axis=1
    ).astype(jnp.float32)                                   # (M, 2H)

    # fused weights / biases (wrapper-side repacking; done once per call here,
    # in a real model these would be pre-packed parameters).
    wx_f = _pack_weights(wx_r, wx_i)                        # (2F, 6H)
    wh_f = _pack_weights(wh_r, wh_i)                        # (2H, 6H)
    bias = jnp.concatenate(
        [_pack_bias(bx_r, bx_i), _pack_bias(bh_r, bh_i)], axis=0)   # (2, 6H)

    # right-sized VMEM limit: ~4x the actual footprint, floored at 8 MiB and
    # capped at 32 MiB so the same config is safe on v5e/v6e/v7x.
    io_bytes = 4 * (M * 2 * F + M * 2 * H + 2 * F * 6 * H + 2 * H * 6 * H
                    + 2 * 6 * H) + 2 * (M * 6 * H)
    tmp_bytes = 4 * M * 6 * H * 20        # xs/hs, moment payloads, temporaries
    vmem_limit = int(min(32 * 1024 * 1024,
                         max(8 * 1024 * 1024, 4 * (io_bytes + tmp_bytes))))

    def full_spec(shape):
        nd = len(shape)
        return pl.BlockSpec(shape, lambda i, _nd=nd: (0,) * _nd)

    fn = pl.pallas_call(
        _bngru_kernel,
        grid=(1,),
        in_specs=[
            pl.BlockSpec(memory_space=pltpu.MemorySpace.SMEM),   # BN params (8,)
            full_spec((M, 2 * F)),
            full_spec((M, 2 * H)),
            full_spec((2 * F, 6 * H)),
            full_spec((2 * H, 6 * H)),
            full_spec((2, 6 * H)),
        ],
        out_specs=full_spec((M, 6 * H)),
        out_shape=jax.ShapeDtypeStruct((M, 6 * H), jnp.bfloat16),
        compiler_params=pltpu.CompilerParams(
            dimension_semantics=("arbitrary",),
            vmem_limit_bytes=vmem_limit,
        ),
    )
    # TODO(synk): production-M restructuring into an M-tiled multi-pass pipeline
    # (moments pass / apply pass / final-BN pass) with a "parallel" M grid axis
    # is required for v7x (2 TCs, 64 MiB VMEM); at demo sizes one resident step
    # is both correct and fastest (BN needs global statistics).
    out = fn(bn_vec, xri, hri, wx_f, wh_f, bias).astype(jnp.float32)  # (M, 6H)

    shp = (B, C, T, H)

    def as_c(cr, ci):
        re = out[:, cr * H:(cr + 1) * H].reshape(shp)
        im = out[:, ci * H:(ci + 1) * H].reshape(shp)
        return (re + 1j * im).astype(jnp.complex64)

    return as_c(0, 1), as_c(2, 3), as_c(4, 5)


# ---------------------------------------------------------------------------
# parameters + pure-JAX reference
# ---------------------------------------------------------------------------
def init_params(key, f_in, hid):
    """Deterministic parameter init mirroring the torch module's parameter shapes."""
    keys = jax.random.split(key, 7)

    def clinear_params(k, fan_in, fan_out):
        kw_r, kb_r, kw_i, kb_i = jax.random.split(k, 4)
        lim = 1.0 / math.sqrt(fan_in)
        # nn.Linear-style uniform init; weights stored pre-transposed as (in, out).
        w_r = jax.random.uniform(kw_r, (fan_in, fan_out), jnp.float32, -lim, lim)
        w_i = jax.random.uniform(kw_i, (fan_in, fan_out), jnp.float32, -lim, lim)
        b_r = jax.random.uniform(kb_r, (fan_out,), jnp.float32, -lim, lim)
        b_i = jax.random.uniform(kb_i, (fan_out,), jnp.float32, -lim, lim)
        # apply_complex adds the full Linear (incl. bias) to each component:
        #   real: fr(re) - fi(im)  -> effective bias (b_r - b_i)
        #   imag: fr(im) + fi(re)  -> effective bias (b_r + b_i)
        return (w_r, w_i,
                (b_r - b_i).reshape(1, fan_out), (b_r + b_i).reshape(1, fan_out))

    # x-path: linear_reset_w1, linear_reset_w2, linear_gate_w3
    xw = [clinear_params(keys[i], f_in, hid) for i in range(3)]
    # h-path: linear_reset_r1, linear_reset_r2, linear_gate_r3
    hw = [clinear_params(keys[3 + i], hid, hid) for i in range(3)]

    wx_r = jnp.stack([p[0] for p in xw]); wx_i = jnp.stack([p[1] for p in xw])
    bx_r = jnp.stack([p[2] for p in xw]); bx_i = jnp.stack([p[3] for p in xw])
    wh_r = jnp.stack([p[0] for p in hw]); wh_i = jnp.stack([p[1] for p in hw])
    bh_r = jnp.stack([p[2] for p in hw]); bh_i = jnp.stack([p[3] for p in hw])

    # ComplexBatchNorm2d(1) affine params: weight (1,3)=[Wrr,Wii,Wri], bias (1,2);
    # default init perturbed a little so every affine term is exercised.
    kw, kb = jax.random.split(keys[6])
    bn_w = jnp.array([1.4142135623730951, 1.4142135623730951, 0.0], jnp.float32) \
        + 0.1 * jax.random.normal(kw, (3,), jnp.float32)
    bn_b = 0.1 * jax.random.normal(kb, (2,), jnp.float32)
    bn_vec = jnp.concatenate([bn_w, bn_b, jnp.zeros((3,), jnp.float32)])
    return (wx_r, wx_i, bx_r, bx_i, wh_r, wh_i, bh_r, bh_i, bn_vec)


def reference_forward(x, h, params):
    """Pure-JAX (complex64) reference of the torch forward semantics."""
    (wx_r, wx_i, bx_r, bx_i, wh_r, wh_i, bh_r, bh_i, bn_vec) = params
    w_rr, w_ii, w_ri, b_r, b_i = bn_vec[0], bn_vec[1], bn_vec[2], bn_vec[3], bn_vec[4]

    def clin(inp, wr, wi, br, bi):
        ar, ai = jnp.real(inp), jnp.imag(inp)
        yr = ar @ wr - ai @ wi + br
        yi = ai @ wr + ar @ wi + bi
        return yr + 1j * yi

    def cbn(y):
        yr, yi = _complex_bn(jnp.real(y), jnp.imag(y), w_rr, w_ii, w_ri, b_r, b_i)
        return yr + 1j * yi

    def csig(y):
        return _sigmoid(jnp.real(y)) + 1j * _sigmoid(jnp.imag(y))

    def ctanh(y):
        return jnp.tanh(jnp.real(y)) + 1j * jnp.tanh(jnp.imag(y))

    x1 = clin(x, wx_r[0], wx_i[0], bx_r[0], bx_i[0])
    h1 = clin(h, wh_r[0], wh_i[0], bh_r[0], bh_i[0])
    r = csig(cbn(x1) + cbn(h1))

    x2 = clin(x, wx_r[1], wx_i[1], bx_r[1], bx_i[1])
    h2 = clin(h, wh_r[1], wh_i[1], bh_r[1], bh_i[1])
    z = csig(cbn(h2) + cbn(x2))

    x3 = clin(x, wx_r[2], wx_i[2], bx_r[2], bx_i[2])
    h3 = r * cbn(clin(h, wh_r[2], wh_i[2], bh_r[2], bh_i[2]))
    n = ctanh(cbn(cbn(x3) + h3))
    return r, z, n


if __name__ == "__main__":
    B, C, T = 2, 1, 8
    F_IN, HID = 16, 32

    key = jax.random.PRNGKey(0)
    k_in, k_par = jax.random.split(key)
    kxr, kxi, khr, khi = jax.random.split(k_in, 4)
    x = (jax.random.normal(kxr, (B, C, T, F_IN), jnp.float32)
         + 1j * jax.random.normal(kxi, (B, C, T, F_IN), jnp.float32)).astype(jnp.complex64)
    h = (jax.random.normal(khr, (B, C, T, HID), jnp.float32)
         + 1j * jax.random.normal(khi, (B, C, T, HID), jnp.float32)).astype(jnp.complex64)

    params = init_params(k_par, F_IN, HID)

    r, z, n = complex_bn_gru_cell(x, h, params)
    jax.block_until_ready((r, z, n))

    r_ref, z_ref, n_ref = reference_forward(x, h, params)
    # 5e-3 tolerance: covers the bf16 output-slab rounding (<2e-3) plus the
    # one-pass-moment / tanh-sigmoid formulation differences (all f32, tiny).
    for got, ref in ((r, r_ref), (z, z_ref), (n, n_ref)):
        err = float(jnp.max(jnp.abs(got - ref)))
        assert jnp.allclose(got, ref, atol=5e-3, rtol=5e-3), f"mismatch, max abs err={err}"

    print("KERNEL_OK")
</pallas_src>

<mosaic_0001>
module attributes {stable_mosaic.version = 11 : i64} {
  func.func @_bngru_kernel(%arg0: i32, %arg1: memref<8xf32, #tpu.memory_space<smem>>, %arg2: memref<16x32xf32, #tpu.memory_space<vmem>>, %arg3: memref<16x64xf32, #tpu.memory_space<vmem>>, %arg4: memref<32x192xf32, #tpu.memory_space<vmem>>, %arg5: memref<64x192xf32, #tpu.memory_space<vmem>>, %arg6: memref<2x192xf32, #tpu.memory_space<vmem>>, %arg7: memref<16x192xbf16, #tpu.memory_space<vmem>>) attributes {dimension_semantics = [#tpu.dimension_semantics<arbitrary>], iteration_bounds = array<i64: 1>, scalar_prefetch = 0 : i64, scratch_operands = 0 : i64, tpu.core_type = #tpu.core_type<tc>, window_params = [{transform_indices = @transform_0, window_bounds = array<i64: 8>}, {pipeline_mode = #tpu.pipeline_mode<synchronous>, transform_indices = @transform_1, window_bounds = array<i64: 16, 32>}, {pipeline_mode = #tpu.pipeline_mode<synchronous>, transform_indices = @transform_2, window_bounds = array<i64: 16, 64>}, {pipeline_mode = #tpu.pipeline_mode<synchronous>, transform_indices = @transform_3, window_bounds = array<i64: 32, 192>}, {pipeline_mode = #tpu.pipeline_mode<synchronous>, transform_indices = @transform_4, window_bounds = array<i64: 64, 192>}, {pipeline_mode = #tpu.pipeline_mode<synchronous>, transform_indices = @transform_5, window_bounds = array<i64: 2, 192>}, {pipeline_mode = #tpu.pipeline_mode<synchronous>, transform_indices = @transform_6, window_bounds = array<i64: 16, 192>}]} {
    %c0 = arith.constant 0 : index
    %0 = memref.load %arg1[%c0] : memref<8xf32, #tpu.memory_space<smem>>
    %c1 = arith.constant 1 : index
    %1 = memref.load %arg1[%c1] : memref<8xf32, #tpu.memory_space<smem>>
    %c2 = arith.constant 2 : index
    %2 = memref.load %arg1[%c2] : memref<8xf32, #tpu.memory_space<smem>>
    %c3 = arith.constant 3 : index
    %3 = memref.load %arg1[%c3] : memref<8xf32, #tpu.memory_space<smem>>
    %c4 = arith.constant 4 : index
    %4 = memref.load %arg1[%c4] : memref<8xf32, #tpu.memory_space<smem>>
    %c0_0 = arith.constant 0 : index
    %c0_1 = arith.constant 0 : index
    %5 = vector.load %arg2[%c0_0, %c0_1] : memref<16x32xf32, #tpu.memory_space<vmem>>, vector<16x32xf32>
    %c0_2 = arith.constant 0 : index
    %c0_3 = arith.constant 0 : index
    %6 = vector.load %arg4[%c0_2, %c0_3] : memref<32x192xf32, #tpu.memory_space<vmem>>, vector<32x192xf32>
    %cst = arith.constant dense<0.000000e+00> : vector<16x192xf32>
    %7 = tpu.matmul %5, %6, %cst {dimension_numbers = #tpu.dot_dimension_numbers<[1], [0], [0], [1], [0, 0, 1, 1], [], []>} : vector<16x32xf32>, vector<32x192xf32>, vector<16x192xf32> -> vector<16x192xf32>
    %c0_4 = arith.constant 0 : index
    %c0_5 = arith.constant 0 : index
    %8 = vector.load %arg6[%c0_4, %c0_5] : memref<2x192xf32, #tpu.memory_space<vmem>>, vector<1x192xf32>
    %9 = vector.broadcast %8 : vector<1x192xf32> to vector<16x192xf32>
    %10 = arith.addf %7, %9 : vector<16x192xf32>
    %c0_6 = arith.constant 0 : index
    %c0_7 = arith.constant 0 : index
    %11 = vector.load %arg3[%c0_6, %c0_7] : memref<16x64xf32, #tpu.memory_space<vmem>>, vector<16x64xf32>
    %c0_8 = arith.constant 0 : index
    %c0_9 = arith.constant 0 : index
    %12 = vector.load %arg5[%c0_8, %c0_9] : memref<64x192xf32, #tpu.memory_space<vmem>>, vector<64x192xf32>
    %cst_10 = arith.constant dense<0.000000e+00> : vector<16x192xf32>
    %13 = tpu.matmul %11, %12, %cst_10 {dimension_numbers = #tpu.dot_dimension_numbers<[1], [0], [0], [1], [0, 0, 1, 1], [], []>} : vector<16x64xf32>, vector<64x192xf32>, vector<16x192xf32> -> vector<16x192xf32>
    %c1_11 = arith.constant 1 : index
    %c0_12 = arith.constant 0 : index
    %14 = vector.load %arg6[%c1_11, %c0_12] : memref<2x192xf32, #tpu.memory_space<vmem>>, vector<1x192xf32>
    %15 = vector.broadcast %14 : vector<1x192xf32> to vector<16x192xf32>
    %16 = arith.addf %13, %15 : vector<16x192xf32>
    %cst_13 = arith.constant 1.000000e+00 : f32
    %17 = vector.broadcast %cst_13 : f32 to vector<1x16xf32>
    %18 = vector.extract_strided_slice %10 {offsets = [0, 0], sizes = [16, 160], strides = [1, 1]} : vector<16x192xf32> to vector<16x160xf32>
    %19 = vector.extract_strided_slice %10 {offsets = [0, 32], sizes = [16, 160], strides = [1, 1]} : vector<16x192xf32> to vector<16x160xf32>
    %20 = arith.mulf %18, %19 : vector<16x160xf32>
    %21 = arith.mulf %10, %10 : vector<16x192xf32>
    %22 = tpu.concatenate %10, %21, %20 in 1 : vector<16x192xf32>, vector<16x192xf32>, vector<16x160xf32> -> vector<16x544xf32>
    %cst_14 = arith.constant dense<0.000000e+00> : vector<1x544xf32>
    %23 = tpu.matmul %17, %22, %cst_14 {dimension_numbers = #tpu.dot_dimension_numbers<[1], [0], [0], [1], [0, 0, 1, 1], [], []>} : vector<1x16xf32>, vector<16x544xf32>, vector<1x544xf32> -> vector<1x544xf32>
    %24 = vector.extract_strided_slice %16 {offsets = [0, 0], sizes = [16, 160], strides = [1, 1]} : vector<16x192xf32> to vector<16x160xf32>
    %25 = vector.extract_strided_slice %16 {offsets = [0, 32], sizes = [16, 160], strides = [1, 1]} : vector<16x192xf32> to vector<16x160xf32>
    %26 = arith.mulf %24, %25 : vector<16x160xf32>
    %27 = arith.mulf %16, %16 : vector<16x192xf32>
    %28 = tpu.concatenate %16, %27, %26 in 1 : vector<16x192xf32>, vector<16x192xf32>, vector<16x160xf32> -> vector<16x544xf32>
    %cst_15 = arith.constant dense<0.000000e+00> : vector<1x544xf32>
    %29 = tpu.matmul %17, %28, %cst_15 {dimension_numbers = #tpu.dot_dimension_numbers<[1], [0], [0], [1], [0, 0, 1, 1], [], []>} : vector<1x16xf32>, vector<16x544xf32>, vector<1x544xf32> -> vector<1x544xf32>
    %30 = vector.extract_strided_slice %23 {offsets = [0, 0], sizes = [1, 32], strides = [1, 1]} : vector<1x544xf32> to vector<1x32xf32>
    %31 = vector.shape_cast %30 : vector<1x32xf32> to vector<1x1x32xf32>
    %cst_16 = arith.constant dense<0.000000e+00> : vector<1xf32>
    %32 = vector.multi_reduction <add>, %31, %cst_16 [1, 2] : vector<1x1x32xf32> to vector<1xf32>
    %33 = vector.shape_cast %32 : vector<1xf32> to vector<1x1x1xf32>
    %34 = vector.extract %33[0, 0, 0] : f32 from vector<1x1x1xf32>
    %35 = vector.extract_strided_slice %23 {offsets = [0, 32], sizes = [1, 32], strides = [1, 1]} : vector<1x544xf32> to vector<1x32xf32>
    %36 = vector.shape_cast %35 : vector<1x32xf32> to vector<1x1x32xf32>
    %cst_17 = arith.constant dense<0.000000e+00> : vector<1xf32>
    %37 = vector.multi_reduction <add>, %36, %cst_17 [1, 2] : vector<1x1x32xf32> to vector<1xf32>
    %38 = vector.shape_cast %37 : vector<1xf32> to vector<1x1x1xf32>
    %39 = vector.extract %38[0, 0, 0] : f32 from vector<1x1x1xf32>
    %40 = vector.extract_strided_slice %23 {offsets = [0, 192], sizes = [1, 32], strides = [1, 1]} : vector<1x544xf32> to vector<1x32xf32>
    %41 = vector.shape_cast %40 : vector<1x32xf32> to vector<1x1x32xf32>
    %cst_18 = arith.constant dense<0.000000e+00> : vector<1xf32>
    %42 = vector.multi_reduction <add>, %41, %cst_18 [1, 2] : vector<1x1x32xf32> to vector<1xf32>
    %43 = vector.shape_cast %42 : vector<1xf32> to vector<1x1x1xf32>
    %44 = vector.extract %43[0, 0, 0] : f32 from vector<1x1x1xf32>
    %45 = vector.extract_strided_slice %23 {offsets = [0, 224], sizes = [1, 32], strides = [1, 1]} : vector<1x544xf32> to vector<1x32xf32>
    %46 = vector.shape_cast %45 : vector<1x32xf32> to vector<1x1x32xf32>
    %cst_19 = arith.constant dense<0.000000e+00> : vector<1xf32>
    %47 = vector.multi_reduction <add>, %46, %cst_19 [1, 2] : vector<1x1x32xf32> to vector<1xf32>
    %48 = vector.shape_cast %47 : vector<1xf32> to vector<1x1x1xf32>
    %49 = vector.extract %48[0, 0, 0] : f32 from vector<1x1x1xf32>
    %50 = vector.extract_strided_slice %23 {offsets = [0, 384], sizes = [1, 32], strides = [1, 1]} : vector<1x544xf32> to vector<1x32xf32>
    %51 = vector.shape_cast %50 : vector<1x32xf32> to vector<1x1x32xf32>
    %cst_20 = arith.constant dense<0.000000e+00> : vector<1xf32>
    %52 = vector.multi_reduction <add>, %51, %cst_20 [1, 2] : vector<1x1x32xf32> to vector<1xf32>
    %53 = vector.shape_cast %52 : vector<1xf32> to vector<1x1x1xf32>
    %54 = vector.extract %53[0, 0, 0] : f32 from vector<1x1x1xf32>
    %cst_21 = arith.constant 0.001953125 : f32
    %55 = arith.mulf %34, %cst_21 : f32
    %cst_22 = arith.constant 0.001953125 : f32
    %56 = arith.mulf %39, %cst_22 : f32
    %cst_23 = arith.constant 0.001953125 : f32
    %57 = arith.mulf %44, %cst_23 : f32
    %58 = arith.mulf %55, %55 : f32
    %59 = arith.subf %57, %58 : f32
    %cst_24 = arith.constant 9.99999974E-6 : f32
    %60 = arith.addf %59, %cst_24 : f32
    %cst_25 = arith.constant 0.001953125 : f32
    %61 = arith.mulf %49, %cst_25 : f32
    %62 = arith.mulf %56, %56 : f32
    %63 = arith.subf %61, %62 : f32
    %cst_26 = arith.constant 9.99999974E-6 : f32
    %64 = arith.addf %63, %cst_26 : f32
    %cst_27 = arith.constant 0.001953125 : f32
    %65 = arith.mulf %54, %cst_27 : f32
    %66 = arith.mulf %55, %56 : f32
    %67 = arith.subf %65, %66 : f32
    %68 = arith.mulf %60, %64 : f32
    %69 = arith.mulf %67, %67 : f32
    %70 = arith.subf %68, %69 : f32
    %71 = math.sqrt %70 : f32
    %72 = arith.addf %60, %64 : f32
    %cst_28 = arith.constant 2.000000e+00 : f32
    %73 = arith.mulf %cst_28, %71 : f32
    %74 = arith.addf %72, %73 : f32
    %75 = math.sqrt %74 : f32
    %76 = arith.mulf %71, %75 : f32
    %cst_29 = arith.constant 1.000000e+00 : f32
    %77 = arith.divf %cst_29, %76 : f32
    %78 = arith.addf %64, %71 : f32
    %79 = arith.mulf %78, %77 : f32
    %80 = arith.addf %60, %71 : f32
    %81 = arith.mulf %80, %77 : f32
    %cst_30 = arith.constant 0.000000e+00 : f32
    %82 = arith.subf %cst_30, %67 : f32
    %83 = arith.mulf %82, %77 : f32
    %84 = arith.mulf %0, %79 : f32
    %85 = arith.mulf %2, %83 : f32
    %86 = arith.addf %84, %85 : f32
    %87 = arith.mulf %0, %83 : f32
    %88 = arith.mulf %2, %81 : f32
    %89 = arith.addf %87, %88 : f32
    %90 = arith.mulf %2, %79 : f32
    %91 = arith.mulf %1, %83 : f32
    %92 = arith.addf %90, %91 : f32
    %93 = arith.mulf %2, %83 : f32
    %94 = arith.mulf %1, %81 : f32
    %95 = arith.addf %93, %94 : f32
    %96 = arith.mulf %86, %55 : f32
    %97 = arith.mulf %89, %56 : f32
    %98 = arith.addf %96, %97 : f32
    %99 = arith.subf %3, %98 : f32
    %100 = arith.mulf %92, %55 : f32
    %101 = arith.mulf %95, %56 : f32
    %102 = arith.addf %100, %101 : f32
    %103 = arith.subf %4, %102 : f32
    %104 = vector.extract_strided_slice %10 {offsets = [0, 0], sizes = [16, 32], strides = [1, 1]} : vector<16x192xf32> to vector<16x32xf32>
    %105 = vector.extract_strided_slice %10 {offsets = [0, 32], sizes = [16, 32], strides = [1, 1]} : vector<16x192xf32> to vector<16x32xf32>
    %106 = vector.broadcast %86 : f32 to vector<16x32xf32>
    %107 = arith.mulf %106, %104 : vector<16x32xf32>
    %108 = vector.broadcast %89 : f32 to vector<16x32xf32>
    %109 = arith.mulf %108, %105 : vector<16x32xf32>
    %110 = arith.addf %107, %109 : vector<16x32xf32>
    %111 = vector.broadcast %99 : f32 to vector<16x32xf32>
    %112 = arith.addf %110, %111 : vector<16x32xf32>
    %113 = vector.broadcast %92 : f32 to vector<16x32xf32>
    %114 = arith.mulf %113, %104 : vector<16x32xf32>
    %115 = vector.broadcast %95 : f32 to vector<16x32xf32>
    %116 = arith.mulf %115, %105 : vector<16x32xf32>
    %117 = arith.addf %114, %116 : vector<16x32xf32>
    %118 = vector.broadcast %103 : f32 to vector<16x32xf32>
    %119 = arith.addf %117, %118 : vector<16x32xf32>
    %120 = vector.extract_strided_slice %29 {offsets = [0, 0], sizes = [1, 32], strides = [1, 1]} : vector<1x544xf32> to vector<1x32xf32>
    %121 = vector.shape_cast %120 : vector<1x32xf32> to vector<1x1x32xf32>
    %cst_31 = arith.constant dense<0.000000e+00> : vector<1xf32>
    %122 = vector.multi_reduction <add>, %121, %cst_31 [1, 2] : vector<1x1x32xf32> to vector<1xf32>
    %123 = vector.shape_cast %122 : vector<1xf32> to vector<1x1x1xf32>
    %124 = vector.extract %123[0, 0, 0] : f32 from vector<1x1x1xf32>
    %125 = vector.extract_strided_slice %29 {offsets = [0, 32], sizes = [1, 32], strides = [1, 1]} : vector<1x544xf32> to vector<1x32xf32>
    %126 = vector.shape_cast %125 : vector<1x32xf32> to vector<1x1x32xf32>
    %cst_32 = arith.constant dense<0.000000e+00> : vector<1xf32>
    %127 = vector.multi_reduction <add>, %126, %cst_32 [1, 2] : vector<1x1x32xf32> to vector<1xf32>
    %128 = vector.shape_cast %127 : vector<1xf32> to vector<1x1x1xf32>
    %129 = vector.extract %128[0, 0, 0] : f32 from vector<1x1x1xf32>
    %130 = vector.extract_strided_slice %29 {offsets = [0, 192], sizes = [1, 32], strides = [1, 1]} : vector<1x544xf32> to vector<1x32xf32>
    %131 = vector.shape_cast %130 : vector<1x32xf32> to vector<1x1x32xf32>
    %cst_33 = arith.constant dense<0.000000e+00> : vector<1xf32>
    %132 = vector.multi_reduction <add>, %131, %cst_33 [1, 2] : vector<1x1x32xf32> to vector<1xf32>
    %133 = vector.shape_cast %132 : vector<1xf32> to vector<1x1x1xf32>
    %134 = vector.extract %133[0, 0, 0] : f32 from vector<1x1x1xf32>
    %135 = vector.extract_strided_slice %29 {offsets = [0, 224], sizes = [1, 32], strides = [1, 1]} : vector<1x544xf32> to vector<1x32xf32>
    %136 = vector.shape_cast %135 : vector<1x32xf32> to vector<1x1x32xf32>
    %cst_34 = arith.constant dense<0.000000e+00> : vector<1xf32>
    %137 = vector.multi_reduction <add>, %136, %cst_34 [1, 2] : vector<1x1x32xf32> to vector<1xf32>
    %138 = vector.shape_cast %137 : vector<1xf32> to vector<1x1x1xf32>
    %139 = vector.extract %138[0, 0, 0] : f32 from vector<1x1x1xf32>
    %140 = vector.extract_strided_slice %29 {offsets = [0, 384], sizes = [1, 32], strides = [1, 1]} : vector<1x544xf32> to vector<1x32xf32>
    %141 = vector.shape_cast %140 : vector<1x32xf32> to vector<1x1x32xf32>
    %cst_35 = arith.constant dense<0.000000e+00> : vector<1xf32>
    %142 = vector.multi_reduction <add>, %141, %cst_35 [1, 2] : vector<1x1x32xf32> to vector<1xf32>
    %143 = vector.shape_cast %142 : vector<1xf32> to vector<1x1x1xf32>
    %144 = vector.extract %143[0, 0, 0] : f32 from vector<1x1x1xf32>
    %cst_36 = arith.constant 0.001953125 : f32
    %145 = arith.mulf %124, %cst_36 : f32
    %cst_37 = arith.constant 0.001953125 : f32
    %146 = arith.mulf %129, %cst_37 : f32
    %cst_38 = arith.constant 0.001953125 : f32
    %147 = arith.mulf %134, %cst_38 : f32
    %148 = arith.mulf %145, %145 : f32
    %149 = arith.subf %147, %148 : f32
    %cst_39 = arith.constant 9.99999974E-6 : f32
    %150 = arith.addf %149, %cst_39 : f32
    %cst_40 = arith.constant 0.001953125 : f32
    %151 = arith.mulf %139, %cst_40 : f32
    %152 = arith.mulf %146, %146 : f32
    %153 = arith.subf %151, %152 : f32
    %cst_41 = arith.constant 9.99999974E-6 : f32
    %154 = arith.addf %153, %cst_41 : f32
    %cst_42 = arith.constant 0.001953125 : f32
    %155 = arith.mulf %144, %cst_42 : f32
    %156 = arith.mulf %145, %146 : f32
    %157 = arith.subf %155, %156 : f32
    %158 = arith.mulf %150, %154 : f32
    %159 = arith.mulf %157, %157 : f32
    %160 = arith.subf %158, %159 : f32
    %161 = math.sqrt %160 : f32
    %162 = arith.addf %150, %154 : f32
    %cst_43 = arith.constant 2.000000e+00 : f32
    %163 = arith.mulf %cst_43, %161 : f32
    %164 = arith.addf %162, %163 : f32
    %165 = math.sqrt %164 : f32
    %166 = arith.mulf %161, %165 : f32
    %cst_44 = arith.constant 1.000000e+00 : f32
    %167 = arith.divf %cst_44, %166 : f32
    %168 = arith.addf %154, %161 : f32
    %169 = arith.mulf %168, %167 : f32
    %170 = arith.addf %150, %161 : f32
    %171 = arith.mulf %170, %167 : f32
    %cst_45 = arith.constant 0.000000e+00 : f32
    %172 = arith.subf %cst_45, %157 : f32
    %173 = arith.mulf %172, %167 : f32
    %174 = arith.mulf %0, %169 : f32
    %175 = arith.mulf %2, %173 : f32
    %176 = arith.addf %174, %175 : f32
    %177 = arith.mulf %0, %173 : f32
    %178 = arith.mulf %2, %171 : f32
    %179 = arith.addf %177, %178 : f32
    %180 = arith.mulf %2, %169 : f32
    %181 = arith.mulf %1, %173 : f32
    %182 = arith.addf %180, %181 : f32
    %183 = arith.mulf %2, %173 : f32
    %184 = arith.mulf %1, %171 : f32
    %185 = arith.addf %183, %184 : f32
    %186 = arith.mulf %176, %145 : f32
    %187 = arith.mulf %179, %146 : f32
    %188 = arith.addf %186, %187 : f32
    %189 = arith.subf %3, %188 : f32
    %190 = arith.mulf %182, %145 : f32
    %191 = arith.mulf %185, %146 : f32
    %192 = arith.addf %190, %191 : f32
    %193 = arith.subf %4, %192 : f32
    %194 = vector.extract_strided_slice %16 {offsets = [0, 0], sizes = [16, 32], strides = [1, 1]} : vector<16x192xf32> to vector<16x32xf32>
    %195 = vector.extract_strided_slice %16 {offsets = [0, 32], sizes = [16, 32], strides = [1, 1]} : vector<16x192xf32> to vector<16x32xf32>
    %196 = vector.broadcast %176 : f32 to vector<16x32xf32>
    %197 = arith.mulf %196, %194 : vector<16x32xf32>
    %198 = vector.broadcast %179 : f32 to vector<16x32xf32>
    %199 = arith.mulf %198, %195 : vector<16x32xf32>
    %200 = arith.addf %197, %199 : vector<16x32xf32>
    %201 = vector.broadcast %189 : f32 to vector<16x32xf32>
    %202 = arith.addf %200, %201 : vector<16x32xf32>
    %203 = vector.broadcast %182 : f32 to vector<16x32xf32>
    %204 = arith.mulf %203, %194 : vector<16x32xf32>
    %205 = vector.broadcast %185 : f32 to vector<16x32xf32>
    %206 = arith.mulf %205, %195 : vector<16x32xf32>
    %207 = arith.addf %204, %206 : vector<16x32xf32>
    %208 = vector.broadcast %193 : f32 to vector<16x32xf32>
    %209 = arith.addf %207, %208 : vector<16x32xf32>
    %210 = arith.addf %112, %202 : vector<16x32xf32>
    %cst_46 = arith.constant 5.000000e-01 : f32
    %211 = vector.broadcast %cst_46 : f32 to vector<16x32xf32>
    %212 = arith.mulf %211, %210 : vector<16x32xf32>
    %213 = math.tanh %212 : vector<16x32xf32>
    %cst_47 = arith.constant 1.000000e+00 : f32
    %214 = vector.broadcast %cst_47 : f32 to vector<16x32xf32>
    %215 = arith.addf %213, %214 : vector<16x32xf32>
    %cst_48 = arith.constant 5.000000e-01 : f32
    %216 = vector.broadcast %cst_48 : f32 to vector<16x32xf32>
    %217 = arith.mulf %216, %215 : vector<16x32xf32>
    %218 = arith.addf %119, %209 : vector<16x32xf32>
    %cst_49 = arith.constant 5.000000e-01 : f32
    %219 = vector.broadcast %cst_49 : f32 to vector<16x32xf32>
    %220 = arith.mulf %219, %218 : vector<16x32xf32>
    %221 = math.tanh %220 : vector<16x32xf32>
    %cst_50 = arith.constant 1.000000e+00 : f32
    %222 = vector.broadcast %cst_50 : f32 to vector<16x32xf32>
    %223 = arith.addf %221, %222 : vector<16x32xf32>
    %cst_51 = arith.constant 5.000000e-01 : f32
    %224 = vector.broadcast %cst_51 : f32 to vector<16x32xf32>
    %225 = arith.mulf %224, %223 : vector<16x32xf32>
    %226 = vector.extract_strided_slice %23 {offsets = [0, 64], sizes = [1, 32], strides = [1, 1]} : vector<1x544xf32> to vector<1x32xf32>
    %227 = vector.shape_cast %226 : vector<1x32xf32> to vector<1x1x32xf32>
    %cst_52 = arith.constant dense<0.000000e+00> : vector<1xf32>
    %228 = vector.multi_reduction <add>, %227, %cst_52 [1, 2] : vector<1x1x32xf32> to vector<1xf32>
    %229 = vector.shape_cast %228 : vector<1xf32> to vector<1x1x1xf32>
    %230 = vector.extract %229[0, 0, 0] : f32 from vector<1x1x1xf32>
    %231 = vector.extract_strided_slice %23 {offsets = [0, 96], sizes = [1, 32], strides = [1, 1]} : vector<1x544xf32> to vector<1x32xf32>
    %232 = vector.shape_cast %231 : vector<1x32xf32> to vector<1x1x32xf32>
    %cst_53 = arith.constant dense<0.000000e+00> : vector<1xf32>
    %233 = vector.multi_reduction <add>, %232, %cst_53 [1, 2] : vector<1x1x32xf32> to vector<1xf32>
    %234 = vector.shape_cast %233 : vector<1xf32> to vector<1x1x1xf32>
    %235 = vector.extract %234[0, 0, 0] : f32 from vector<1x1x1xf32>
    %236 = vector.extract_strided_slice %23 {offsets = [0, 256], sizes = [1, 32], strides = [1, 1]} : vector<1x544xf32> to vector<1x32xf32>
    %237 = vector.shape_cast %236 : vector<1x32xf32> to vector<1x1x32xf32>
    %cst_54 = arith.constant dense<0.000000e+00> : vector<1xf32>
    %238 = vector.multi_reduction <add>, %237, %cst_54 [1, 2] : vector<1x1x32xf32> to vector<1xf32>
    %239 = vector.shape_cast %238 : vector<1xf32> to vector<1x1x1xf32>
    %240 = vector.extract %239[0, 0, 0] : f32 from vector<1x1x1xf32>
    %241 = vector.extract_strided_slice %23 {offsets = [0, 288], sizes = [1, 32], strides = [1, 1]} : vector<1x544xf32> to vector<1x32xf32>
    %242 = vector.shape_cast %241 : vector<1x32xf32> to vector<1x1x32xf32>
    %cst_55 = arith.constant dense<0.000000e+00> : vector<1xf32>
    %243 = vector.multi_reduction <add>, %242, %cst_55 [1, 2] : vector<1x1x32xf32> to vector<1xf32>
    %244 = vector.shape_cast %243 : vector<1xf32> to vector<1x1x1xf32>
    %245 = vector.extract %244[0, 0, 0] : f32 from vector<1x1x1xf32>
    %246 = vector.extract_strided_slice %23 {offsets = [0, 448], sizes = [1, 32], strides = [1, 1]} : vector<1x544xf32> to vector<1x32xf32>
    %247 = vector.shape_cast %246 : vector<1x32xf32> to vector<1x1x32xf32>
    %cst_56 = arith.constant dense<0.000000e+00> : vector<1xf32>
    %248 = vector.multi_reduction <add>, %247, %cst_56 [1, 2] : vector<1x1x32xf32> to vector<1xf32>
    %249 = vector.shape_cast %248 : vector<1xf32> to vector<1x1x1xf32>
    %250 = vector.extract %249[0, 0, 0] : f32 from vector<1x1x1xf32>
    %cst_57 = arith.constant 0.001953125 : f32
    %251 = arith.mulf %230, %cst_57 : f32
    %cst_58 = arith.constant 0.001953125 : f32
    %252 = arith.mulf %235, %cst_58 : f32
    %cst_59 = arith.constant 0.001953125 : f32
    %253 = arith.mulf %240, %cst_59 : f32
    %254 = arith.mulf %251, %251 : f32
    %255 = arith.subf %253, %254 : f32
    %cst_60 = arith.constant 9.99999974E-6 : f32
    %256 = arith.addf %255, %cst_60 : f32
    %cst_61 = arith.constant 0.001953125 : f32
    %257 = arith.mulf %245, %cst_61 : f32
    %258 = arith.mulf %252, %252 : f32
    %259 = arith.subf %257, %258 : f32
    %cst_62 = arith.constant 9.99999974E-6 : f32
    %260 = arith.addf %259, %cst_62 : f32
    %cst_63 = arith.constant 0.001953125 : f32
    %261 = arith.mulf %250, %cst_63 : f32
    %262 = arith.mulf %251, %252 : f32
    %263 = arith.subf %261, %262 : f32
    %264 = arith.mulf %256, %260 : f32
    %265 = arith.mulf %263, %263 : f32
    %266 = arith.subf %264, %265 : f32
    %267 = math.sqrt %266 : f32
    %268 = arith.addf %256, %260 : f32
    %cst_64 = arith.constant 2.000000e+00 : f32
    %269 = arith.mulf %cst_64, %267 : f32
    %270 = arith.addf %268, %269 : f32
    %271 = math.sqrt %270 : f32
    %272 = arith.mulf %267, %271 : f32
    %cst_65 = arith.constant 1.000000e+00 : f32
    %273 = arith.divf %cst_65, %272 : f32
    %274 = arith.addf %260, %267 : f32
    %275 = arith.mulf %274, %273 : f32
    %276 = arith.addf %256, %267 : f32
    %277 = arith.mulf %276, %273 : f32
    %cst_66 = arith.constant 0.000000e+00 : f32
    %278 = arith.subf %cst_66, %263 : f32
    %279 = arith.mulf %278, %273 : f32
    %280 = arith.mulf %0, %275 : f32
    %281 = arith.mulf %2, %279 : f32
    %282 = arith.addf %280, %281 : f32
    %283 = arith.mulf %0, %279 : f32
    %284 = arith.mulf %2, %277 : f32
    %285 = arith.addf %283, %284 : f32
    %286 = arith.mulf %2, %275 : f32
    %287 = arith.mulf %1, %279 : f32
    %288 = arith.addf %286, %287 : f32
    %289 = arith.mulf %2, %279 : f32
    %290 = arith.mulf %1, %277 : f32
    %291 = arith.addf %289, %290 : f32
    %292 = arith.mulf %282, %251 : f32
    %293 = arith.mulf %285, %252 : f32
    %294 = arith.addf %292, %293 : f32
    %295 = arith.subf %3, %294 : f32
    %296 = arith.mulf %288, %251 : f32
    %297 = arith.mulf %291, %252 : f32
    %298 = arith.addf %296, %297 : f32
    %299 = arith.subf %4, %298 : f32
    %300 = vector.extract_strided_slice %10 {offsets = [0, 64], sizes = [16, 32], strides = [1, 1]} : vector<16x192xf32> to vector<16x32xf32>
    %301 = vector.extract_strided_slice %10 {offsets = [0, 96], sizes = [16, 32], strides = [1, 1]} : vector<16x192xf32> to vector<16x32xf32>
    %302 = vector.broadcast %282 : f32 to vector<16x32xf32>
    %303 = arith.mulf %302, %300 : vector<16x32xf32>
    %304 = vector.broadcast %285 : f32 to vector<16x32xf32>
    %305 = arith.mulf %304, %301 : vector<16x32xf32>
    %306 = arith.addf %303, %305 : vector<16x32xf32>
    %307 = vector.broadcast %295 : f32 to vector<16x32xf32>
    %308 = arith.addf %306, %307 : vector<16x32xf32>
    %309 = vector.broadcast %288 : f32 to vector<16x32xf32>
    %310 = arith.mulf %309, %300 : vector<16x32xf32>
    %311 = vector.broadcast %291 : f32 to vector<16x32xf32>
    %312 = arith.mulf %311, %301 : vector<16x32xf32>
    %313 = arith.addf %310, %312 : vector<16x32xf32>
    %314 = vector.broadcast %299 : f32 to vector<16x32xf32>
    %315 = arith.addf %313, %314 : vector<16x32xf32>
    %316 = vector.extract_strided_slice %29 {offsets = [0, 64], sizes = [1, 32], strides = [1, 1]} : vector<1x544xf32> to vector<1x32xf32>
    %317 = vector.shape_cast %316 : vector<1x32xf32> to vector<1x1x32xf32>
    %cst_67 = arith.constant dense<0.000000e+00> : vector<1xf32>
    %318 = vector.multi_reduction <add>, %317, %cst_67 [1, 2] : vector<1x1x32xf32> to vector<1xf32>
    %319 = vector.shape_cast %318 : vector<1xf32> to vector<1x1x1xf32>
    %320 = vector.extract %319[0, 0, 0] : f32 from vector<1x1x1xf32>
    %321 = vector.extract_strided_slice %29 {offsets = [0, 96], sizes = [1, 32], strides = [1, 1]} : vector<1x544xf32> to vector<1x32xf32>
    %322 = vector.shape_cast %321 : vector<1x32xf32> to vector<1x1x32xf32>
    %cst_68 = arith.constant dense<0.000000e+00> : vector<1xf32>
    %323 = vector.multi_reduction <add>, %322, %cst_68 [1, 2] : vector<1x1x32xf32> to vector<1xf32>
    %324 = vector.shape_cast %323 : vector<1xf32> to vector<1x1x1xf32>
    %325 = vector.extract %324[0, 0, 0] : f32 from vector<1x1x1xf32>
    %326 = vector.extract_strided_slice %29 {offsets = [0, 256], sizes = [1, 32], strides = [1, 1]} : vector<1x544xf32> to vector<1x32xf32>
    %327 = vector.shape_cast %326 : vector<1x32xf32> to vector<1x1x32xf32>
    %cst_69 = arith.constant dense<0.000000e+00> : vector<1xf32>
    %328 = vector.multi_reduction <add>, %327, %cst_69 [1, 2] : vector<1x1x32xf32> to vector<1xf32>
    %329 = vector.shape_cast %328 : vector<1xf32> to vector<1x1x1xf32>
    %330 = vector.extract %329[0, 0, 0] : f32 from vector<1x1x1xf32>
    %331 = vector.extract_strided_slice %29 {offsets = [0, 288], sizes = [1, 32], strides = [1, 1]} : vector<1x544xf32> to vector<1x32xf32>
    %332 = vector.shape_cast %331 : vector<1x32xf32> to vector<1x1x32xf32>
    %cst_70 = arith.constant dense<0.000000e+00> : vector<1xf32>
    %333 = vector.multi_reduction <add>, %332, %cst_70 [1, 2] : vector<1x1x32xf32> to vector<1xf32>
    %334 = vector.shape_cast %333 : vector<1xf32> to vector<1x1x1xf32>
    %335 = vector.extract %334[0, 0, 0] : f32 from vector<1x1x1xf32>
    %336 = vector.extract_strided_slice %29 {offsets = [0, 448], sizes = [1, 32], strides = [1, 1]} : vector<1x544xf32> to vector<1x32xf32>
    %337 = vector.shape_cast %336 : vector<1x32xf32> to vector<1x1x32xf32>
    %cst_71 = arith.constant dense<0.000000e+00> : vector<1xf32>
    %338 = vector.multi_reduction <add>, %337, %cst_71 [1, 2] : vector<1x1x32xf32> to vector<1xf32>
    %339 = vector.shape_cast %338 : vector<1xf32> to vector<1x1x1xf32>
    %340 = vector.extract %339[0, 0, 0] : f32 from vector<1x1x1xf32>
    %cst_72 = arith.constant 0.001953125 : f32
    %341 = arith.mulf %320, %cst_72 : f32
    %cst_73 = arith.constant 0.001953125 : f32
    %342 = arith.mulf %325, %cst_73 : f32
    %cst_74 = arith.constant 0.001953125 : f32
    %343 = arith.mulf %330, %cst_74 : f32
    %344 = arith.mulf %341, %341 : f32
    %345 = arith.subf %343, %344 : f32
    %cst_75 = arith.constant 9.99999974E-6 : f32
    %346 = arith.addf %345, %cst_75 : f32
    %cst_76 = arith.constant 0.001953125 : f32
    %347 = arith.mulf %335, %cst_76 : f32
    %348 = arith.mulf %342, %342 : f32
    %349 = arith.subf %347, %348 : f32
    %cst_77 = arith.constant 9.99999974E-6 : f32
    %350 = arith.addf %349, %cst_77 : f32
    %cst_78 = arith.constant 0.001953125 : f32
    %351 = arith.mulf %340, %cst_78 : f32
    %352 = arith.mulf %341, %342 : f32
    %353 = arith.subf %351, %352 : f32
    %354 = arith.mulf %346, %350 : f32
    %355 = arith.mulf %353, %353 : f32
    %356 = arith.subf %354, %355 : f32
    %357 = math.sqrt %356 : f32
    %358 = arith.addf %346, %350 : f32
    %cst_79 = arith.constant 2.000000e+00 : f32
    %359 = arith.mulf %cst_79, %357 : f32
    %360 = arith.addf %358, %359 : f32
    %361 = math.sqrt %360 : f32
    %362 = arith.mulf %357, %361 : f32
    %cst_80 = arith.constant 1.000000e+00 : f32
    %363 = arith.divf %cst_80, %362 : f32
    %364 = arith.addf %350, %357 : f32
    %365 = arith.mulf %364, %363 : f32
    %366 = arith.addf %346, %357 : f32
    %367 = arith.mulf %366, %363 : f32
    %cst_81 = arith.constant 0.000000e+00 : f32
    %368 = arith.subf %cst_81, %353 : f32
    %369 = arith.mulf %368, %363 : f32
    %370 = arith.mulf %0, %365 : f32
    %371 = arith.mulf %2, %369 : f32
    %372 = arith.addf %370, %371 : f32
    %373 = arith.mulf %0, %369 : f32
    %374 = arith.mulf %2, %367 : f32
    %375 = arith.addf %373, %374 : f32
    %376 = arith.mulf %2, %365 : f32
    %377 = arith.mulf %1, %369 : f32
    %378 = arith.addf %376, %377 : f32
    %379 = arith.mulf %2, %369 : f32
    %380 = arith.mulf %1, %367 : f32
    %381 = arith.addf %379, %380 : f32
    %382 = arith.mulf %372, %341 : f32
    %383 = arith.mulf %375, %342 : f32
    %384 = arith.addf %382, %383 : f32
    %385 = arith.subf %3, %384 : f32
    %386 = arith.mulf %378, %341 : f32
    %387 = arith.mulf %381, %342 : f32
    %388 = arith.addf %386, %387 : f32
    %389 = arith.subf %4, %388 : f32
    %390 = vector.extract_strided_slice %16 {offsets = [0, 64], sizes = [16, 32], strides = [1, 1]} : vector<16x192xf32> to vector<16x32xf32>
    %391 = vector.extract_strided_slice %16 {offsets = [0, 96], sizes = [16, 32], strides = [1, 1]} : vector<16x192xf32> to vector<16x32xf32>
    %392 = vector.broadcast %372 : f32 to vector<16x32xf32>
    %393 = arith.mulf %392, %390 : vector<16x32xf32>
    %394 = vector.broadcast %375 : f32 to vector<16x32xf32>
    %395 = arith.mulf %394, %391 : vector<16x32xf32>
    %396 = arith.addf %393, %395 : vector<16x32xf32>
    %397 = vector.broadcast %385 : f32 to vector<16x32xf32>
    %398 = arith.addf %396, %397 : vector<16x32xf32>
    %399 = vector.broadcast %378 : f32 to vector<16x32xf32>
    %400 = arith.mulf %399, %390 : vector<16x32xf32>
    %401 = vector.broadcast %381 : f32 to vector<16x32xf32>
    %402 = arith.mulf %401, %391 : vector<16x32xf32>
    %403 = arith.addf %400, %402 : vector<16x32xf32>
    %404 = vector.broadcast %389 : f32 to vector<16x32xf32>
    %405 = arith.addf %403, %404 : vector<16x32xf32>
    %406 = arith.addf %398, %308 : vector<16x32xf32>
    %cst_82 = arith.constant 5.000000e-01 : f32
    %407 = vector.broadcast %cst_82 : f32 to vector<16x32xf32>
    %408 = arith.mulf %407, %406 : vector<16x32xf32>
    %409 = math.tanh %408 : vector<16x32xf32>
    %cst_83 = arith.constant 1.000000e+00 : f32
    %410 = vector.broadcast %cst_83 : f32 to vector<16x32xf32>
    %411 = arith.addf %409, %410 : vector<16x32xf32>
    %cst_84 = arith.constant 5.000000e-01 : f32
    %412 = vector.broadcast %cst_84 : f32 to vector<16x32xf32>
    %413 = arith.mulf %412, %411 : vector<16x32xf32>
    %414 = arith.addf %405, %315 : vector<16x32xf32>
    %cst_85 = arith.constant 5.000000e-01 : f32
    %415 = vector.broadcast %cst_85 : f32 to vector<16x32xf32>
    %416 = arith.mulf %415, %414 : vector<16x32xf32>
    %417 = math.tanh %416 : vector<16x32xf32>
    %cst_86 = arith.constant 1.000000e+00 : f32
    %418 = vector.broadcast %cst_86 : f32 to vector<16x32xf32>
    %419 = arith.addf %417, %418 : vector<16x32xf32>
    %cst_87 = arith.constant 5.000000e-01 : f32
    %420 = vector.broadcast %cst_87 : f32 to vector<16x32xf32>
    %421 = arith.mulf %420, %419 : vector<16x32xf32>
    %422 = vector.extract_strided_slice %23 {offsets = [0, 128], sizes = [1, 32], strides = [1, 1]} : vector<1x544xf32> to vector<1x32xf32>
    %423 = vector.shape_cast %422 : vector<1x32xf32> to vector<1x1x32xf32>
    %cst_88 = arith.constant dense<0.000000e+00> : vector<1xf32>
    %424 = vector.multi_reduction <add>, %423, %cst_88 [1, 2] : vector<1x1x32xf32> to vector<1xf32>
    %425 = vector.shape_cast %424 : vector<1xf32> to vector<1x1x1xf32>
    %426 = vector.extract %425[0, 0, 0] : f32 from vector<1x1x1xf32>
    %427 = vector.extract_strided_slice %23 {offsets = [0, 160], sizes = [1, 32], strides = [1, 1]} : vector<1x544xf32> to vector<1x32xf32>
    %428 = vector.shape_cast %427 : vector<1x32xf32> to vector<1x1x32xf32>
    %cst_89 = arith.constant dense<0.000000e+00> : vector<1xf32>
    %429 = vector.multi_reduction <add>, %428, %cst_89 [1, 2] : vector<1x1x32xf32> to vector<1xf32>
    %430 = vector.shape_cast %429 : vector<1xf32> to vector<1x1x1xf32>
    %431 = vector.extract %430[0, 0, 0] : f32 from vector<1x1x1xf32>
    %432 = vector.extract_strided_slice %23 {offsets = [0, 320], sizes = [1, 32], strides = [1, 1]} : vector<1x544xf32> to vector<1x32xf32>
    %433 = vector.shape_cast %432 : vector<1x32xf32> to vector<1x1x32xf32>
    %cst_90 = arith.constant dense<0.000000e+00> : vector<1xf32>
    %434 = vector.multi_reduction <add>, %433, %cst_90 [1, 2] : vector<1x1x32xf32> to vector<1xf32>
    %435 = vector.shape_cast %434 : vector<1xf32> to vector<1x1x1xf32>
    %436 = vector.extract %435[0, 0, 0] : f32 from vector<1x1x1xf32>
    %437 = vector.extract_strided_slice %23 {offsets = [0, 352], sizes = [1, 32], strides = [1, 1]} : vector<1x544xf32> to vector<1x32xf32>
    %438 = vector.shape_cast %437 : vector<1x32xf32> to vector<1x1x32xf32>
    %cst_91 = arith.constant dense<0.000000e+00> : vector<1xf32>
    %439 = vector.multi_reduction <add>, %438, %cst_91 [1, 2] : vector<1x1x32xf32> to vector<1xf32>
    %440 = vector.shape_cast %439 : vector<1xf32> to vector<1x1x1xf32>
    %441 = vector.extract %440[0, 0, 0] : f32 from vector<1x1x1xf32>
    %442 = vector.extract_strided_slice %23 {offsets = [0, 512], sizes = [1, 32], strides = [1, 1]} : vector<1x544xf32> to vector<1x32xf32>
    %443 = vector.shape_cast %442 : vector<1x32xf32> to vector<1x1x32xf32>
    %cst_92 = arith.constant dense<0.000000e+00> : vector<1xf32>
    %444 = vector.multi_reduction <add>, %443, %cst_92 [1, 2] : vector<1x1x32xf32> to vector<1xf32>
    %445 = vector.shape_cast %444 : vector<1xf32> to vector<1x1x1xf32>
    %446 = vector.extract %445[0, 0, 0] : f32 from vector<1x1x1xf32>
    %cst_93 = arith.constant 0.001953125 : f32
    %447 = arith.mulf %426, %cst_93 : f32
    %cst_94 = arith.constant 0.001953125 : f32
    %448 = arith.mulf %431, %cst_94 : f32
    %cst_95 = arith.constant 0.001953125 : f32
    %449 = arith.mulf %436, %cst_95 : f32
    %450 = arith.mulf %447, %447 : f32
    %451 = arith.subf %449, %450 : f32
    %cst_96 = arith.constant 9.99999974E-6 : f32
    %452 = arith.addf %451, %cst_96 : f32
    %cst_97 = arith.constant 0.001953125 : f32
    %453 = arith.mulf %441, %cst_97 : f32
    %454 = arith.mulf %448, %448 : f32
    %455 = arith.subf %453, %454 : f32
    %cst_98 = arith.constant 9.99999974E-6 : f32
    %456 = arith.addf %455, %cst_98 : f32
    %cst_99 = arith.constant 0.001953125 : f32
    %457 = arith.mulf %446, %cst_99 : f32
    %458 = arith.mulf %447, %448 : f32
    %459 = arith.subf %457, %458 : f32
    %460 = arith.mulf %452, %456 : f32
    %461 = arith.mulf %459, %459 : f32
    %462 = arith.subf %460, %461 : f32
    %463 = math.sqrt %462 : f32
    %464 = arith.addf %452, %456 : f32
    %cst_100 = arith.constant 2.000000e+00 : f32
    %465 = arith.mulf %cst_100, %463 : f32
    %466 = arith.addf %464, %465 : f32
    %467 = math.sqrt %466 : f32
    %468 = arith.mulf %463, %467 : f32
    %cst_101 = arith.constant 1.000000e+00 : f32
    %469 = arith.divf %cst_101, %468 : f32
    %470 = arith.addf %456, %463 : f32
    %471 = arith.mulf %470, %469 : f32
    %472 = arith.addf %452, %463 : f32
    %473 = arith.mulf %472, %469 : f32
    %cst_102 = arith.constant 0.000000e+00 : f32
    %474 = arith.subf %cst_102, %459 : f32
    %475 = arith.mulf %474, %469 : f32
    %476 = arith.mulf %0, %471 : f32
    %477 = arith.mulf %2, %475 : f32
    %478 = arith.addf %476, %477 : f32
    %479 = arith.mulf %0, %475 : f32
    %480 = arith.mulf %2, %473 : f32
    %481 = arith.addf %479, %480 : f32
    %482 = arith.mulf %2, %471 : f32
    %483 = arith.mulf %1, %475 : f32
    %484 = arith.addf %482, %483 : f32
    %485 = arith.mulf %2, %475 : f32
    %486 = arith.mulf %1, %473 : f32
    %487 = arith.addf %485, %486 : f32
    %488 = arith.mulf %478, %447 : f32
    %489 = arith.mulf %481, %448 : f32
    %490 = arith.addf %488, %489 : f32
    %491 = arith.subf %3, %490 : f32
    %492 = arith.mulf %484, %447 : f32
    %493 = arith.mulf %487, %448 : f32
    %494 = arith.addf %492, %493 : f32
    %495 = arith.subf %4, %494 : f32
    %496 = vector.extract_strided_slice %10 {offsets = [0, 128], sizes = [16, 32], strides = [1, 1]} : vector<16x192xf32> to vector<16x32xf32>
    %497 = vector.extract_strided_slice %10 {offsets = [0, 160], sizes = [16, 32], strides = [1, 1]} : vector<16x192xf32> to vector<16x32xf32>
    %498 = vector.broadcast %478 : f32 to vector<16x32xf32>
    %499 = arith.mulf %498, %496 : vector<16x32xf32>
    %500 = vector.broadcast %481 : f32 to vector<16x32xf32>
    %501 = arith.mulf %500, %497 : vector<16x32xf32>
    %502 = arith.addf %499, %501 : vector<16x32xf32>
    %503 = vector.broadcast %491 : f32 to vector<16x32xf32>
    %504 = arith.addf %502, %503 : vector<16x32xf32>
    %505 = vector.broadcast %484 : f32 to vector<16x32xf32>
    %506 = arith.mulf %505, %496 : vector<16x32xf32>
    %507 = vector.broadcast %487 : f32 to vector<16x32xf32>
    %508 = arith.mulf %507, %497 : vector<16x32xf32>
    %509 = arith.addf %506, %508 : vector<16x32xf32>
    %510 = vector.broadcast %495 : f32 to vector<16x32xf32>
    %511 = arith.addf %509, %510 : vector<16x32xf32>
    %512 = vector.extract_strided_slice %29 {offsets = [0, 128], sizes = [1, 32], strides = [1, 1]} : vector<1x544xf32> to vector<1x32xf32>
    %513 = vector.shape_cast %512 : vector<1x32xf32> to vector<1x1x32xf32>
    %cst_103 = arith.constant dense<0.000000e+00> : vector<1xf32>
    %514 = vector.multi_reduction <add>, %513, %cst_103 [1, 2] : vector<1x1x32xf32> to vector<1xf32>
    %515 = vector.shape_cast %514 : vector<1xf32> to vector<1x1x1xf32>
    %516 = vector.extract %515[0, 0, 0] : f32 from vector<1x1x1xf32>
    %517 = vector.extract_strided_slice %29 {offsets = [0, 160], sizes = [1, 32], strides = [1, 1]} : vector<1x544xf32> to vector<1x32xf32>
    %518 = vector.shape_cast %517 : vector<1x32xf32> to vector<1x1x32xf32>
    %cst_104 = arith.constant dense<0.000000e+00> : vector<1xf32>
    %519 = vector.multi_reduction <add>, %518, %cst_104 [1, 2] : vector<1x1x32xf32> to vector<1xf32>
    %520 = vector.shape_cast %519 : vector<1xf32> to vector<1x1x1xf32>
    %521 = vector.extract %520[0, 0, 0] : f32 from vector<1x1x1xf32>
    %522 = vector.extract_strided_slice %29 {offsets = [0, 320], sizes = [1, 32], strides = [1, 1]} : vector<1x544xf32> to vector<1x32xf32>
    %523 = vector.shape_cast %522 : vector<1x32xf32> to vector<1x1x32xf32>
    %cst_105 = arith.constant dense<0.000000e+00> : vector<1xf32>
    %524 = vector.multi_reduction <add>, %523, %cst_105 [1, 2] : vector<1x1x32xf32> to vector<1xf32>
    %525 = vector.shape_cast %524 : vector<1xf32> to vector<1x1x1xf32>
    %526 = vector.extract %525[0, 0, 0] : f32 from vector<1x1x1xf32>
    %527 = vector.extract_strided_slice %29 {offsets = [0, 352], sizes = [1, 32], strides = [1, 1]} : vector<1x544xf32> to vector<1x32xf32>
    %528 = vector.shape_cast %527 : vector<1x32xf32> to vector<1x1x32xf32>
    %cst_106 = arith.constant dense<0.000000e+00> : vector<1xf32>
    %529 = vector.multi_reduction <add>, %528, %cst_106 [1, 2] : vector<1x1x32xf32> to vector<1xf32>
    %530 = vector.shape_cast %529 : vector<1xf32> to vector<1x1x1xf32>
    %531 = vector.extract %530[0, 0, 0] : f32 from vector<1x1x1xf32>
    %532 = vector.extract_strided_slice %29 {offsets = [0, 512], sizes = [1, 32], strides = [1, 1]} : vector<1x544xf32> to vector<1x32xf32>
    %533 = vector.shape_cast %532 : vector<1x32xf32> to vector<1x1x32xf32>
    %cst_107 = arith.constant dense<0.000000e+00> : vector<1xf32>
    %534 = vector.multi_reduction <add>, %533, %cst_107 [1, 2] : vector<1x1x32xf32> to vector<1xf32>
    %535 = vector.shape_cast %534 : vector<1xf32> to vector<1x1x1xf32>
    %536 = vector.extract %535[0, 0, 0] : f32 from vector<1x1x1xf32>
    %cst_108 = arith.constant 0.001953125 : f32
    %537 = arith.mulf %516, %cst_108 : f32
    %cst_109 = arith.constant 0.001953125 : f32
    %538 = arith.mulf %521, %cst_109 : f32
    %cst_110 = arith.constant 0.001953125 : f32
    %539 = arith.mulf %526, %cst_110 : f32
    %540 = arith.mulf %537, %537 : f32
    %541 = arith.subf %539, %540 : f32
    %cst_111 = arith.constant 9.99999974E-6 : f32
    %542 = arith.addf %541, %cst_111 : f32
    %cst_112 = arith.constant 0.001953125 : f32
    %543 = arith.mulf %531, %cst_112 : f32
    %544 = arith.mulf %538, %538 : f32
    %545 = arith.subf %543, %544 : f32
    %cst_113 = arith.constant 9.99999974E-6 : f32
    %546 = arith.addf %545, %cst_113 : f32
    %cst_114 = arith.constant 0.001953125 : f32
    %547 = arith.mulf %536, %cst_114 : f32
    %548 = arith.mulf %537, %538 : f32
    %549 = arith.subf %547, %548 : f32
    %550 = arith.mulf %542, %546 : f32
    %551 = arith.mulf %549, %549 : f32
    %552 = arith.subf %550, %551 : f32
    %553 = math.sqrt %552 : f32
    %554 = arith.addf %542, %546 : f32
    %cst_115 = arith.constant 2.000000e+00 : f32
    %555 = arith.mulf %cst_115, %553 : f32
    %556 = arith.addf %554, %555 : f32
    %557 = math.sqrt %556 : f32
    %558 = arith.mulf %553, %557 : f32
    %cst_116 = arith.constant 1.000000e+00 : f32
    %559 = arith.divf %cst_116, %558 : f32
    %560 = arith.addf %546, %553 : f32
    %561 = arith.mulf %560, %559 : f32
    %562 = arith.addf %542, %553 : f32
    %563 = arith.mulf %562, %559 : f32
    %cst_117 = arith.constant 0.000000e+00 : f32
    %564 = arith.subf %cst_117, %549 : f32
    %565 = arith.mulf %564, %559 : f32
    %566 = arith.mulf %0, %561 : f32
    %567 = arith.mulf %2, %565 : f32
    %568 = arith.addf %566, %567 : f32
    %569 = arith.mulf %0, %565 : f32
    %570 = arith.mulf %2, %563 : f32
    %571 = arith.addf %569, %570 : f32
    %572 = arith.mulf %2, %561 : f32
    %573 = arith.mulf %1, %565 : f32
    %574 = arith.addf %572, %573 : f32
    %575 = arith.mulf %2, %565 : f32
    %576 = arith.mulf %1, %563 : f32
    %577 = arith.addf %575, %576 : f32
    %578 = arith.mulf %568, %537 : f32
    %579 = arith.mulf %571, %538 : f32
    %580 = arith.addf %578, %579 : f32
    %581 = arith.subf %3, %580 : f32
    %582 = arith.mulf %574, %537 : f32
    %583 = arith.mulf %577, %538 : f32
    %584 = arith.addf %582, %583 : f32
    %585 = arith.subf %4, %584 : f32
    %586 = vector.extract_strided_slice %16 {offsets = [0, 128], sizes = [16, 32], strides = [1, 1]} : vector<16x192xf32> to vector<16x32xf32>
    %587 = vector.extract_strided_slice %16 {offsets = [0, 160], sizes = [16, 32], strides = [1, 1]} : vector<16x192xf32> to vector<16x32xf32>
    %588 = vector.broadcast %568 : f32 to vector<16x32xf32>
    %589 = arith.mulf %588, %586 : vector<16x32xf32>
    %590 = vector.broadcast %571 : f32 to vector<16x32xf32>
    %591 = arith.mulf %590, %587 : vector<16x32xf32>
    %592 = arith.addf %589, %591 : vector<16x32xf32>
    %593 = vector.broadcast %581 : f32 to vector<16x32xf32>
    %594 = arith.addf %592, %593 : vector<16x32xf32>
    %595 = vector.broadcast %574 : f32 to vector<16x32xf32>
    %596 = arith.mulf %595, %586 : vector<16x32xf32>
    %597 = vector.broadcast %577 : f32 to vector<16x32xf32>
    %598 = arith.mulf %597, %587 : vector<16x32xf32>
    %599 = arith.addf %596, %598 : vector<16x32xf32>
    %600 = vector.broadcast %585 : f32 to vector<16x32xf32>
    %601 = arith.addf %599, %600 : vector<16x32xf32>
    %602 = arith.mulf %217, %594 : vector<16x32xf32>
    %603 = arith.addf %504, %602 : vector<16x32xf32>
    %604 = arith.mulf %225, %601 : vector<16x32xf32>
    %605 = arith.subf %603, %604 : vector<16x32xf32>
    %606 = arith.mulf %217, %601 : vector<16x32xf32>
    %607 = arith.addf %511, %606 : vector<16x32xf32>
    %608 = arith.mulf %225, %594 : vector<16x32xf32>
    %609 = arith.addf %607, %608 : vector<16x32xf32>
    %610 = arith.mulf %605, %605 : vector<16x32xf32>
    %611 = arith.mulf %609, %609 : vector<16x32xf32>
    %612 = arith.mulf %605, %609 : vector<16x32xf32>
    %613 = tpu.concatenate %605, %609, %610, %611, %612 in 1 : vector<16x32xf32>, vector<16x32xf32>, vector<16x32xf32>, vector<16x32xf32>, vector<16x32xf32> -> vector<16x160xf32>
    %cst_118 = arith.constant dense<0.000000e+00> : vector<1x160xf32>
    %614 = tpu.matmul %17, %613, %cst_118 {dimension_numbers = #tpu.dot_dimension_numbers<[1], [0], [0], [1], [0, 0, 1, 1], [], []>} : vector<1x16xf32>, vector<16x160xf32>, vector<1x160xf32> -> vector<1x160xf32>
    %615 = vector.extract_strided_slice %614 {offsets = [0, 0], sizes = [1, 32], strides = [1, 1]} : vector<1x160xf32> to vector<1x32xf32>
    %616 = vector.shape_cast %615 : vector<1x32xf32> to vector<1x1x32xf32>
    %cst_119 = arith.constant dense<0.000000e+00> : vector<1xf32>
    %617 = vector.multi_reduction <add>, %616, %cst_119 [1, 2] : vector<1x1x32xf32> to vector<1xf32>
    %618 = vector.shape_cast %617 : vector<1xf32> to vector<1x1x1xf32>
    %619 = vector.extract %618[0, 0, 0] : f32 from vector<1x1x1xf32>
    %620 = vector.extract_strided_slice %614 {offsets = [0, 32], sizes = [1, 32], strides = [1, 1]} : vector<1x160xf32> to vector<1x32xf32>
    %621 = vector.shape_cast %620 : vector<1x32xf32> to vector<1x1x32xf32>
    %cst_120 = arith.constant dense<0.000000e+00> : vector<1xf32>
    %622 = vector.multi_reduction <add>, %621, %cst_120 [1, 2] : vector<1x1x32xf32> to vector<1xf32>
    %623 = vector.shape_cast %622 : vector<1xf32> to vector<1x1x1xf32>
    %624 = vector.extract %623[0, 0, 0] : f32 from vector<1x1x1xf32>
    %625 = vector.extract_strided_slice %614 {offsets = [0, 64], sizes = [1, 32], strides = [1, 1]} : vector<1x160xf32> to vector<1x32xf32>
    %626 = vector.shape_cast %625 : vector<1x32xf32> to vector<1x1x32xf32>
    %cst_121 = arith.constant dense<0.000000e+00> : vector<1xf32>
    %627 = vector.multi_reduction <add>, %626, %cst_121 [1, 2] : vector<1x1x32xf32> to vector<1xf32>
    %628 = vector.shape_cast %627 : vector<1xf32> to vector<1x1x1xf32>
    %629 = vector.extract %628[0, 0, 0] : f32 from vector<1x1x1xf32>
    %630 = vector.extract_strided_slice %614 {offsets = [0, 96], sizes = [1, 32], strides = [1, 1]} : vector<1x160xf32> to vector<1x32xf32>
    %631 = vector.shape_cast %630 : vector<1x32xf32> to vector<1x1x32xf32>
    %cst_122 = arith.constant dense<0.000000e+00> : vector<1xf32>
    %632 = vector.multi_reduction <add>, %631, %cst_122 [1, 2] : vector<1x1x32xf32> to vector<1xf32>
    %633 = vector.shape_cast %632 : vector<1xf32> to vector<1x1x1xf32>
    %634 = vector.extract %633[0, 0, 0] : f32 from vector<1x1x1xf32>
    %635 = vector.extract_strided_slice %614 {offsets = [0, 128], sizes = [1, 32], strides = [1, 1]} : vector<1x160xf32> to vector<1x32xf32>
    %636 = vector.shape_cast %635 : vector<1x32xf32> to vector<1x1x32xf32>
    %cst_123 = arith.constant dense<0.000000e+00> : vector<1xf32>
    %637 = vector.multi_reduction <add>, %636, %cst_123 [1, 2] : vector<1x1x32xf32> to vector<1xf32>
    %638 = vector.shape_cast %637 : vector<1xf32> to vector<1x1x1xf32>
    %639 = vector.extract %638[0, 0, 0] : f32 from vector<1x1x1xf32>
    %cst_124 = arith.constant 0.001953125 : f32
    %640 = arith.mulf %619, %cst_124 : f32
    %cst_125 = arith.constant 0.001953125 : f32
    %641 = arith.mulf %624, %cst_125 : f32
    %cst_126 = arith.constant 0.001953125 : f32
    %642 = arith.mulf %629, %cst_126 : f32
    %643 = arith.mulf %640, %640 : f32
    %644 = arith.subf %642, %643 : f32
    %cst_127 = arith.constant 9.99999974E-6 : f32
    %645 = arith.addf %644, %cst_127 : f32
    %cst_128 = arith.constant 0.001953125 : f32
    %646 = arith.mulf %634, %cst_128 : f32
    %647 = arith.mulf %641, %641 : f32
    %648 = arith.subf %646, %647 : f32
    %cst_129 = arith.constant 9.99999974E-6 : f32
    %649 = arith.addf %648, %cst_129 : f32
    %cst_130 = arith.constant 0.001953125 : f32
    %650 = arith.mulf %639, %cst_130 : f32
    %651 = arith.mulf %640, %641 : f32
    %652 = arith.subf %650, %651 : f32
    %653 = arith.mulf %645, %649 : f32
    %654 = arith.mulf %652, %652 : f32
    %655 = arith.subf %653, %654 : f32
    %656 = math.sqrt %655 : f32
    %657 = arith.addf %645, %649 : f32
    %cst_131 = arith.constant 2.000000e+00 : f32
    %658 = arith.mulf %cst_131, %656 : f32
    %659 = arith.addf %657, %658 : f32
    %660 = math.sqrt %659 : f32
    %661 = arith.mulf %656, %660 : f32
    %cst_132 = arith.constant 1.000000e+00 : f32
    %662 = arith.divf %cst_132, %661 : f32
    %663 = arith.addf %649, %656 : f32
    %664 = arith.mulf %663, %662 : f32
    %665 = arith.addf %645, %656 : f32
    %666 = arith.mulf %665, %662 : f32
    %cst_133 = arith.constant 0.000000e+00 : f32
    %667 = arith.subf %cst_133, %652 : f32
    %668 = arith.mulf %667, %662 : f32
    %669 = arith.mulf %0, %664 : f32
    %670 = arith.mulf %2, %668 : f32
    %671 = arith.addf %669, %670 : f32
    %672 = arith.mulf %0, %668 : f32
    %673 = arith.mulf %2, %666 : f32
    %674 = arith.addf %672, %673 : f32
    %675 = arith.mulf %2, %664 : f32
    %676 = arith.mulf %1, %668 : f32
    %677 = arith.addf %675, %676 : f32
    %678 = arith.mulf %2, %668 : f32
    %679 = arith.mulf %1, %666 : f32
    %680 = arith.addf %678, %679 : f32
    %681 = arith.mulf %671, %640 : f32
    %682 = arith.mulf %674, %641 : f32
    %683 = arith.addf %681, %682 : f32
    %684 = arith.subf %3, %683 : f32
    %685 = arith.mulf %677, %640 : f32
    %686 = arith.mulf %680, %641 : f32
    %687 = arith.addf %685, %686 : f32
    %688 = arith.subf %4, %687 : f32
    %689 = vector.broadcast %671 : f32 to vector<16x32xf32>
    %690 = arith.mulf %689, %605 : vector<16x32xf32>
    %691 = vector.broadcast %674 : f32 to vector<16x32xf32>
    %692 = arith.mulf %691, %609 : vector<16x32xf32>
    %693 = arith.addf %690, %692 : vector<16x32xf32>
    %694 = vector.broadcast %684 : f32 to vector<16x32xf32>
    %695 = arith.addf %693, %694 : vector<16x32xf32>
    %696 = math.tanh %695 : vector<16x32xf32>
    %697 = vector.broadcast %677 : f32 to vector<16x32xf32>
    %698 = arith.mulf %697, %605 : vector<16x32xf32>
    %699 = vector.broadcast %680 : f32 to vector<16x32xf32>
    %700 = arith.mulf %699, %609 : vector<16x32xf32>
    %701 = arith.addf %698, %700 : vector<16x32xf32>
    %702 = vector.broadcast %688 : f32 to vector<16x32xf32>
    %703 = arith.addf %701, %702 : vector<16x32xf32>
    %704 = math.tanh %703 : vector<16x32xf32>
    %705 = tpu.concatenate %217, %225, %413, %421, %696, %704 in 1 : vector<16x32xf32>, vector<16x32xf32>, vector<16x32xf32>, vector<16x32xf32>, vector<16x32xf32>, vector<16x32xf32> -> vector<16x192xf32>
    %706 = arith.truncf %705 : vector<16x192xf32> to vector<16x192xbf16>
    %c0_134 = arith.constant 0 : index
    %c0_135 = arith.constant 0 : index
    %707 = vector.load %arg7[%c0_134, %c0_135] : memref<16x192xbf16, #tpu.memory_space<vmem>>, vector<16x192xbf16>
    tpu.vector_store %arg7[%c0_134, %c0_135], %706 {strides = array<i32>} : memref<16x192xbf16, #tpu.memory_space<vmem>>, vector<16x192xbf16>,
    return
  }
  func.func @transform_0(%arg0: i32) -> i32 {
    %c0_i32 = arith.constant 0 : i32
    %c0_i32_0 = arith.constant 0 : i32
    return %c0_i32 : i32
  }
  func.func @transform_1(%arg0: i32) -> (i32, i32) {
    %c0_i32 = arith.constant 0 : i32
    %c0_i32_0 = arith.constant 0 : i32
    %c0_i32_1 = arith.constant 0 : i32
    return %c0_i32, %c0_i32_0 : i32, i32
  }
  func.func @transform_2(%arg0: i32) -> (i32, i32) {
    %c0_i32 = arith.constant 0 : i32
    %c0_i32_0 = arith.constant 0 : i32
    %c0_i32_1 = arith.constant 0 : i32
    return %c0_i32, %c0_i32_0 : i32, i32
  }
  func.func @transform_3(%arg0: i32) -> (i32, i32) {
    %c0_i32 = arith.constant 0 : i32
    %c0_i32_0 = arith.constant 0 : i32
    %c0_i32_1 = arith.constant 0 : i32
    return %c0_i32, %c0_i32_0 : i32, i32
  }
  func.func @transform_4(%arg0: i32) -> (i32, i32) {
    %c0_i32 = arith.constant 0 : i32
    %c0_i32_0 = arith.constant 0 : i32
    %c0_i32_1 = arith.constant 0 : i32
    return %c0_i32, %c0_i32_0 : i32, i32
  }
  func.func @transform_5(%arg0: i32) -> (i32, i32) {
    %c0_i32 = arith.constant 0 : i32
    %c0_i32_0 = arith.constant 0 : i32
    %c0_i32_1 = arith.constant 0 : i32
    return %c0_i32, %c0_i32_0 : i32, i32
  }
  func.func @transform_6(%arg0: i32) -> (i32, i32) {
    %c0_i32 = arith.constant 0 : i32
    %c0_i32_0 = arith.constant 0 : i32
    %c0_i32_1 = arith.constant 0 : i32
    return %c0_i32, %c0_i32_0 : i32, i32
  }
}

</mosaic_0001>

<bundles_post_ra>
// kernel: tpu_custom_call.1
= control target key start
LH: loop header
LB: loop body
LE: loop exit
PB: predicated region body
PF: predicated region fallthrough
CT: control target
= control target key end

     0   :  { %s3760_s0 = inlined_call_operand.hbm [shape: f32[8], index: 0, kind: input, shape index: {}]   ;;  %s3761_s1 = inlined_call_operand.hbm [shape: f32[16,32], index: 1, kind: input, shape index: {}]   ;;  %s3762_s2 = inlined_call_operand.hbm [shape: f32[16,64], index: 2, kind: input, shape index: {}]   ;;  %s3763_s3 = inlined_call_operand.hbm [shape: f32[32,192], index: 3, kind: input, shape index: {}]   ;;  %s3764_s4 = inlined_call_operand.hbm [shape: f32[64,192], index: 4, kind: input, shape index: {}]   ;;  %s3765_s5 = inlined_call_operand.vmem [shape: f32[2,192], index: 5, kind: input, shape index: {}]   ;;  %s3766_s6 = inlined_call_operand.hbm [shape: bf16[16,192], index: 6, kind: output, shape index: {}]  }
   0x1   :  { %3793 = sst [smem:[#allocation30_spill]] %s3766_s6 }
   0x2   :  { %11 = vsyncpa [#allocation5], 0 }
   0x3   :  { %12 = vsyncpa [#allocation3], 0 }
   0x4   :  { %13 = vsyncpa [#allocation8], 0 }
   0x5   :  { %14 = vsyncpa [#allocation11], 0 }
   0x6   :  { %15 = vsyncpa [#allocation4], 0  ;;  %s2679_s21 = smov [#allocation7]   ;;  %s2680_s23 = smov [#allocation6]  }
   0x7   :  { %s41_s22 = sshll.u32 %s2679_s21, 4  ;;  %s29_s24 = sshll.u32 %s2680_s23, 4  ;;  %s42_s22 = int_to_ptr.vmem [resolvable:$true] %s41_s22  ;;  %s30_s24 = int_to_ptr.vmem [resolvable:$true] %s29_s24 }
   0x8   :  { %s2549_s27 = scalar_lea.hbm %s3762_s2, 256 }
   0x9   :  { %p2550_p0 = scmp.ne.s32.totalorder %s3762_s2, %s2549_s27  ;;  %p2553_p1 = scmp.lt.u32.totalorder %s2549_s27, %s3762_s2 }
   0xb   :  { %p2555_p2 = pnand %p2553_p1, %p2550_p0 }
   0xd   :  { %2558 = shalt.err (!%p2555_p2)
}
   0xe   :  { %s2559_s8 = scalar_lea.vmem %s42_s22, 256  ;;  %p2564_p4 = scmp.lt.s32.totalorder %s42_s22, %s42_s22 }
   0xf   :  { %p2560_p3 = scmp.ne.s32.totalorder %s42_s22, %s2559_s8  ;;  %p2565_p5 = scmp.lt.s32.totalorder %s2559_s8, %s2559_s8 }
  0x11   :  { %p2566_p6 = por %p2565_p5, %p2564_p4 }
  0x13   :  { %p2567_p7 = pnand %p2566_p6, %p2560_p3 }
  0x15   :  { %2570 = shalt.err (!%p2567_p7)
}
  0x16   :  { %s3767_s9 = smov 128   ;;  %s3768_s10 = smov 8  }
  0x17   :  { %47 = dma.hbm_to_vmem [thread:$0]  %s3762_s2, 256, %s42_s22, [#allocation8], %s3767_s9, %s3767_s9, %s3768_s10  }
  0x18   :  { %s2571_s15 = scalar_lea.hbm %s3760_s0, 16 }
  0x19   :  { %p2572_p8 = scmp.ne.s32.totalorder %s3760_s0, %s2571_s15  ;;  %p2575_p9 = scmp.lt.u32.totalorder %s2571_s15, %s3760_s0 }
  0x1b   :  { %p2577_p10 = pnand %p2575_p9, %p2572_p8 }
  0x1d   :  { %2580 = shalt.err (!%p2577_p10)
}
  0x1e   :  { %s2683_s20 = smov [#allocation2]   ;;  %s2581_s25 = scalar_lea.hbm %s3761_s1, 256 }
  0x1f   :  { %23 = dma.hbm_to_smem %s3760_s0, 16, %s2683_s20, [#allocation5]  }
  0x20   :  { %p2582_p11 = scmp.ne.s32.totalorder %s3761_s1, %s2581_s25  ;;  %p2585_p12 = scmp.lt.u32.totalorder %s2581_s25, %s3761_s1 }
  0x22   :  { %p2587_p13 = pnand %p2585_p12, %p2582_p11 }
  0x24   :  { %2590 = shalt.err (!%p2587_p13)
}
  0x25   :  { %s2591_s30 = scalar_lea.vmem %s30_s24, 256  ;;  %p2596_p1 = scmp.lt.s32.totalorder %s30_s24, %s30_s24 }
  0x26   :  { %p2592_p0 = scmp.ne.s32.totalorder %s30_s24, %s2591_s30  ;;  %p2597_p2 = scmp.lt.s32.totalorder %s2591_s30, %s2591_s30 }
  0x28   :  { %p2598_p3 = por %p2597_p2, %p2596_p1 }
  0x2a   :  { %p2599_p4 = pnand %p2598_p3, %p2592_p0 }
  0x2c   :  { %2602 = shalt.err (!%p2599_p4)
}
  0x2d   :  { %35 = dma.hbm_to_vmem [thread:$0]  %s3761_s1, 256, %s30_s24, [#allocation3], %s3767_s9, %s3767_s9, %s3768_s10  }
  0x2e   :  { %s2684_s8 = smov [#allocation9]   ;;  %s2603_s14 = scalar_lea.hbm %s3763_s3, 1024 }
  0x2f   :  { %s53_s11 = sshll.u32 %s2684_s8, 4  ;;  %p2604_p5 = scmp.ne.s32.totalorder %s3763_s3, %s2603_s14  ;;  %s54_s11 = int_to_ptr.vmem [resolvable:$true] %s53_s11 }
  0x30   :  { %p2607_p6 = scmp.lt.u32.totalorder %s2603_s14, %s3763_s3 }
  0x32   :  { %p2609_p7 = pnand %p2607_p6, %p2604_p5 }
  0x34   :  { %2612 = shalt.err (!%p2609_p7)
}
  0x35   :  { %s2613_s19 = scalar_lea.vmem %s54_s11, 1024  ;;  %p2618_p9 = scmp.lt.s32.totalorder %s54_s11, %s54_s11 }
  0x36   :  { %p2614_p8 = scmp.ne.s32.totalorder %s54_s11, %s2613_s19  ;;  %p2619_p10 = scmp.lt.s32.totalorder %s2613_s19, %s2613_s19 }
  0x38   :  { %p2620_p11 = por %p2619_p10, %p2618_p9 }
  0x3a   :  { %p2621_p12 = pnand %p2620_p11, %p2614_p8 }
  0x3c   :  { %2624 = shalt.err (!%p2621_p12)
}
  0x3d   :  { %s2685_s1 = smov 256   ;;  %s2686_s24 = smov 16  }
  0x3e   :  { %59 = dma.hbm_to_vmem [thread:$0]  %s3763_s3, 1024, %s54_s11, [#allocation8], %s2685_s1, %s2685_s1, %s2686_s24  }
  0x3f   :  { %s2687_s23 = smov [#allocation10]   ;;  %s2625_s26 = scalar_lea.hbm %s3764_s4, 2048 }
  0x40   :  { %s65_s2 = sshll.u32 %s2687_s23, 4  ;;  %p2626_p13 = scmp.ne.s32.totalorder %s3764_s4, %s2625_s26  ;;  %s66_s2 = int_to_ptr.vmem [resolvable:$true] %s65_s2 }
  0x41   :  { %p2629_p0 = scmp.lt.u32.totalorder %s2625_s26, %s3764_s4 }
  0x43   :  { %p2631_p1 = pnand %p2629_p0, %p2626_p13 }
  0x45   :  { %2634 = shalt.err (!%p2631_p1)
}
  0x46   :  { %s2635_s0 = scalar_lea.vmem %s66_s2, 2048  ;;  %p2640_p3 = scmp.lt.s32.totalorder %s66_s2, %s66_s2 }
  0x47   :  { %p2636_p2 = scmp.ne.s32.totalorder %s66_s2, %s2635_s0  ;;  %p2641_p4 = scmp.lt.s32.totalorder %s2635_s0, %s2635_s0 }
  0x49   :  { %p2642_p5 = por %p2641_p4, %p2640_p3 }
  0x4b   :  { %p2643_p6 = pnand %p2642_p5, %p2636_p2 }
  0x4d   :  { %2646 = shalt.err (!%p2643_p6)
}
  0x4e   :  { %71 = dma.hbm_to_vmem [thread:$0]  %s3764_s4, 2048, %s66_s2, [#allocation11], %s2685_s1, %s2685_s1, %s2686_s24  }
  0x4f   :  { %2669 = dma.done.wait [#allocation5], 16  }
  0x50   :  { %2670 = vsyncadd [#allocation5], 4294967280 }
  0x51   :  { %2671 = dma.done.wait [#allocation3], 256  }
  0x52   :  { %2672 = vsyncadd [#allocation3], 4294967040 }
  0x53   :  { %2673 = dma.done.wait [#allocation8], 1280  }
  0x54   :  { %2674 = vsyncadd [#allocation8], 4294966016 }
  0x55   :  { %2675 = dma.done.wait [#allocation11], 2048  }
  0x56   :  { %2676 = vsyncadd [#allocation11], 4294965248 }
  0x57   :  { %89 = sfence }
  0x58   :  { %v98_v0 = vld [vmem:[#allocation9 + $0x8] sm:$0xff]  ;;  %v100_v1 = vld [vmem:[#allocation9 + $0x18] sm:$0xff]  ;;  %v97_v2 = vld [vmem:[#allocation9] sm:$0xff]  ;;  %v2688_v7 = vmov 0.0   ;;  %vm117_vm0 = vcmask 261120   ;;  %vm232_vm1 = vcmask 523264   ;;  %v107_v41 = vlaneseq }
  0x59   :  { %v2254_v3 = vpack.c.bf16 %v100_v1, %v98_v0  ;;  %v99_v4 = vld [vmem:[#allocation9 + $0x10] sm:$0xff]  ;;  %v102_v5 = vld [vmem:[#allocation9 + $0x28] sm:$0xff]  ;;  %v104_v6 = vld [vmem:[#allocation9 + $0x38] sm:$0xff]  ;;  %188 = vmatprep.mubr.f32.mxu0 %v2688_v7  ;;  %303 = vmatprep.mubr.f32.mxu1 %v2688_v7  ;;  %s3773_s11 = smov 96   ;;  %vm328_vm2 = vcmask 785408   ;;  %vm363_vm3 = vcmask 130048  }
  0x5a   :  { %v2256_v8 = vpack.c.bf16 %v99_v4, %v97_v2  ;;  %v2258_v9 = vpack.c.bf16 %v104_v6, %v102_v5  ;;  %v101_v10 = vld [vmem:[#allocation9 + $0x20] sm:$0xff]  ;;  %v103_v11 = vld [vmem:[#allocation9 + $0x30] sm:$0xff]  ;;  %v204_v12 = vld [vmem:[#allocation10 + $0x8] sm:$0xff]  ;;  %v108_v42 = vshrl.u32 %v107_v41, 7  ;;  %vm2693_vm4 = vmmov 0   ;;  %s3771_s14 = smov 32  }
  0x5b   :  { %2255 = vmatprep.subr.bf16.mxu0 %v2254_v3  ;;  %v206_v13 = vld [vmem:[#allocation10 + $0x18] sm:$0xff]  ;;  %v2260_v14 = vpack.c.bf16 %v103_v11, %v101_v10  ;;  %v203_v16 = vld [vmem:[#allocation10] sm:$0xff]  ;;  %v205_v17 = vld [vmem:[#allocation10 + $0x10] sm:$0xff]  ;;  %vm837_vm5 = vcmask 253952  }
  0x5c   :  { %2257 = vmatpush1.bf16.msra.mxu0 %v2256_v8  ;;  %v2262_v15 = vpack.c.bf16 %v206_v13, %v204_v12  ;;  %v208_v18 = vld [vmem:[#allocation10 + $0x28] sm:$0xff]  ;;  %v2264_v19 = vpack.c.bf16 %v205_v17, %v203_v16  ;;  %v210_v20 = vld [vmem:[#allocation10 + $0x38] sm:$0xff]  ;;  %v207_v21 = vld [vmem:[#allocation10 + $0x20] sm:$0xff]  ;;  %v113_v43 = vsub.s32 1, %v108_v42  ;;  %v109_v45 = vsub.s32 0, %v108_v42 }
  0x5d   :  { %2259 = vmatprep.subr.bf16.mxu0 %v2258_v9  ;;  %v209_v22 = vld [vmem:[#allocation10 + $0x30] sm:$0xff]  ;;  %v2266_v23 = vpack.c.bf16 %v210_v20, %v208_v18  ;;  %v212_v24 = vld [vmem:[#allocation10 + $0x48] sm:$0xff]  ;;  %v214_v25 = vld [vmem:[#allocation10 + $0x58] sm:$0xff] }
  0x5e   :  { %2263 = vmatprep.subr.bf16.mxu1 %v2262_v15  ;;  %v2268_v26 = vpack.c.bf16 %v209_v22, %v207_v21  ;;  %v95_v27 = vld [vmem:[#allocation6] sm:$0xff]  ;;  %v2270_v28 = vpack.c.bf16 %v214_v25, %v212_v24  ;;  %v213_v30 = vld [vmem:[#allocation10 + $0x50] sm:$0xff]  ;;  %v216_v31 = vld [vmem:[#allocation10 + $0x68] sm:$0xff] }
  0x5f   :  { %2265 = vmatpush1.bf16.msra.mxu1 %v2264_v19  ;;  %v211_v29 = vld [vmem:[#allocation10 + $0x40] sm:$0xff]  ;;  %v218_v32 = vld [vmem:[#allocation10 + $0x78] sm:$0xff]  ;;  %v96_v34 = vld [vmem:[#allocation6 + $0x8] sm:$0xff] }
  0x60   :  { %2261 = vmatpush1.bf16.msra.mxu0 %v2260_v14  ;;  %2267 = vmatprep.subr.bf16.mxu1 %v2266_v23  ;;  %v2272_v33 = vpack.c.bf16 %v213_v30, %v211_v29  ;;  %v2274_v35 = vpack.c.bf16 %v218_v32, %v216_v31  ;;  %v215_v36 = vld [vmem:[#allocation10 + $0x60] sm:$0xff]  ;;  %v217_v37 = vld [vmem:[#allocation10 + $0x70] sm:$0xff]  ;;  %v202_v40 = vld [vmem:[#allocation7 + $0x8] sm:$0xff] }
  0x61   :  { %v2276_v38 = vpack.c.bf16 %v217_v37, %v215_v36  ;;  %v201_v39 = vld [vmem:[#allocation7] sm:$0xff]  ;;  %v105_v44 = vld [vmem:[%s3765_s5] ss:$2 sm:$0x3] }
  0x62   :  { %v114_v46 = vrot.slane %v105_v44, %v113_v43  ;;  %v110_v47 = vrot.slane %v105_v44, %v109_v45  ;;  %v2220_v55 = vld [vmem:[%s3765_s5 + $0x1] ss:$2 sm:$0x3]  ;;  %s3769_s5 = smov 64  }
  0x63   :  { %2218 = vmatmul.mubr.msk.f32.vlgmr.msra.gmra.mrb[0].mxu0 %vm117_vm0, %v95_v27  ;;  %2269 = vmatpush1.bf16.msra.mxu1 %v2268_v26  ;;  %v225_v61 = vrot.slane %v2220_v55, %v109_v45  ;;  %v229_v3 = vrot.slane %v2220_v55, %v113_v43 }
  0x64   :  { %194 = vmatprep.mubr.f32.mxu0 %v2688_v7  ;;  %2271 = vmatprep.subr.bf16.mxu1 %v2270_v28 }
  0x67   :  { %2219 = vmatmul.mubr.msk.f32.gmra.mrb[2].mxu0 %vm117_vm0, %v96_v34  ;;  %2273 = vmatpush1.bf16.msra.mxu1 %v2272_v33 }
  0x68   :  { %2275 = vmatprep.subr.bf16.mxu1 %v2274_v35  ;;  %431 = vmatprep.mubr.f32.mxu0 %v2688_v7 }
  0x6b   :  { %2277 = vmatpush1.bf16.msra.mxu1 %v2276_v38  ;;  %v2691_v38 = vmov 1.0  }
  0x6e   :  { %2221 = vmatmul.mubr.msk.f32.vlgmr.msra.gmra.mrb[0].mxu1 %vm232_vm1, %v201_v39 }
  0x6f   :  { %309 = vmatprep.mubr.f32.mxu1 %v2688_v7 }
  0x72   :  { %2222 = vmatmul.mubr.msk.f32.gmra.mrb[2].mxu1 %vm232_vm1, %v202_v40 }
  0x73   :  { %689 = vmatprep.mubr.f32.mxu1 %v2688_v7 }
 0x136   :  { %v190_v48 = vpop.f32.mrb[0].mxu0 }
 0x137   :  { %v192_v49 = vpop.f32.mrb[1].mxu0  ;;  %v2812_v51 = vadd.f32 %v190_v48, %v110_v47 }
 0x138   :  { %v2810_v50 = vadd.f32 %v192_v49, %v114_v46 }
 0x139   :  { %v339_v57 = vmul.f32 %v2812_v51, %v2812_v51 }
 0x13a   :  { %v196_v52 = vpop.f32.mrb[2].mxu0  ;;  %322 = vrot.lane.b32.xlu1 %v2810_v50, %s3773_s11  ;;  %v340_v59 = vmul.f32 %v2810_v50, %v2810_v50 }
 0x13b   :  { %v2816_v53 = vadd.f32 %v196_v52, %v110_v47  ;;  %v198_v54 = vpop.f32.mrb[3].mxu0  ;;  %v2692_v52 = vmov 0.0|0.0  }
 0x13c   :  { %v2821_v56 = vadd.f32 %v198_v54, %v114_v46 }
 0x13d   :  { %v341_v58 = vmul.f32 %v2816_v53, %v2816_v53  ;;  %v2280_v26 = vpack.c.bf16 %v2816_v53, %v2812_v51 }
 0x13e   :  { %324 = vrot.lane.b32.xlu1 %v2816_v53, %s3773_s11  ;;  %v342_v60 = vmul.f32 %v2821_v56, %v2821_v56 }
 0x13f   :  { %v2433_v62 = vpack.i.bf16 %v341_v58, %v339_v57 }
 0x140   :  { %v2438_v63 = vpack.i.bf16 %v342_v60, %v340_v59 }
 0x141   :  { %2434 = vrot.lane.b32.xlu0 %v2433_v62, %s3769_s5  ;;  %v305_v0 = vpop.f32.mrb[0].mxu1 }
 0x142   :  { %2439 = vrot.lane.b32.xlu1 %v2438_v63, %s3769_s5  ;;  %v2835_v1 = vadd.f32 %v305_v0, %v225_v61  ;;  %v307_v2 = vpop.f32.mrb[1].mxu1 }
 0x143   :  { %v2845_v9 = vadd.f32 %v307_v2, %v229_v3 }
 0x144   :  { %v601_v6 = vmul.f32 %v2835_v1, %v2835_v1 }
 0x145   :  { %320 = vrot.lane.b32.xlu0 %v2812_v51, %s3773_s11  ;;  %v311_v4 = vpop.f32.mrb[2].mxu1  ;;  %v602_v13 = vmul.f32 %v2845_v9, %v2845_v9 }
 0x146   :  { %v2839_v5 = vadd.f32 %v311_v4, %v225_v61  ;;  %583 = vrot.lane.b32.xlu1 %v2835_v1, %s3773_s11  ;;  %v313_v8 = vpop.f32.mrb[3].mxu1 }
 0x147   :  { %v2849_v11 = vadd.f32 %v313_v8, %v229_v3 }
 0x148   :  { %v603_v10 = vmul.f32 %v2839_v5, %v2839_v5  ;;  %v2291_v49 = vpack.c.bf16 %v2839_v5, %v2835_v1 }
 0x149   :  { %326 = vrot.lane.b32.xlu0 %v2821_v56, %s3773_s11  ;;  %v604_v14 = vmul.f32 %v2849_v11, %v2849_v11 }
 0x14a   :  { %v2443_v12 = vpack.i.bf16 %v603_v10, %v601_v6  ;;  %587 = vrot.lane.b32.xlu1 %v2839_v5, %s3773_s11 }
 0x14b   :  { %v2448_v15 = vpack.i.bf16 %v604_v14, %v602_v13 }
 0x14d   :  { %2444 = vrot.lane.b32.xlu0 %v2443_v12, %s3769_s5 }
 0x14e   :  { %2449 = vrot.lane.b32.xlu1 %v2448_v15, %s3769_s5 }
 0x151   :  { %585 = vrot.lane.b32.xlu0 %v2845_v9, %s3773_s11 }
 0x155   :  { %589 = vrot.lane.b32.xlu0 %v2849_v11, %s3773_s11 }
 0x1ac   :  { %v323_v16 = vpop.permute.xlu1 %322 }
 0x1ad   :  { %v336_v46 = vmul.f32 %v323_v16, %v2810_v50 }
 0x1b0   :  { %v325_v17 = vpop.permute.xlu1 %324 }
 0x1b3   :  { %v2435_v18 = vpop.permute.xlu0 %2434 }
 0x1b4   :  { %v2437_v19 = vunpack.i.h.bf16 %v2435_v18  ;;  %v2436_v20 = vunpack.i.l.bf16 %v2435_v18  ;;  %v2440_v21 = vpop.permute.xlu1 %2439 }
 0x1b5   :  { %v2442_v28 = vunpack.i.h.bf16 %v2440_v21  ;;  %v2441_v29 = vunpack.i.l.bf16 %v2440_v21 }
 0x1b6   :  { %v361_v22 = vsel %vm232_vm1, %v2810_v50, %v2436_v20  ;;  %v362_v23 = vsel %vm232_vm1, %v2821_v56, %v2437_v19 }
 0x1b7   :  { %v321_v24 = vpop.permute.xlu0 %320  ;;  %v2278_v25 = vpack.c.bf16 %v362_v23, %v361_v22  ;;  %v355_v34 = vsel %vm232_vm1, %v2436_v20, %v2441_v29  ;;  %v356_v35 = vsel %vm232_vm1, %v2437_v19, %v2442_v28 }
 0x1b8   :  { %v584_v27 = vpop.permute.xlu1 %583  ;;  %v329_v30 = vsel %vm328_vm2, %v321_v24, %v323_v16  ;;  %v2284_v41 = vpack.c.bf16 %v356_v35, %v355_v34 }
 0x1b9   :  { %2279 = vmatprep.subr.bf16.mxu0 %v2278_v25  ;;  %v335_v36 = vmul.f32 %v329_v30, %v2812_v51 }
 0x1ba   :  { %2281 = vmatpush1.bf16.msra.mxu0 %v2280_v26 }
 0x1bb   :  { %v327_v31 = vpop.permute.xlu0 %326 }
 0x1bc   :  { %v330_v32 = vsel %vm328_vm2, %v325_v17, %v327_v31  ;;  %v588_v33 = vpop.permute.xlu1 %587  ;;  %v338_v42 = vmul.f32 %v327_v31, %v2821_v56 }
 0x1bd   :  { %v337_v37 = vmul.f32 %v330_v32, %v2816_v53  ;;  %2223 = vmatmul.mubr.msk.f32.vlgmr.msra.gmra.mrb[4].mxu0 %vm363_vm3, %v2691_v38 }
 0x1be   :  { %502 = vmatprep.mubr.f32.mxu0 %v2688_v7  ;;  %v2287_v59 = vpack.c.bf16 %v338_v42, %v336_v46 }
 0x1bf   :  { %v2282_v39 = vpack.c.bf16 %v337_v37, %v335_v36  ;;  %v2445_v40 = vpop.permute.xlu0 %2444 }
 0x1c0   :  { %v2447_v43 = vunpack.i.h.bf16 %v2445_v40  ;;  %v2446_v44 = vunpack.i.l.bf16 %v2445_v40  ;;  %v2450_v45 = vpop.permute.xlu1 %2449 }
 0x1c1   :  { %2283 = vmatprep.subr.bf16.mxu0 %v2282_v39  ;;  %v2452_v57 = vunpack.i.h.bf16 %v2450_v45  ;;  %v2451_v58 = vunpack.i.l.bf16 %v2450_v45 }
 0x1c2   :  { %2285 = vmatpush1.bf16.msra.mxu0 %v2284_v41  ;;  %v623_v47 = vsel %vm232_vm1, %v2845_v9, %v2446_v44  ;;  %v624_v48 = vsel %vm232_vm1, %v2849_v11, %v2447_v43 }
 0x1c3   :  { %2286 = vmatprep.subr.bf16.mxu0 %v2692_v52  ;;  %v586_v54 = vpop.permute.xlu0 %585  ;;  %v2289_v55 = vpack.c.bf16 %v624_v48, %v623_v47  ;;  %v617_v0 = vsel %vm232_vm1, %v2446_v44, %v2451_v58  ;;  %v618_v2 = vsel %vm232_vm1, %v2447_v43, %v2452_v57 }
 0x1c4   :  { %v591_v60 = vsel %vm328_vm2, %v584_v27, %v586_v54  ;;  %v598_v61 = vmul.f32 %v586_v54, %v2845_v9  ;;  %v2295_v10 = vpack.c.bf16 %v618_v2, %v617_v0 }
 0x1c5   :  { %2224 = vmatmul.mubr.msk.f32.vlgmr.msra.gmra.mrb[6].mxu0 %vm363_vm3, %v2691_v38  ;;  %2290 = vmatprep.subr.bf16.mxu1 %v2289_v55  ;;  %v597_v62 = vmul.f32 %v591_v60, %v2835_v1 }
 0x1c6   :  { %2288 = vmatpush3.bf16.msra.mxu0 %v2287_v59  ;;  %2292 = vmatpush1.bf16.msra.mxu1 %v2291_v49 }
 0x1c7   :  { %v590_v63 = vpop.permute.xlu0 %589  ;;  %2297 = vmatprep.subr.bf16.mxu1 %v2692_v52  ;;  %2244 = vmatprep.mubr.msk.f32.mxu0 %vm2693_vm4, %v2688_v7 }
 0x1c8   :  { %v592_v3 = vsel %vm328_vm2, %v588_v33, %v590_v63  ;;  %v600_v4 = vmul.f32 %v590_v63, %v2849_v11 }
 0x1c9   :  { %v599_v6 = vmul.f32 %v592_v3, %v2839_v5  ;;  %2226 = vmatmul.mubr.msk.f32.vlgmr.msra.gmra.mrb[4].mxu1 %vm363_vm3, %v2691_v38  ;;  %2245 = vmatmul.mubr.msk.f32.vlgmr.msra.gmra.mrb[8].mxu0 %vm363_vm3, %v2691_v38 }
 0x1ca   :  { %v2298_v8 = vpack.c.bf16 %v600_v4, %v598_v61  ;;  %760 = vmatprep.mubr.f32.mxu0 %v2688_v7  ;;  %2251 = vmatprep.mubr.msk.f32.mxu1 %vm2693_vm4, %v2688_v7 }
 0x1cb   :  { %v2293_v12 = vpack.c.bf16 %v599_v6, %v597_v62 }
 0x1cc   :  { %2299 = vmatpush3.bf16.msra.mxu1 %v2298_v8 }
 0x1cd   :  { %2294 = vmatprep.subr.bf16.mxu0 %v2293_v12 }
 0x1ce   :  { %2296 = vmatpush1.bf16.msra.mxu0 %v2295_v10 }
 0x1cf   :  { %2252 = vmatmul.mubr.msk.f32.vlgmr.msra.gmra.mrb[6].mxu1 %vm363_vm3, %v2691_v38 }
 0x1d1   :  { %2227 = vmatmul.mubr.msk.f32.vlgmr.msra.gmra.mrb[10].mxu0 %vm363_vm3, %v2691_v38 }
 0x1d2   :  { %1986 = vmatprep.mubr.f32.mxu0 %v2688_v7 }
 0x290   :  { %v2910_v13 = vpop.f32.mrb[4].mxu0 }
 0x291   :  { %849 = vrot.lane.b32.xlu0 %v2910_v13, %s3773_s11  ;;  %v2914_v14 = vpop.f32.mrb[5].mxu0  ;;  %v838_v18 = vsel %vm837_vm5, %v2910_v13, 0.0 }
 0x292   :  { %863 = vrot.lane.b32.xlu1 %v2914_v14, %s3769_s5 }
 0x295   :  { %876 = vrot.lane.b32.xlu0 %v2914_v14, %s3771_s14 }
 0x298   :  { %v2920_v15 = vpop.f32.mrb[6].mxu0 }
 0x299   :  { %v2922_v16 = vpop.f32.mrb[7].mxu0 }
 0x29a   :  { %v889_v25 = vsel %vm837_vm5, %v2922_v16, 0.0 }
 0x29c   :  { %v2924_v17 = vpop.f32.mrb[4].mxu1  ;;  %v2939_v26 = vpop.f32.mrb[8].mxu0 }
 0x29d   :  { %v2926_v7 = vpop.f32.mrb[5].mxu1  ;;  %v2246_v27 = vpop.f32.mrb[9].mxu0  ;;  %v1003_v30 = vsel %vm837_vm5, %v2924_v17, 0.0 }
 0x2a4   :  { %v2941_v28 = vpop.f32.mrb[10].mxu0 }
 0x2a5   :  { %v2943_v29 = vpop.f32.mrb[11].mxu0 }
 0x2b6   :  { %839 = vadd.xlane.f32.xlu1 %v838_v18 }
 0x303   :  { %v850_v19 = vpop.permute.xlu0 %849 }
 0x304   :  { %v852_v20 = vsel %vm837_vm5, %v850_v19, 0.0  ;;  %v864_v21 = vpop.permute.xlu1 %863  ;;  %v1054_v19 = vsel %vm837_vm5, %v2943_v29, 0.0 }
 0x305   :  { %853 = vadd.xlane.f32.xlu0 %v852_v20  ;;  %v866_v24 = vsel %vm837_vm5, %v864_v21, 0.0 }
 0x307   :  { %v877_v22 = vpop.permute.xlu0 %876 }
 0x308   :  { %v879_v23 = vsel %vm837_vm5, %v877_v22, 0.0 }
 0x309   :  { %880 = vadd.xlane.f32.xlu1 %v879_v23  ;;  %867 = vadd.xlane.f32.xlu0 %v866_v24 }
 0x30d   :  { %890 = vadd.xlane.f32.xlu0 %v889_v25 }
 0x31a   :  { %1014 = vrot.lane.b32.xlu1 %v2924_v17, %s3773_s11 }
 0x31e   :  { %1041 = vrot.lane.b32.xlu1 %v2926_v7, %s3771_s14 }
 0x323   :  { %1028 = vrot.lane.b32.xlu0 %v2926_v7, %s3769_s5 }
 0x342   :  { %1004 = vadd.xlane.f32.xlu1 %v1003_v30 }
 0x343   :  { %v840_v31 = vpop.xlane.xlu1 %839 }
 0x344   :  { %v841_v32 = vrot.slane %v840_v31, 4 }
 0x346   :  { %v842_v33 = vadd.f32 %v841_v32, %v840_v31 }
 0x348   :  { %v843_v34 = vrot.slane %v842_v33, 2 }
 0x34a   :  { %v844_v35 = vadd.f32 %v843_v34, %v842_v33 }
 0x34c   :  { %v845_v36 = vrot.slane %v844_v35, 1 }
 0x34e   :  { %v846_v37 = vadd.f32 %v845_v36, %v844_v35 }
 0x350   :  { %2304 = vpush %v846_v37 }
 0x381   :  { %s2305_s15 = spop %2304 }
 0x382   :  { %s2962_s16 = smul.f32 0.001953125, %s2305_s15 }
 0x384   :  { %s902_s19 = smul.f32 %s2962_s16, %s2962_s16 }
 0x392   :  { %v854_v39 = vpop.xlane.xlu0 %853 }
 0x393   :  { %v855_v40 = vrot.slane %v854_v39, 4 }
 0x395   :  { %v856_v41 = vadd.f32 %v855_v40, %v854_v39 }
 0x396   :  { %v868_v42 = vpop.xlane.xlu0 %867  ;;  %v881_v43 = vpop.xlane.xlu1 %880 }
 0x397   :  { %v857_v44 = vrot.slane %v856_v41, 2  ;;  %v869_v45 = vrot.slane %v868_v42, 4  ;;  %v882_v46 = vrot.slane %v881_v43, 4 }
 0x399   :  { %v870_v47 = vadd.f32 %v869_v45, %v868_v42  ;;  %v883_v48 = vadd.f32 %v882_v46, %v881_v43  ;;  %v858_v49 = vadd.f32 %v857_v44, %v856_v41 }
 0x39a   :  { %v1015_v52 = vpop.permute.xlu1 %1014  ;;  %v891_v54 = vpop.xlane.xlu0 %890 }
 0x39b   :  { %v871_v55 = vrot.slane %v870_v47, 2  ;;  %v884_v57 = vrot.slane %v883_v48, 2  ;;  %v892_v58 = vrot.slane %v891_v54, 4  ;;  %v1017_v59 = vsel %vm837_vm5, %v1015_v52, 0.0 }
 0x39c   :  { %1018 = vadd.xlane.f32.xlu0 %v1017_v59  ;;  %v859_v60 = vrot.slane %v858_v49, 1 }
 0x39d   :  { %v893_v61 = vadd.f32 %v892_v58, %v891_v54  ;;  %v872_v62 = vadd.f32 %v871_v55, %v870_v47  ;;  %v885_v63 = vadd.f32 %v884_v57, %v883_v48  ;;  %v1214_v47 = vsel %vm837_vm5, %v2920_v15, 0.0 }
 0x39e   :  { %v1042_v0 = vpop.permute.xlu1 %1041  ;;  %v1029_v2 = vpop.permute.xlu0 %1028  ;;  %v860_v3 = vadd.f32 %v859_v60, %v858_v49 }
 0x39f   :  { %v894_v4 = vrot.slane %v893_v61, 2  ;;  %v1044_v6 = vsel %vm837_vm5, %v1042_v0, 0.0  ;;  %v1031_v8 = vsel %vm837_vm5, %v1029_v2, 0.0  ;;  %v873_v10 = vrot.slane %v872_v62, 1 }
 0x3a0   :  { %2306 = vpush %v860_v3  ;;  %1045 = vadd.xlane.f32.xlu1 %v1044_v6  ;;  %1032 = vadd.xlane.f32.xlu0 %v1031_v8  ;;  %v886_v12 = vrot.slane %v885_v63, 1 }
 0x3a1   :  { %v874_v18 = vadd.f32 %v873_v10, %v872_v62  ;;  %v895_v20 = vadd.f32 %v894_v4, %v893_v61 }
 0x3a2   :  { %v887_v21 = vadd.f32 %v886_v12, %v885_v63 }
 0x3a3   :  { %2308 = vpush %v874_v18  ;;  %v896_v22 = vrot.slane %v895_v20, 1 }
 0x3a4   :  { %2310 = vpush %v887_v21  ;;  %1055 = vadd.xlane.f32.xlu0 %v1054_v19 }
 0x3a5   :  { %v897_v23 = vadd.f32 %v896_v22, %v895_v20 }
 0x3a7   :  { %2312 = vpush %v897_v23 }
 0x3b1   :  { %1188 = vrot.lane.b32.xlu1 %v2910_v13, %s3769_s5 }
 0x3b5   :  { %1225 = vrot.lane.b32.xlu1 %v2920_v15, %s3773_s11 }
 0x3b9   :  { %1239 = vrot.lane.b32.xlu1 %v2922_v16, %s3769_s5 }
 0x3ba   :  { %1201 = vrot.lane.b32.xlu0 %v2910_v13, %s3771_s14 }
 0x3cf   :  { %v1005_v32 = vpop.xlane.xlu1 %1004 }
 0x3d0   :  { %v1006_v55 = vrot.slane %v1005_v32, 4 }
 0x3d1   :  { %s2307_s17 = spop %2306 }
 0x3d2   :  { %s2964_s18 = smul.f32 0.001953125, %s2307_s17  ;;  %v1007_v60 = vadd.f32 %v1006_v55, %v1005_v32 }
 0x3d4   :  { %s2309_s1 = spop %2308  ;;  %s906_s24 = smul.f32 %s2964_s18, %s2964_s18  ;;  %v1008_v2 = vrot.slane %v1007_v60, 2 }
 0x3d5   :  { %s901_s20 = smul.f32 0.001953125, %s2309_s1  ;;  %s2311_s21 = spop %2310 }
 0x3d6   :  { %s905_s23 = smul.f32 0.001953125, %s2311_s21  ;;  %s3004_s1 = sld [smem:[#allocation2 + $0x2]] }
 0x3d7   :  { %s903_s2 = ssub.f32 %s901_s20, %s902_s19  ;;  %s910_s22 = smul.f32 %s2964_s18, %s2962_s16 }
 0x3d8   :  { %s907_s25 = ssub.f32 %s905_s23, %s906_s24  ;;  %s2313_s26 = spop %2312 }
 0x3d9   :  { %s2972_s27 = sadd.f32 1e-05, %s903_s2  ;;  %s909_s28 = smul.f32 0.001953125, %s2313_s26 }
 0x3da   :  { %s2974_s29 = sadd.f32 1e-05, %s907_s25  ;;  %s3002_s19 = sld [smem:[#allocation2]] }
 0x3db   :  { %s2976_s30 = ssub.f32 %s909_s28, %s910_s22  ;;  %s3011_s2 = sld [smem:[#allocation2 + $0x1]] }
 0x3dc   :  { %s912_s0 = smul.f32 %s2974_s29, %s2972_s27  ;;  %s924_s8 = sadd.f32 %s2974_s29, %s2972_s27 }
 0x3dd   :  { %s913_s3 = smul.f32 %s2976_s30, %s2976_s30  ;;  %3795 = sst [smem:[#allocation19_spill]] %s3004_s1 }
 0x3de   :  { %s944_s24 = ssub.f32 0.0, %s2976_s30 }
 0x3df   :  { %s914_s7 = ssub.f32 %s912_s0, %s913_s3 }
 0x3e0   :  { %3794 = sst [smem:[#allocation18_spill]] %s3002_s19 }
 0x3e1   :  { %v915_v13 = vstv %s914_s7 }
 0x3e2   :  { %2483 = vrsqrt.f32 %v915_v13  ;;  %vm918_vm6 = vcmp.eq.f32.partialorder %v915_v13, inf  ;;  %v921_v25 = vand.u32 2147483648, %v915_v13  ;;  %vm920_vm7 = vcmp.eq.f32.partialorder %v915_v13, 0.0 }
 0x3ec   :  { %v2484_v16 = vpop.eup %2483 }
 0x3ed   :  { %v917_v24 = vmul.f32 %v2484_v16, %v915_v13 }
 0x3ef   :  { %v919_v27 = vsel %vm918_vm6, %v915_v13, %v917_v24 }
 0x3f0   :  { %v922_v30 = vsel %vm920_vm7, %v921_v25, %v919_v27 }
 0x3f1   :  { %2314 = vpush %v922_v30 }
 0x422   :  { %s2982_s4 = spop %2314 }
 0x423   :  { %s925_s12 = smul.f32 2.0, %s2982_s4  ;;  %s940_s20 = sadd.f32 %s2982_s4, %s2974_s29 }
 0x424   :  { %s942_s23 = sadd.f32 %s2982_s4, %s2972_s27 }
 0x425   :  { %s926_s13 = sadd.f32 %s925_s12, %s924_s8 }
 0x427   :  { %v927_v31 = vstv %s926_s13 }
 0x428   :  { %2485 = vrsqrt.f32 %v927_v31  ;;  %vm930_vm8 = vcmp.eq.f32.partialorder %v927_v31, inf  ;;  %v933_v42 = vand.u32 2147483648, %v927_v31  ;;  %vm932_vm9 = vcmp.eq.f32.partialorder %v927_v31, 0.0 }
 0x429   :  { %v1019_v33 = vpop.xlane.xlu0 %1018 }
 0x42a   :  { %v1020_v57 = vrot.slane %v1019_v33, 4 }
 0x42c   :  { %v1021_v62 = vadd.f32 %v1020_v57, %v1019_v33 }
 0x42d   :  { %v1046_v34 = vpop.xlane.xlu1 %1045  ;;  %v1033_v35 = vpop.xlane.xlu0 %1032 }
 0x42e   :  { %v1034_v58 = vrot.slane %v1033_v35, 4  ;;  %v1047_v59 = vrot.slane %v1046_v34, 4  ;;  %v1022_v4 = vrot.slane %v1021_v62, 2 }
 0x430   :  { %v1035_v63 = vadd.f32 %v1034_v58, %v1033_v35  ;;  %v1048_v0 = vadd.f32 %v1047_v59, %v1046_v34  ;;  %v1023_v12 = vadd.f32 %v1022_v4, %v1021_v62  ;;  %v1544_v59 = vsel %vm837_vm5, %v2914_v14, 0.0 }
 0x431   :  { %v1189_v36 = vpop.permute.xlu1 %1188  ;;  %v1056_v37 = vpop.xlane.xlu0 %1055 }
 0x432   :  { %v2486_v39 = vpop.eup %2485  ;;  %v1191_v40 = vsel %vm837_vm5, %v1189_v36, 0.0  ;;  %v1057_v61 = vrot.slane %v1056_v37, 4  ;;  %v1036_v8 = vrot.slane %v1035_v63, 2  ;;  %v1024_v22 = vrot.slane %v1023_v12, 1 }
 0x433   :  { %1192 = vadd.xlane.f32.xlu0 %v1191_v40  ;;  %v929_v41 = vmul.f32 %v2486_v39, %v927_v31 }
 0x434   :  { %v1058_v3 = vadd.f32 %v1057_v61, %v1056_v37  ;;  %v1037_v18 = vadd.f32 %v1036_v8, %v1035_v63  ;;  %v1025_v27 = vadd.f32 %v1024_v22, %v1023_v12 }
 0x435   :  { %v1226_v43 = vpop.permute.xlu1 %1225  ;;  %v1202_v44 = vpop.permute.xlu0 %1201  ;;  %v931_v45 = vsel %vm930_vm8, %v927_v31, %v929_v41 }
 0x436   :  { %v934_v46 = vsel %vm932_vm9, %v933_v42, %v931_v45  ;;  %v1204_v48 = vsel %vm837_vm5, %v1202_v44, 0.0  ;;  %v1228_v52 = vsel %vm837_vm5, %v1226_v43, 0.0  ;;  %v1059_v10 = vrot.slane %v1058_v3, 2 }
 0x437   :  { %2316 = vpush %v934_v46  ;;  %1215 = vadd.xlane.f32.xlu0 %v1214_v47  ;;  %1205 = vadd.xlane.f32.xlu1 %v1204_v48  ;;  %v1038_v23 = vrot.slane %v1037_v18, 1 }
 0x438   :  { %v1060_v21 = vadd.f32 %v1059_v10, %v1058_v3 }
 0x439   :  { %v1240_v49 = vpop.permute.xlu1 %1239  ;;  %v1039_v30 = vadd.f32 %v1038_v23, %v1037_v18 }
 0x43a   :  { %v1242_v54 = vsel %vm837_vm5, %v1240_v49, 0.0  ;;  %v1061_v25 = vrot.slane %v1060_v21, 1 }
 0x43b   :  { %1229 = vadd.xlane.f32.xlu0 %v1228_v52  ;;  %1243 = vadd.xlane.f32.xlu1 %v1242_v54  ;;  %v1382_v52 = vsel %vm837_vm5, %v2941_v28, 0.0 }
 0x43c   :  { %v1062_v32 = vadd.f32 %v1061_v25, %v1060_v21 }
 0x44c   :  { %1369 = vrot.lane.b32.xlu1 %v2924_v17, %s3771_s14 }
 0x450   :  { %1393 = vrot.lane.b32.xlu1 %v2941_v28, %s3773_s11 }
 0x451   :  { %1356 = vrot.lane.b32.xlu0 %v2924_v17, %s3769_s5  ;;  %v1049_v17 = vrot.slane %v1048_v0, 2 }
 0x453   :  { %v1050_v19 = vadd.f32 %v1049_v17, %v1048_v0 }
 0x455   :  { %1407 = vrot.lane.b32.xlu0 %v2943_v29, %s3769_s5  ;;  %v1009_v29 = vadd.f32 %v1008_v2, %v1007_v60  ;;  %v1051_v13 = vrot.slane %v1050_v19, 1 }
 0x457   :  { %v1010_v20 = vrot.slane %v1009_v29, 1  ;;  %v1052_v31 = vadd.f32 %v1051_v13, %v1050_v19 }
 0x459   :  { %v1011_v24 = vadd.f32 %v1010_v20, %v1009_v29 }
 0x468   :  { %s2317_s15 = spop %2316 }
 0x469   :  { %s936_s17 = smul.f32 %s2317_s15, %s2982_s4 }
 0x46b   :  { %v937_v6 = vstv %s936_s17 }
 0x46c   :  { %2487 = vrcp.f32 %v937_v6 }
 0x476   :  { %v2488_v16 = vpop.eup %2487 }
 0x477   :  { %2318 = vpush %v2488_v16 }
 0x478   :  { %2320 = vpush %v1011_v24 }
 0x479   :  { %2322 = vpush %v1025_v27 }
 0x47a   :  { %2324 = vpush %v1039_v30 }
 0x47b   :  { %2326 = vpush %v1052_v31 }
 0x47c   :  { %2328 = vpush %v1062_v32 }
 0x4a8   :  { %s2319_s21 = spop %2318 }
 0x4a9   :  { %s3013_s22 = smul.f32 %s2319_s21, %s940_s20  ;;  %s2321_s0 = spop %2320 }
 0x4aa   :  { %s943_s25 = smul.f32 %s2319_s21, %s942_s23  ;;  %s2323_s30 = spop %2322 }
 0x4ab   :  { %s3015_s26 = smul.f32 %s2319_s21, %s944_s24  ;;  %s2325_s4 = spop %2324 }
 0x4ac   :  { %s946_s28 = smul.f32 %s3013_s22, %s3002_s19  ;;  %s2327_s17 = spop %2326 }
 0x4ad   :  { %s947_s3 = smul.f32 %s3004_s1, %s3015_s26 }
 0x4ae   :  { %s949_s7 = smul.f32 %s3015_s26, %s3002_s19 }
 0x4af   :  { %s950_s29 = smul.f32 %s3004_s1, %s943_s25  ;;  %s3024_s8 = sadd.f32 %s947_s3, %s946_s28 }
 0x4b0   :  { %s952_s27 = smul.f32 %s3004_s1, %s3013_s22 }
 0x4b1   :  { %s955_s12 = smul.f32 %s3011_s2, %s943_s25  ;;  %s3029_s13 = sadd.f32 %s950_s29, %s949_s7 }
 0x4b2   :  { %s3031_s15 = smul.f32 0.001953125, %s2321_s0  ;;  %s2329_s25 = spop %2328 }
 0x4b3   :  { %s3033_s24 = smul.f32 0.001953125, %s2323_s30  ;;  %s3035_s20 = sadd.f32 %s955_s12, %s947_s3 }
 0x4b4   :  { %s1066_s21 = smul.f32 0.001953125, %s2325_s4 }
 0x4b5   :  { %s1067_s23 = smul.f32 %s3031_s15, %s3031_s15 }
 0x4b6   :  { %s1070_s28 = smul.f32 0.001953125, %s2327_s17 }
 0x4b7   :  { %s1068_s0 = ssub.f32 %s1066_s21, %s1067_s23  ;;  %s1071_s7 = smul.f32 %s3033_s24, %s3033_s24 }
 0x4b8   :  { %s1074_s29 = smul.f32 0.001953125, %s2329_s25 }
 0x4b9   :  { %s3041_s30 = sadd.f32 1e-05, %s1068_s0  ;;  %s1075_s9 = smul.f32 %s3033_s24, %s3031_s15 }
 0x4ba   :  { %s1072_s10 = ssub.f32 %s1070_s28, %s1071_s7  ;;  %s957_s3 = smul.f32 %s3024_s8, %s2962_s16 }
 0x4bb   :  { %s3047_s4 = ssub.f32 %s1074_s29, %s1075_s9  ;;  %s958_s12 = smul.f32 %s3029_s13, %s2964_s18 }
 0x4bc   :  { %s3051_s17 = sadd.f32 1e-05, %s1072_s10  ;;  %s953_s21 = smul.f32 %s3011_s2, %s3015_s26 }
 0x4bd   :  { %s1078_s23 = smul.f32 %s3047_s4, %s3047_s4  ;;  %s3059_s5 = sadd.f32 %s958_s12, %s957_s3 }
 0x4be   :  { %s1077_s25 = smul.f32 %s3051_s17, %s3041_s30  ;;  %s3064_s28 = sadd.f32 %s953_s21, %s952_s27 }
 0x4bf   :  { %s962_s9 = smul.f32 %s3035_s20, %s2964_s18  ;;  %s1089_s22 = sadd.f32 %s3051_s17, %s3041_s30 }
 0x4c0   :  { %s1079_s0 = ssub.f32 %s1077_s25, %s1078_s23  ;;  %v1193_v33 = vpop.xlane.xlu0 %1192  ;;  %s961_s10 = smul.f32 %s3064_s28, %s2962_s16 }
 0x4c1   :  { %3796 = sst [smem:[#allocation20_spill]] %s3064_s28  ;;  %s3798_s16 = smov 64   ;;  %v1194_v0 = vrot.slane %v1193_v33, 4 }
 0x4c2   :  { %v1080_v34 = vstv %s1079_s0  ;;  %s3070_s7 = sadd.f32 %s962_s9, %s961_s10 }
 0x4c3   :  { %2489 = vrsqrt.f32 %v1080_v34  ;;  %vm1083_vm10 = vcmp.eq.f32.partialorder %v1080_v34, inf  ;;  %v1086_v46 = vand.u32 2147483648, %v1080_v34  ;;  %vm1085_vm11 = vcmp.eq.f32.partialorder %v1080_v34, 0.0  ;;  %s1109_s25 = ssub.f32 0.0, %s3047_s4 }
 0x4c4   :  { %v1206_v35 = vpop.xlane.xlu1 %1205  ;;  %v1216_v36 = vpop.xlane.xlu0 %1215  ;;  %3797 = sst [smem:[#allocation21_spill]] %s3070_s7  ;;  %v1195_v6 = vadd.f32 %v1194_v0, %v1193_v33 }
 0x4c5   :  { %v1207_v2 = vrot.slane %v1206_v35, 4  ;;  %v1217_v3 = vrot.slane %v1216_v36, 4 }
 0x4c6   :  { %v1196_v29 = vrot.slane %v1195_v6, 2 }
 0x4c7   :  { %v1208_v17 = vadd.f32 %v1207_v2, %v1206_v35  ;;  %v1218_v10 = vadd.f32 %v1217_v3, %v1216_v36 }
 0x4c8   :  { %v1244_v37 = vpop.xlane.xlu1 %1243  ;;  %v1230_v39 = vpop.xlane.xlu0 %1229  ;;  %v1197_v23 = vadd.f32 %v1196_v29, %v1195_v6 }
 0x4c9   :  { %v1231_v4 = vrot.slane %v1230_v39, 4  ;;  %v1245_v8 = vrot.slane %v1244_v37, 4  ;;  %v1209_v18 = vrot.slane %v1208_v17, 2  ;;  %v1219_v20 = vrot.slane %v1218_v10, 2 }
 0x4ca   :  { %v1198_v25 = vrot.slane %v1197_v23, 1 }
 0x4cb   :  { %v1246_v12 = vadd.f32 %v1245_v8, %v1244_v37  ;;  %v1210_v13 = vadd.f32 %v1209_v18, %v1208_v17  ;;  %v1220_v16 = vadd.f32 %v1219_v20, %v1218_v10 }
 0x4cc   :  { %v1370_v40 = vpop.permute.xlu1 %1369  ;;  %v1357_v41 = vpop.permute.xlu0 %1356 }
 0x4cd   :  { %v2490_v42 = vpop.eup %2489  ;;  %v1372_v43 = vsel %vm837_vm5, %v1370_v40, 0.0  ;;  %v1359_v44 = vsel %vm837_vm5, %v1357_v41, 0.0  ;;  %v1247_v22 = vrot.slane %v1246_v12, 2  ;;  %v1211_v30 = vrot.slane %v1210_v13, 1 }
 0x4ce   :  { %v1082_v45 = vmul.f32 %v2490_v42, %v1080_v34  ;;  %1373 = vadd.xlane.f32.xlu0 %v1372_v43  ;;  %1360 = vadd.xlane.f32.xlu1 %v1359_v44  ;;  %v1221_v31 = vrot.slane %v1220_v16, 1 }
 0x4cf   :  { %v1248_v27 = vadd.f32 %v1247_v22, %v1246_v12  ;;  %v1212_v36 = vadd.f32 %v1211_v30, %v1210_v13 }
 0x4d0   :  { %v1084_v47 = vsel %vm1083_vm10, %v1080_v34, %v1082_v45  ;;  %v1394_v48 = vpop.permute.xlu1 %1393  ;;  %v1408_v55 = vpop.permute.xlu0 %1407  ;;  %v1199_v34 = vadd.f32 %v1198_v25, %v1197_v23  ;;  %v1222_v37 = vadd.f32 %v1221_v31, %v1220_v16  ;;  %v968_v23 = vstv %s3029_s13 }
 0x4d1   :  { %v1087_v49 = vsel %vm1085_vm11, %v1086_v46, %v1084_v47  ;;  %v1396_v54 = vsel %vm837_vm5, %v1394_v48, 0.0  ;;  %v1410_v57 = vsel %vm837_vm5, %v1408_v55, 0.0  ;;  %v1249_v35 = vrot.slane %v1248_v27, 1 }
 0x4d2   :  { %2330 = vpush %v1087_v49  ;;  %1383 = vadd.xlane.f32.xlu0 %v1382_v52  ;;  %1397 = vadd.xlane.f32.xlu1 %v1396_v54  ;;  %v1593_v55 = vsel %vm837_vm5, %v2939_v26, 0.0  ;;  %v1707_v26 = vsel %vm837_vm5, %v2926_v7, 0.0  ;;  %v969_v13 = vmul.f32 %v968_v23, %v2812_v51  ;;  %v987_v16 = vstv %s3035_s20 }
 0x4d3   :  { %v1250_v40 = vadd.f32 %v1249_v35, %v1248_v27  ;;  %v970_v30 = vmul.f32 %v968_v23, %v2816_v53 }
 0x4d6   :  { %1411 = vadd.xlane.f32.xlu0 %v1410_v57  ;;  %v3111_v57 = vpop.f32.mrb[6].mxu1 }
 0x4d7   :  { %v1756_v22 = vsel %vm837_vm5, %v3111_v57, 0.0 }
 0x4e3   :  { %1554 = vrot.lane.b32.xlu1 %v2914_v14, %s3773_s11  ;;  %v1232_v14 = vadd.f32 %v1231_v4, %v1230_v39 }
 0x4e5   :  { %v1233_v21 = vrot.slane %v1232_v14, 2 }
 0x4e7   :  { %1580 = vrot.lane.b32.xlu1 %v2920_v15, %s3771_s14  ;;  %v1234_v24 = vadd.f32 %v1233_v21, %v1232_v14 }
 0x4e9   :  { %v1235_v32 = vrot.slane %v1234_v24, 1 }
 0x4eb   :  { %v1236_v39 = vadd.f32 %v1235_v32, %v1234_v24  ;;  %v989_v24 = vmul.f32 %v987_v16, %v2816_v53  ;;  %v988_v32 = vmul.f32 %v987_v16, %v2812_v51 }
 0x4ec   :  { %1567 = vrot.lane.b32.xlu0 %v2920_v15, %s3798_s16 }
 0x503   :  { %s3084_s18 = spop %2330 }
 0x504   :  { %s1090_s26 = smul.f32 2.0, %s3084_s18  ;;  %s1105_s12 = sadd.f32 %s3084_s18, %s3051_s17 }
 0x505   :  { %s1107_s23 = sadd.f32 %s3084_s18, %s3041_s30 }
 0x506   :  { %s1091_s27 = sadd.f32 %s1090_s26, %s1089_s22 }
 0x508   :  { %v1092_v58 = vstv %s1091_s27 }
 0x509   :  { %2491 = vrsqrt.f32 %v1092_v58  ;;  %vm1095_vm12 = vcmp.eq.f32.partialorder %v1092_v58, inf  ;;  %v1098_v62 = vand.u32 2147483648, %v1092_v58  ;;  %vm1097_vm13 = vcmp.eq.f32.partialorder %v1092_v58, 0.0 }
 0x50b   :  { %1545 = vadd.xlane.f32.xlu1 %v1544_v59 }
 0x513   :  { %v2492_v60 = vpop.eup %2491 }
 0x514   :  { %v1094_v61 = vmul.f32 %v2492_v60, %v1092_v58 }
 0x516   :  { %v1096_v63 = vsel %vm1095_vm12, %v1092_v58, %v1094_v61  ;;  %v2253_v58 = vpop.f32.mrb[7].mxu1 }
 0x517   :  { %v1099_v15 = vsel %vm1097_vm13, %v1098_v62, %v1096_v63 }
 0x518   :  { %2332 = vpush %v1099_v15 }
 0x549   :  { %s2333_s29 = spop %2332 }
 0x54a   :  { %s1101_s3 = smul.f32 %s2333_s29, %s3084_s18 }
 0x54c   :  { %v1102_v19 = vstv %s1101_s3 }
 0x54d   :  { %2493 = vrcp.f32 %v1102_v19 }
 0x557   :  { %v2494_v33 = vpop.eup %2493 }
 0x558   :  { %2334 = vpush %v2494_v33 }
 0x559   :  { %2336 = vpush %v1199_v34 }
 0x55a   :  { %2338 = vpush %v1212_v36 }
 0x55b   :  { %2340 = vpush %v1222_v37  ;;  %v3092_v41 = vpop.xlane.xlu1 %1360  ;;  %v3094_v42 = vpop.xlane.xlu0 %1373 }
 0x55c   :  { %2342 = vpush %v1236_v39  ;;  %v1362_v36 = vrot.slane %v3092_v41, 4  ;;  %v1375_v37 = vrot.slane %v3094_v42, 4 }
 0x55d   :  { %2344 = vpush %v1250_v40 }
 0x55f   :  { %v3096_v43 = vpop.xlane.xlu1 %1397  ;;  %v3098_v44 = vpop.xlane.xlu0 %1383 }
 0x560   :  { %v1385_v39 = vrot.slane %v3098_v44, 4  ;;  %v1399_v40 = vrot.slane %v3096_v43, 4 }
 0x563   :  { %v1555_v45 = vpop.permute.xlu1 %1554  ;;  %v3100_v46 = vpop.xlane.xlu0 %1411 }
 0x564   :  { %v1557_v47 = vsel %vm837_vm5, %v1555_v45, 0.0  ;;  %v1363_v45 = vadd.f32 %v1362_v36, %v3092_v41 }
 0x565   :  { %1558 = vadd.xlane.f32.xlu0 %v1557_v47  ;;  %v1413_v47 = vrot.slane %v3100_v46, 4 }
 0x567   :  { %v1581_v48 = vpop.permute.xlu1 %1580  ;;  %v1568_v49 = vpop.permute.xlu0 %1567 }
 0x568   :  { %v1583_v52 = vsel %vm837_vm5, %v1581_v48, 0.0  ;;  %v1570_v54 = vsel %vm837_vm5, %v1568_v49, 0.0  ;;  %v1376_v48 = vadd.f32 %v1375_v37, %v3094_v42  ;;  %v1386_v49 = vadd.f32 %v1385_v39, %v3098_v44 }
 0x569   :  { %1584 = vadd.xlane.f32.xlu1 %v1583_v52  ;;  %1571 = vadd.xlane.f32.xlu0 %v1570_v54  ;;  %v1400_v52 = vadd.f32 %v1399_v40, %v3096_v43  ;;  %v1364_v54 = vrot.slane %v1363_v45, 2 }
 0x56a   :  { %v1377_v57 = vrot.slane %v1376_v48, 2 }
 0x56b   :  { %v1365_v41 = vadd.f32 %v1364_v54, %v1363_v45 }
 0x56d   :  { %1594 = vadd.xlane.f32.xlu0 %v1593_v55  ;;  %v1414_v55 = vadd.f32 %v1413_v47, %v3100_v46  ;;  %v1366_v42 = vrot.slane %v1365_v41, 1 }
 0x57a   :  { %1717 = vrot.lane.b32.xlu1 %v2926_v7, %s3773_s11 }
 0x57e   :  { %1743 = vrot.lane.b32.xlu1 %v2941_v28, %s3771_s14 }
 0x583   :  { %1730 = vrot.lane.b32.xlu0 %v2941_v28, %s3798_s16 }
 0x589   :  { %s2335_s21 = spop %2334 }
 0x58a   :  { %s3120_s0 = smul.f32 %s2335_s21, %s1105_s12  ;;  %s2337_s26 = spop %2336 }
 0x58b   :  { %s1108_s9 = smul.f32 %s2335_s21, %s1107_s23  ;;  %s2339_s3 = spop %2338 }
 0x58c   :  { %s3122_s10 = smul.f32 %s2335_s21, %s1109_s25  ;;  %s2341_s30 = spop %2340 }
 0x58d   :  { %s1111_s22 = smul.f32 %s3120_s0, %s3002_s19  ;;  %s2343_s21 = spop %2342 }
 0x58e   :  { %s1112_s27 = smul.f32 %s3004_s1, %s3122_s10 }
 0x58f   :  { %s1114_s29 = smul.f32 %s3122_s10, %s3002_s19 }
 0x590   :  { %s1115_s14 = smul.f32 %s3004_s1, %s1108_s9  ;;  %s3131_s17 = sadd.f32 %s1112_s27, %s1111_s22 }
 0x591   :  { %s1120_s4 = smul.f32 %s3011_s2, %s1108_s9 }
 0x592   :  { %s3136_s18 = sadd.f32 %s1115_s14, %s1114_s29  ;;  %s3138_s12 = smul.f32 0.001953125, %s2337_s26  ;;  %v1130_v45 = vstv %s3131_s17 }
 0x593   :  { %s3140_s23 = smul.f32 0.001953125, %s2339_s3  ;;  %s3142_s25 = sadd.f32 %s1120_s4, %s1112_s27 }
 0x594   :  { %s1254_s9 = smul.f32 0.001953125, %s2341_s30  ;;  %s2345_s14 = spop %2344  ;;  %v1133_v25 = vstv %s3136_s18 }
 0x595   :  { %s1255_s22 = smul.f32 %s3138_s12, %s3138_s12  ;;  %v1134_v27 = vmul.f32 %v1133_v25, %v2835_v1  ;;  %v1135_v31 = vmul.f32 %v1133_v25, %v2839_v5  ;;  %v1152_v33 = vstv %s3142_s25 }
 0x596   :  { %s1258_s29 = smul.f32 0.001953125, %s2343_s21  ;;  %v1154_v34 = vmul.f32 %v1152_v33, %v2839_v5  ;;  %v1153_v35 = vmul.f32 %v1152_v33, %v2835_v1 }
 0x597   :  { %s1256_s26 = ssub.f32 %s1254_s9, %s1255_s22  ;;  %s1259_s11 = smul.f32 %s3140_s23, %s3140_s23 }
 0x598   :  { %s1262_s6 = smul.f32 0.001953125, %s2345_s14  ;;  %v3186_v15 = vpop.xlane.xlu1 %1545 }
 0x599   :  { %s3148_s16 = sadd.f32 1e-05, %s1256_s26  ;;  %s1263_s3 = smul.f32 %s3140_s23, %s3138_s12 }
 0x59a   :  { %s1260_s7 = ssub.f32 %s1258_s29, %s1259_s11  ;;  %s1122_s27 = smul.f32 %s3131_s17, %s3031_s15 }
 0x59b   :  { %s3154_s30 = ssub.f32 %s1262_s6, %s1263_s3  ;;  %s1123_s4 = smul.f32 %s3136_s18, %s3033_s24 }
 0x59c   :  { %s3158_s21 = sadd.f32 1e-05, %s1260_s7  ;;  %s1118_s9 = smul.f32 %s3011_s2, %s3122_s10 }
 0x59d   :  { %s1266_s22 = smul.f32 %s3154_s30, %s3154_s30  ;;  %s3166_s26 = sadd.f32 %s1123_s4, %s1122_s27 }
 0x59e   :  { %s1265_s14 = smul.f32 %s3158_s21, %s3148_s16  ;;  %s1297_s4 = ssub.f32 0.0, %s3154_s30 }
 0x59f   :  { %s3799_s6 = smul.f32 %s3004_s1, %s3120_s0 }
 0x5a0   :  { %s1267_s28 = ssub.f32 %s1265_s14, %s1266_s22  ;;  %s1127_s7 = smul.f32 %s3142_s25, %s3033_s24 }
 0x5a1   :  { %s3173_s11 = sadd.f32 %s1118_s9, %s3799_s6 }
 0x5a2   :  { %1708 = vadd.xlane.f32.xlu1 %v1707_v26  ;;  %v1268_v28 = vstv %s1267_s28  ;;  %s1277_s28 = sadd.f32 %s3158_s21, %s3148_s16  ;;  %v1387_v26 = vrot.slane %v1386_v49, 2 }
 0x5a3   :  { %2495 = vrsqrt.f32 %v1268_v28  ;;  %s1126_s10 = smul.f32 %s3173_s11, %s3031_s15  ;;  %vm1271_vm14 = vcmp.eq.f32.partialorder %v1268_v28, inf  ;;  %v1274_v61 = vand.u32 2147483648, %v1268_v28  ;;  %vm1273_vm15 = vcmp.eq.f32.partialorder %v1268_v28, 0.0  ;;  %s3800_s15 = smov 96  }
 0x5a5   :  { %s3179_s29 = sadd.f32 %s1127_s7, %s1126_s10 }
 0x5ad   :  { %v2496_v59 = vpop.eup %2495 }
 0x5ae   :  { %v1270_v60 = vmul.f32 %v2496_v59, %v1268_v28  ;;  %v1415_v59 = vrot.slane %v1414_v55, 2 }
 0x5b0   :  { %v1272_v62 = vsel %vm1271_vm14, %v1268_v28, %v1270_v60  ;;  %v1401_v28 = vrot.slane %v1400_v52, 2  ;;  %v1378_v60 = vadd.f32 %v1377_v57, %v1376_v48  ;;  %v1131_v57 = vmul.f32 %v1130_v45, %v2835_v1 }
 0x5b1   :  { %v1275_v7 = vsel %vm1273_vm15, %v1274_v61, %v1272_v62  ;;  %v1388_v61 = vadd.f32 %v1387_v26, %v1386_v49 }
 0x5b2   :  { %2346 = vpush %v1275_v7  ;;  %v1402_v62 = vadd.f32 %v1401_v28, %v1400_v52  ;;  %v1416_v7 = vadd.f32 %v1415_v59, %v1414_v55  ;;  %v1379_v44 = vrot.slane %v1378_v60, 1  ;;  %v1149_v28 = vstv %s3173_s11 }
 0x5b3   :  { %v1389_v43 = vrot.slane %v1388_v61, 1 }
 0x5e3   :  { %s3181_s3 = spop %2346 }
 0x5e4   :  { %s1278_s0 = smul.f32 2.0, %s3181_s3  ;;  %s1293_s20 = sadd.f32 %s3181_s3, %s3158_s21 }
 0x5e5   :  { %s1295_s25 = sadd.f32 %s3181_s3, %s3148_s16 }
 0x5e6   :  { %s1279_s27 = sadd.f32 %s1278_s0, %s1277_s28 }
 0x5e8   :  { %v1280_v63 = vstv %s1279_s27 }
 0x5e9   :  { %2497 = vrsqrt.f32 %v1280_v63  ;;  %vm1283_vm4 = vcmp.eq.f32.partialorder %v1280_v63, inf  ;;  %v1286_v4 = vand.u32 2147483648, %v1280_v63  ;;  %vm1285_vm6 = vcmp.eq.f32.partialorder %v1280_v63, 0.0 }
 0x5f2   :  { %v3188_v0 = vpop.xlane.xlu0 %1558 }
 0x5f3   :  { %v2498_v2 = vpop.eup %2497 }
 0x5f4   :  { %v1282_v3 = vmul.f32 %v2498_v2, %v1280_v63  ;;  %v1367_v2 = vadd.f32 %v1366_v42, %v1365_v41  ;;  %v1150_v42 = vmul.f32 %v1149_v28, %v2835_v1 }
 0x5f6   :  { %v3190_v6 = vpop.xlane.xlu1 %1584  ;;  %v3192_v8 = vpop.xlane.xlu0 %1571  ;;  %v1284_v17 = vsel %vm1283_vm4, %v1280_v63, %v1282_v3  ;;  %v1403_v63 = vrot.slane %v1402_v62, 1  ;;  %v1417_v3 = vrot.slane %v1416_v7, 1 }
 0x5f7   :  { %v1287_v10 = vsel %vm1285_vm6, %v1286_v4, %v1284_v17  ;;  %v1380_v4 = vadd.f32 %v1379_v44, %v1378_v60  ;;  %v1390_v17 = vadd.f32 %v1389_v43, %v1388_v61 }
 0x5f8   :  { %2348 = vpush %v1287_v10  ;;  %v1404_v10 = vadd.f32 %v1403_v63, %v1402_v62 }
 0x5fa   :  { %v1718_v14 = vpop.permute.xlu1 %1717  ;;  %v3194_v29 = vpop.xlane.xlu0 %1594 }
 0x5fb   :  { %v1720_v12 = vsel %vm837_vm5, %v1718_v14, 0.0  ;;  %v1418_v14 = vadd.f32 %v1417_v3, %v1416_v7  ;;  %v1132_v7 = vmul.f32 %v1130_v45, %v2839_v5 }
 0x5fc   :  { %1721 = vadd.xlane.f32.xlu0 %v1720_v12 }
 0x5fe   :  { %v1744_v18 = vpop.permute.xlu1 %1743  ;;  %v1731_v19 = vpop.permute.xlu0 %1730 }
 0x5ff   :  { %v1746_v20 = vsel %vm837_vm5, %v1744_v18, 0.0  ;;  %v1733_v21 = vsel %vm837_vm5, %v1731_v19, 0.0 }
 0x600   :  { %1747 = vadd.xlane.f32.xlu1 %v1746_v20  ;;  %1734 = vadd.xlane.f32.xlu0 %v1733_v21 }
 0x604   :  { %1757 = vadd.xlane.f32.xlu0 %v1756_v22  ;;  %v965_v22 = vstv %s3024_s8 }
 0x611   :  { %973 = vrot.lane.b32.xlu1 %v969_v13, %s3800_s15 }
 0x615   :  { %994 = vrot.lane.b32.xlu1 %v989_v24, %s3800_s15 }
 0x619   :  { %1138 = vrot.lane.b32.xlu1 %v1134_v27, %s3800_s15  ;;  %v966_v27 = vmul.f32 %v965_v22, %v2812_v51 }
 0x61a   :  { %975 = vrot.lane.b32.xlu0 %v970_v30, %s3800_s15 }
 0x61d   :  { %1140 = vrot.lane.b32.xlu1 %v1135_v31, %s3800_s15 }
 0x61e   :  { %992 = vrot.lane.b32.xlu0 %v988_v32, %s3800_s15 }
 0x621   :  { %1159 = vrot.lane.b32.xlu1 %v1154_v34, %s3800_s15 }
 0x622   :  { %1157 = vrot.lane.b32.xlu0 %v1153_v35, %s3800_s15  ;;  %v967_v35 = vmul.f32 %v965_v22, %v2816_v53 }
 0x629   :  { %s2349_s13 = spop %2348 }
 0x62a   :  { %s1289_s24 = smul.f32 %s2349_s13, %s3181_s3 }
 0x62c   :  { %v1290_v58 = vstv %s1289_s24 }
 0x62d   :  { %2499 = vrcp.f32 %v1290_v58 }
 0x62f   :  { %v3295_v18 = vpop.xlane.xlu1 %1708 }
 0x637   :  { %v2500_v46 = vpop.eup %2499 }
 0x638   :  { %2350 = vpush %v2500_v46 }
 0x639   :  { %2352 = vpush %v1367_v2 }
 0x63a   :  { %2354 = vpush %v1380_v4 }
 0x63b   :  { %2356 = vpush %v1390_v17 }
 0x63c   :  { %2358 = vpush %v1404_v10  ;;  %v1151_v10 = vmul.f32 %v1149_v28, %v2839_v5 }
 0x63d   :  { %2360 = vpush %v1418_v14 }
 0x669   :  { %s2351_s18 = spop %2350 }
 0x66a   :  { %s3237_s9 = smul.f32 %s2351_s18, %s1293_s20  ;;  %s2353_s7 = spop %2352 }
 0x66b   :  { %s1296_s22 = smul.f32 %s2351_s18, %s1295_s25  ;;  %s2355_s0 = spop %2354 }
 0x66c   :  { %s3239_s14 = smul.f32 %s2351_s18, %s1297_s4  ;;  %s2357_s16 = spop %2356 }
 0x66d   :  { %s1299_s6 = smul.f32 %s3237_s9, %s3002_s19  ;;  %s2359_s20 = spop %2358 }
 0x66e   :  { %s1300_s10 = smul.f32 %s3004_s1, %s3239_s14 }
 0x66f   :  { %s1302_s28 = smul.f32 %s3239_s14, %s3002_s19 }
 0x670   :  { %s1303_s27 = smul.f32 %s3004_s1, %s1296_s22  ;;  %s3248_s21 = sadd.f32 %s1300_s10, %s1299_s6 }
 0x671   :  { %s1305_s13 = smul.f32 %s3004_s1, %s3237_s9 }
 0x672   :  { %3801 = sst [smem:[#allocation22_spill]] %s3248_s21  ;;  %s1308_s30 = smul.f32 %s3011_s2, %s1296_s22 }
 0x673   :  { %s3253_s3 = sadd.f32 %s1303_s27, %s1302_s28  ;;  %s3255_s24 = smul.f32 0.001953125, %s2353_s7 }
 0x674   :  { %s3257_s18 = smul.f32 0.001953125, %s2355_s0  ;;  %s3259_s25 = sadd.f32 %s1308_s30, %s1300_s10 }
 0x675   :  { %3802 = sst [smem:[#allocation23_spill]] %s3253_s3  ;;  %s1422_s4 = smul.f32 0.001953125, %s2357_s16 }
 0x676   :  { %3803 = sst [smem:[#allocation24_spill]] %s3257_s18  ;;  %s1423_s9 = smul.f32 %s3255_s24, %s3255_s24 }
 0x677   :  { %3804 = sst [smem:[#allocation25_spill]] %s3259_s25  ;;  %s2361_s22 = spop %2360 }
 0x678   :  { %s1426_s6 = smul.f32 0.001953125, %s2359_s20  ;;  %s1424_s7 = ssub.f32 %s1422_s4, %s1423_s9 }
 0x679   :  { %s1427_s28 = smul.f32 %s3257_s18, %s3257_s18 }
 0x67a   :  { %s1430_s27 = smul.f32 0.001953125, %s2361_s22  ;;  %s3265_s15 = sadd.f32 1e-05, %s1424_s7 }
 0x67b   :  { %s1431_s0 = smul.f32 %s3257_s18, %s3255_s24  ;;  %s1428_s1 = ssub.f32 %s1426_s6, %s1427_s28 }
 0x67c   :  { %s1310_s19 = smul.f32 %s3248_s21, %s3138_s12 }
 0x67d   :  { %s3271_s10 = ssub.f32 %s1430_s27, %s1431_s0  ;;  %s1311_s16 = smul.f32 %s3253_s3, %s3140_s23 }
 0x67e   :  { %s3275_s30 = sadd.f32 1e-05, %s1428_s1  ;;  %s1306_s20 = smul.f32 %s3011_s2, %s3239_s14 }
 0x67f   :  { %s1434_s4 = smul.f32 %s3271_s10, %s3271_s10  ;;  %s3283_s22 = sadd.f32 %s1311_s16, %s1310_s19 }
 0x680   :  { %s1433_s9 = smul.f32 %s3275_s30, %s3265_s15  ;;  %s3285_s18 = sadd.f32 %s1306_s20, %s1305_s13 }
 0x681   :  { %3805 = sst [smem:[#allocation26_spill]] %s3283_s22  ;;  %s1315_s6 = smul.f32 %s3259_s25, %s3140_s23 }
 0x682   :  { %s1435_s7 = ssub.f32 %s1433_s9, %s1434_s4  ;;  %s1314_s28 = smul.f32 %s3285_s18, %s3138_s12 }
 0x683   :  { %3806 = sst [smem:[#allocation27_spill]] %s3285_s18  ;;  %s3291_s27 = sld [smem:[#allocation2 + $0x3]] }
 0x684   :  { %v1436_v12 = vstv %s1435_s7  ;;  %s3807_s1 = sld [smem:[#allocation20_spill]]  ;;  %s3293_s14 = sadd.f32 %s1315_s6, %s1314_s28 }
 0x685   :  { %2501 = vrsqrt.f32 %v1436_v12  ;;  %s3299_s19 = sld [smem:[#allocation2 + $0x4]]  ;;  %s3809_s13 = sld [smem:[#allocation21_spill]]  ;;  %vm1439_vm7 = vcmp.eq.f32.partialorder %v1436_v12, inf  ;;  %v1442_v16 = vand.u32 2147483648, %v1436_v12  ;;  %vm1441_vm8 = vcmp.eq.f32.partialorder %v1436_v12, 0.0 }
 0x686   :  { %3808 = sst [smem:[#allocation20_spill]] %s3293_s14  ;;  %s3810_s20 = sld [smem:[#allocation18_spill]] }
 0x687   :  { %s3811_s4 = sld [smem:[#allocation19_spill]]  ;;  %s1465_s28 = ssub.f32 0.0, %s3271_s10 }
 0x689   :  { %v3297_v19 = vpop.xlane.xlu0 %1721  ;;  %s960_s12 = ssub.f32 %s3291_s27, %s3059_s5 }
 0x68a   :  { %v984_v30 = vstv %s3807_s1  ;;  %s1125_s5 = ssub.f32 %s3291_s27, %s3166_s26 }
 0x68b   :  { %s964_s23 = ssub.f32 %s3299_s19, %s3809_s13  ;;  %v981_v34 = vstv %s960_s12  ;;  %v986_v36 = vmul.f32 %v984_v30, %v2816_v53  ;;  %v985_v55 = vmul.f32 %v984_v30, %v2812_v51 }
 0x68c   :  { %v1146_v60 = vstv %s1125_s5  ;;  %s1129_s8 = ssub.f32 %s3299_s19, %s3179_s29 }
 0x68d   :  { %v3301_v20 = vpop.xlane.xlu1 %1747  ;;  %v3303_v21 = vpop.xlane.xlu0 %1734  ;;  %v1000_v49 = vstv %s964_s23  ;;  %s1445_s26 = sadd.f32 %s3275_s30, %s3265_s15 }
 0x68e   :  { %v1165_v3 = vstv %s1129_s8 }
 0x68f   :  { %v2502_v23 = vpop.eup %2501 }
 0x690   :  { %v1438_v13 = vmul.f32 %v2502_v23, %v1436_v12 }
 0x691   :  { %v3308_v24 = vpop.xlane.xlu0 %1757  ;;  %v974_v25 = vpop.permute.xlu1 %973 }
 0x692   :  { %v1440_v31 = vsel %vm1439_vm7, %v1436_v12, %v1438_v13  ;;  %v979_v33 = vadd.f32 %v974_v25, %v966_v27 }
 0x693   :  { %v1443_v32 = vsel %vm1441_vm8, %v1442_v16, %v1440_v31 }
 0x694   :  { %2362 = vpush %v1443_v32  ;;  %v982_v37 = vadd.f32 %v981_v34, %v979_v33 }
 0x695   :  { %v976_v39 = vpop.permute.xlu0 %975  ;;  %v995_v40 = vpop.permute.xlu1 %994 }
 0x696   :  { %v980_v47 = vadd.f32 %v976_v39, %v967_v35  ;;  %v999_v48 = vadd.f32 %v995_v40, %v986_v36  ;;  %v1560_v35 = vrot.slane %v3188_v0, 4  ;;  %v1573_v36 = vrot.slane %v3192_v8, 4 }
 0x697   :  { %v1596_v40 = vrot.slane %v3194_v29, 4 }
 0x698   :  { %v983_v52 = vadd.f32 %v981_v34, %v980_v47  ;;  %v1002_v54 = vadd.f32 %v1000_v49, %v999_v48  ;;  %v1547_v34 = vrot.slane %v3186_v15, 4  ;;  %v1561_v45 = vadd.f32 %v1560_v35, %v3188_v0 }
 0x699   :  { %v993_v58 = vpop.permute.xlu0 %992  ;;  %v1139_v26 = vpop.permute.xlu1 %1138  ;;  %v1574_v47 = vadd.f32 %v1573_v36, %v3192_v8  ;;  %v1749_v35 = vrot.slane %v3301_v20, 4 }
 0x69a   :  { %v998_v59 = vadd.f32 %v993_v58, %v985_v55  ;;  %v1144_v41 = vadd.f32 %v1139_v26, %v1131_v57  ;;  %v1548_v39 = vadd.f32 %v1547_v34, %v3186_v15  ;;  %v1736_v34 = vrot.slane %v3303_v21, 4 }
 0x69b   :  { %v1575_v57 = vrot.slane %v1574_v47, 2 }
 0x69c   :  { %v1001_v61 = vadd.f32 %v1000_v49, %v998_v59  ;;  %v1147_v62 = vadd.f32 %v1146_v60, %v1144_v41  ;;  %v1549_v49 = vrot.slane %v1548_v39, 2 }
 0x69d   :  { %v1158_v44 = vpop.permute.xlu0 %1157  ;;  %v1141_v43 = vpop.permute.xlu1 %1140  ;;  %v1576_v59 = vadd.f32 %v1575_v57, %v1574_v47 }
 0x69e   :  { %v3326_v63 = vadd.f32 %v1147_v62, %v982_v37  ;;  %v1163_v46 = vadd.f32 %v1158_v44, %v1150_v42  ;;  %v1145_v2 = vadd.f32 %v1141_v43, %v1132_v7  ;;  %v1586_v37 = vrot.slane %v3190_v6, 4 }
 0x69f   :  { %v1550_v15 = vadd.f32 %v1549_v49, %v1548_v39 }
 0x6a0   :  { %v1166_v4 = vadd.f32 %v1165_v3, %v1163_v46  ;;  %v1148_v17 = vadd.f32 %v1146_v60, %v1145_v2  ;;  %v1587_v48 = vadd.f32 %v1586_v37, %v3190_v6  ;;  %v1577_v6 = vrot.slane %v1576_v59, 1 }
 0x6a1   :  { %v1160_v14 = vpop.permute.xlu1 %1159  ;;  %v1551_v0 = vrot.slane %v1550_v15, 1  ;;  %v1759_v37 = vrot.slane %v3308_v24, 4 }
 0x6a2   :  { %v3329_v12 = vadd.f32 %v1166_v4, %v1001_v61  ;;  %v3331_v22 = vadd.f32 %v1148_v17, %v983_v52  ;;  %v1164_v23 = vadd.f32 %v1160_v14, %v1151_v10  ;;  %v1597_v52 = vadd.f32 %v1596_v40, %v3194_v29 }
 0x6a3   :  { %v1588_v58 = vrot.slane %v1587_v48, 2  ;;  %v1552_v62 = vadd.f32 %v1551_v0, %v1550_v15  ;;  %v1578_v44 = vadd.f32 %v1577_v6, %v1576_v59  ;;  %v1737_v40 = vadd.f32 %v1736_v34, %v3303_v21 }
 0x6a4   :  { %v1167_v13 = vadd.f32 %v1165_v3, %v1164_v23  ;;  %v1598_v26 = vrot.slane %v1597_v52, 2 }
 0x6a5   :  { %v1589_v41 = vadd.f32 %v1588_v58, %v1587_v48  ;;  %v1760_v48 = vadd.f32 %v1759_v37, %v3308_v24 }
 0x6a6   :  { %v3333_v16 = vadd.f32 %v1167_v13, %v1002_v54  ;;  %v1562_v54 = vrot.slane %v1561_v45, 2  ;;  %v1599_v60 = vadd.f32 %v1598_v26, %v1597_v52 }
 0x6a7   :  { %v1590_v61 = vrot.slane %v1589_v41, 1  ;;  %v1761_v57 = vrot.slane %v1760_v48, 2 }
 0x6a8   :  { %v1563_v28 = vadd.f32 %v1562_v54, %v1561_v45  ;;  %v1600_v42 = vrot.slane %v1599_v60, 1  ;;  %v1750_v45 = vadd.f32 %v1749_v35, %v3301_v20  ;;  %v1738_v54 = vrot.slane %v1737_v40, 2 }
 0x6a9   :  { %v1591_v43 = vadd.f32 %v1590_v61, %v1589_v41 }
 0x6aa   :  { %v1564_v8 = vrot.slane %v1563_v28, 1  ;;  %v1601_v46 = vadd.f32 %v1600_v42, %v1599_v60  ;;  %v1739_v26 = vadd.f32 %v1738_v54, %v1737_v40 }
 0x6ac   :  { %v1565_v7 = vadd.f32 %v1564_v8, %v1563_v28  ;;  %v1762_v28 = vadd.f32 %v1761_v57, %v1760_v48  ;;  %v1740_v20 = vrot.slane %v1739_v26, 1 }
 0x6ae   :  { %v1763_v0 = vrot.slane %v1762_v28, 1  ;;  %v1741_v8 = vadd.f32 %v1740_v20, %v1739_v26  ;;  %v1171_v26 = vmul.f32 0.5, %v3331_v22 }
 0x6b0   :  { %v1764_v61 = vadd.f32 %v1763_v0, %v1762_v28 }
 0x6c5   :  { %s3335_s17 = spop %2362 }
 0x6c6   :  { %s1446_s11 = smul.f32 2.0, %s3335_s17  ;;  %s1461_s9 = sadd.f32 %s3335_s17, %s3275_s30 }
 0x6c7   :  { %s1463_s6 = sadd.f32 %s3335_s17, %s3265_s15 }
 0x6c8   :  { %s1447_s29 = sadd.f32 %s1446_s11, %s1445_s26 }
 0x6ca   :  { %v1448_v25 = vstv %s1447_s29 }
 0x6cb   :  { %2503 = vrsqrt.f32 %v1448_v25  ;;  %vm1451_vm9 = vcmp.eq.f32.partialorder %v1448_v25, inf  ;;  %v1454_v31 = vand.u32 2147483648, %v1448_v25  ;;  %vm1453_vm10 = vcmp.eq.f32.partialorder %v1448_v25, 0.0 }
 0x6d5   :  { %v2504_v27 = vpop.eup %2503 }
 0x6d6   :  { %v1450_v30 = vmul.f32 %v2504_v27, %v1448_v25 }
 0x6d8   :  { %v1452_v32 = vsel %vm1451_vm9, %v1448_v25, %v1450_v30 }
 0x6d9   :  { %v1455_v33 = vsel %vm1453_vm10, %v1454_v31, %v1452_v32  ;;  %v1710_v32 = vrot.slane %v3295_v18, 4  ;;  %vm2189_vm10 = vcmask 1043456  }
 0x6da   :  { %2364 = vpush %v1455_v33  ;;  %v1723_v33 = vrot.slane %v3297_v19, 4 }
 0x6db   :  { %v1711_v36 = vadd.f32 %v1710_v32, %v3295_v18 }
 0x6dc   :  { %v1724_v39 = vadd.f32 %v1723_v33, %v3297_v19 }
 0x6dd   :  { %v1712_v47 = vrot.slane %v1711_v36, 2 }
 0x6de   :  { %v1725_v49 = vrot.slane %v1724_v39, 2 }
 0x6df   :  { %v1713_v18 = vadd.f32 %v1712_v47, %v1711_v36 }
 0x6e0   :  { %v1726_v58 = vadd.f32 %v1725_v49, %v1724_v39 }
 0x6e1   :  { %v1714_v19 = vrot.slane %v1713_v18, 1 }
 0x6e2   :  { %v1727_v21 = vrot.slane %v1726_v58, 1 }
 0x6e3   :  { %v1715_v41 = vadd.f32 %v1714_v19, %v1713_v18  ;;  %v1181_v19 = vmul.f32 0.5, %v3333_v16 }
 0x6e4   :  { %v1728_v60 = vadd.f32 %v1727_v21, %v1726_v58  ;;  %v1170_v58 = vmul.f32 0.5, %v3326_v63 }
 0x70b   :  { %s2365_s0 = spop %2364 }
 0x70c   :  { %s1457_s16 = smul.f32 %s2365_s0, %s3335_s17 }
 0x70e   :  { %v1458_v55 = vstv %s1457_s16 }
 0x70f   :  { %2505 = vrcp.f32 %v1458_v55  ;;  %v1751_v55 = vrot.slane %v1750_v45, 2 }
 0x711   :  { %v1752_v15 = vadd.f32 %v1751_v55, %v1750_v45 }
 0x713   :  { %v1753_v59 = vrot.slane %v1752_v15, 1 }
 0x715   :  { %v1754_v6 = vadd.f32 %v1753_v59, %v1752_v15  ;;  %v1180_v15 = vmul.f32 0.5, %v3329_v12 }
 0x719   :  { %v2506_v29 = vpop.eup %2505 }
 0x71a   :  { %2366 = vpush %v2506_v29 }
 0x71b   :  { %2368 = vpush %v1552_v62 }
 0x71c   :  { %2370 = vpush %v1565_v7 }
 0x71d   :  { %2372 = vpush %v1578_v44 }
 0x71e   :  { %2374 = vpush %v1591_v43 }
 0x71f   :  { %2376 = vpush %v1601_v46 }
 0x74b   :  { %s2367_s7 = spop %2366 }
 0x74c   :  { %s3356_s1 = smul.f32 %s2367_s7, %s1461_s9  ;;  %s2369_s5 = spop %2368 }
 0x74d   :  { %s1464_s13 = smul.f32 %s2367_s7, %s1463_s6  ;;  %s2371_s11 = spop %2370 }
 0x74e   :  { %s3358_s12 = smul.f32 %s2367_s7, %s1465_s28  ;;  %s2373_s15 = spop %2372 }
 0x74f   :  { %s1467_s23 = smul.f32 %s3356_s1, %s3810_s20  ;;  %s3814_s9 = sld [smem:[#allocation24_spill]] }
 0x750   :  { %s1468_s8 = smul.f32 %s3811_s4, %s3358_s12  ;;  %s2375_s7 = spop %2374 }
 0x751   :  { %s1470_s26 = smul.f32 %s3358_s12, %s3810_s20 }
 0x752   :  { %s1471_s29 = smul.f32 %s3811_s4, %s1464_s13  ;;  %s3367_s30 = sadd.f32 %s1468_s8, %s1467_s23 }
 0x753   :  { %s1473_s0 = smul.f32 %s3811_s4, %s3356_s1  ;;  %s2377_s23 = spop %2376 }
 0x754   :  { %3812 = sst [smem:[#allocation21_spill]] %s3367_s30  ;;  %s1476_s10 = smul.f32 %s3011_s2, %s1464_s13 }
 0x755   :  { %s3372_s17 = sadd.f32 %s1471_s29, %s1470_s26  ;;  %s3374_s16 = smul.f32 0.001953125, %s2369_s5 }
 0x756   :  { %s3376_s6 = smul.f32 0.001953125, %s2371_s11  ;;  %s3378_s28 = sadd.f32 %s1476_s10, %s1468_s8 }
 0x757   :  { %3813 = sst [smem:[#allocation18_spill]] %s3372_s17  ;;  %s1605_s1 = smul.f32 0.001953125, %s2373_s15 }
 0x758   :  { %3815 = sst [smem:[#allocation19_spill]] %s3378_s28  ;;  %s1606_s13 = smul.f32 %s3374_s16, %s3374_s16 }
 0x759   :  { %s1609_s26 = smul.f32 0.001953125, %s2375_s7 }
 0x75a   :  { %s1607_s5 = ssub.f32 %s1605_s1, %s1606_s13  ;;  %s1610_s29 = smul.f32 %s3376_s6, %s3376_s6 }
 0x75b   :  { %s1613_s14 = smul.f32 0.001953125, %s2377_s23 }
 0x75c   :  { %s3384_s18 = sadd.f32 1e-05, %s1607_s5  ;;  %s1614_s11 = smul.f32 %s3376_s6, %s3374_s16 }
 0x75d   :  { %s1611_s22 = ssub.f32 %s1609_s26, %s1610_s29  ;;  %s1478_s21 = smul.f32 %s3367_s30, %s3255_s24 }
 0x75e   :  { %s3390_s8 = ssub.f32 %s1613_s14, %s1614_s11  ;;  %s1479_s15 = smul.f32 %s3372_s17, %s3814_s9 }
 0x75f   :  { %s3394_s10 = sadd.f32 1e-05, %s1611_s22  ;;  %s1474_s7 = smul.f32 %s3011_s2, %s3358_s12 }
 0x760   :  { %s1617_s1 = smul.f32 %s3390_s8, %s3390_s8  ;;  %s3402_s25 = sadd.f32 %s1479_s15, %s1478_s21 }
 0x761   :  { %s1616_s13 = smul.f32 %s3394_s10, %s3384_s18  ;;  %s3404_s5 = sadd.f32 %s1474_s7, %s1473_s0 }
 0x762   :  { %3816 = sst [smem:[#allocation24_spill]] %s3402_s25  ;;  %s1483_s14 = smul.f32 %s3378_s28, %s3814_s9 }
 0x763   :  { %s1618_s23 = ssub.f32 %s1616_s13, %s1617_s1  ;;  %s1482_s26 = smul.f32 %s3404_s5, %s3255_s24 }
 0x764   :  { %3817 = sst [smem:[#allocation28_spill]] %s3404_s5 }
 0x765   :  { %v1619_v2 = vstv %s1618_s23  ;;  %s3410_s29 = sadd.f32 %s1483_s14, %s1482_s26 }
 0x766   :  { %2507 = vrsqrt.f32 %v1619_v2  ;;  %vm1622_vm11 = vcmp.eq.f32.partialorder %v1619_v2, inf  ;;  %v1625_v17 = vand.u32 2147483648, %v1619_v2  ;;  %vm1624_vm12 = vcmp.eq.f32.partialorder %v1619_v2, 0.0  ;;  %s1628_s22 = sadd.f32 %s3394_s10, %s3384_s18 }
 0x767   :  { %3818 = sst [smem:[#allocation29_spill]] %s3410_s29 }
 0x768   :  { %s1648_s1 = ssub.f32 0.0, %s3390_s8 }
 0x770   :  { %v2508_v3 = vpop.eup %2507 }
 0x771   :  { %v1621_v4 = vmul.f32 %v2508_v3, %v1619_v2 }
 0x773   :  { %v1623_v10 = vsel %vm1622_vm11, %v1619_v2, %v1621_v4  ;;  %vm2190_vm11 = vcmask 523268  }
 0x774   :  { %v1626_v14 = vsel %vm1624_vm12, %v1625_v17, %v1623_v10  ;;  %vm2191_vm12 = vmor %vm2190_vm11, %vm2189_vm10 }
 0x775   :  { %2378 = vpush %v1626_v14 }
 0x7a6   :  { %s3412_s21 = spop %2378 }
 0x7a7   :  { %s1629_s12 = smul.f32 2.0, %s3412_s21  ;;  %s1644_s11 = sadd.f32 %s3412_s21, %s3394_s10 }
 0x7a8   :  { %s1646_s7 = sadd.f32 %s3412_s21, %s3384_s18 }
 0x7a9   :  { %s1630_s0 = sadd.f32 %s1629_s12, %s1628_s22 }
 0x7ab   :  { %v1631_v23 = vstv %s1630_s0 }
 0x7ac   :  { %2509 = vrsqrt.f32 %v1631_v23  ;;  %vm1634_vm13 = vcmp.eq.f32.partialorder %v1631_v23, inf  ;;  %v1637_v27 = vand.u32 2147483648, %v1631_v23  ;;  %vm1636_vm14 = vcmp.eq.f32.partialorder %v1631_v23, 0.0 }
 0x7b6   :  { %v2510_v13 = vpop.eup %2509 }
 0x7b7   :  { %v1633_v25 = vmul.f32 %v2510_v13, %v1631_v23 }
 0x7b9   :  { %v1635_v30 = vsel %vm1634_vm13, %v1631_v23, %v1633_v25 }
 0x7ba   :  { %v1638_v31 = vsel %vm1636_vm14, %v1637_v27, %v1635_v30 }
 0x7bb   :  { %2380 = vpush %v1638_v31 }
 0x7ec   :  { %s2381_s24 = spop %2380 }
 0x7ed   :  { %s1640_s9 = smul.f32 %s2381_s24, %s3412_s21 }
 0x7ef   :  { %v1641_v52 = vstv %s1640_s9 }
 0x7f0   :  { %2511 = vrcp.f32 %v1641_v52 }
 0x7fa   :  { %v2512_v24 = vpop.eup %2511 }
 0x7fb   :  { %2382 = vpush %v2512_v24 }
 0x7fc   :  { %2384 = vpush %v1715_v41 }
 0x7fd   :  { %2386 = vpush %v1728_v60 }
 0x7fe   :  { %2388 = vpush %v1741_v8 }
 0x7ff   :  { %2390 = vpush %v1754_v6 }
 0x800   :  { %2392 = vpush %v1764_v61 }
 0x82c   :  { %s2383_s15 = spop %2382 }
 0x82d   :  { %s3433_s13 = smul.f32 %s2383_s15, %s1644_s11  ;;  %s2385_s26 = spop %2384 }
 0x82e   :  { %s3435_s23 = smul.f32 %s2383_s15, %s1646_s7  ;;  %s2387_s12 = spop %2386 }
 0x82f   :  { %s3437_s14 = smul.f32 %s2383_s15, %s1648_s1  ;;  %s2389_s9 = spop %2388 }
 0x830   :  { %s1654_s0 = smul.f32 %s3811_s4, %s3435_s23  ;;  %s2391_s21 = spop %2390 }
 0x831   :  { %s1653_s22 = smul.f32 %s3437_s14, %s3810_s20  ;;  %s2393_s7 = spop %2392 }
 0x832   :  { %s3449_s18 = smul.f32 0.001953125, %s2385_s26  ;;  %s3819_s26 = smov 96  }
 0x833   :  { %s3447_s29 = sadd.f32 %s1654_s0, %s1653_s22  ;;  %s3451_s8 = smul.f32 0.001953125, %s2387_s12 }
 0x834   :  { %s1768_s11 = smul.f32 0.001953125, %s2389_s9 }
 0x835   :  { %v1672_v29 = vstv %s3447_s29  ;;  %s1769_s15 = smul.f32 %s3449_s18, %s3449_s18 }
 0x836   :  { %v1673_v62 = vmul.f32 %v1672_v29, %v2810_v50  ;;  %v1674_v42 = vmul.f32 %v1672_v29, %v2821_v56  ;;  %s1772_s1 = smul.f32 0.001953125, %s2391_s21 }
 0x837   :  { %s1770_s22 = ssub.f32 %s1768_s11, %s1769_s15  ;;  %s1773_s12 = smul.f32 %s3451_s8, %s3451_s8 }
 0x838   :  { %1677 = vrot.lane.b32.xlu0 %v1673_v62, %s3819_s26  ;;  %1679 = vrot.lane.b32.xlu1 %v1674_v42, %s3819_s26  ;;  %s1776_s0 = smul.f32 0.001953125, %s2393_s7 }
 0x839   :  { %s3462_s9 = sadd.f32 1e-05, %s1770_s22  ;;  %s1777_s10 = smul.f32 %s3451_s8, %s3449_s18 }
 0x83a   :  { %s1659_s21 = smul.f32 %s3011_s2, %s3435_s23  ;;  %s1774_s24 = ssub.f32 %s1772_s1, %s1773_s12 }
 0x83b   :  { %s3468_s5 = ssub.f32 %s1776_s0, %s1777_s10  ;;  %s1651_s25 = smul.f32 %s3811_s4, %s3437_s14 }
 0x83c   :  { %s3472_s30 = sadd.f32 1e-05, %s1774_s24  ;;  %s1657_s11 = smul.f32 %s3011_s2, %s3437_s14 }
 0x83d   :  { %s1780_s15 = smul.f32 %s3468_s5, %s3468_s5  ;;  %s3489_s12 = sadd.f32 %s1659_s21, %s1651_s25 }
 0x83e   :  { %s1779_s7 = smul.f32 %s3472_s30, %s3462_s9 }
 0x83f   :  { %s3820_s22 = smul.f32 %s3433_s13, %s3810_s20  ;;  %v1691_v55 = vstv %s3489_s12 }
 0x840   :  { %s1662_s17 = smul.f32 %s3447_s29, %s3376_s6  ;;  %s1781_s23 = ssub.f32 %s1779_s7, %s1780_s15  ;;  %v1692_v57 = vmul.f32 %v1691_v55, %v2810_v50  ;;  %v1693_v18 = vmul.f32 %v1691_v55, %v2821_v56 }
 0x841   :  { %s3483_s28 = sadd.f32 %s1651_s25, %s3820_s22  ;;  %s3821_s10 = smul.f32 %s3811_s4, %s3433_s13 }
 0x842   :  { %v1782_v7 = vstv %s1781_s23  ;;  %s1666_s0 = smul.f32 %s3489_s12, %s3376_s6  ;;  %s1811_s7 = ssub.f32 0.0, %s3468_s5 }
 0x843   :  { %s1661_s1 = smul.f32 %s3483_s28, %s3374_s16  ;;  %s3494_s24 = sadd.f32 %s1657_s11, %s3821_s10  ;;  %2513 = vrsqrt.f32 %v1782_v7  ;;  %vm1785_vm15 = vcmp.eq.f32.partialorder %v1782_v7, inf  ;;  %v1788_v46 = vand.u32 2147483648, %v1782_v7  ;;  %vm1787_vm4 = vcmp.eq.f32.partialorder %v1782_v7, 0.0 }
 0x844   :  { %v1669_v25 = vstv %s3483_s28 }
 0x845   :  { %s3496_s14 = sadd.f32 %s1662_s17, %s1661_s1  ;;  %s1665_s22 = smul.f32 %s3494_s24, %s3374_s16  ;;  %v1670_v27 = vmul.f32 %v1669_v25, %v2810_v50  ;;  %v1671_v30 = vmul.f32 %v1669_v25, %v2821_v56 }
 0x846   :  { %s1791_s17 = sadd.f32 %s3472_s30, %s3462_s9 }
 0x847   :  { %s3502_s3 = sadd.f32 %s1666_s0, %s1665_s22 }
 0x848   :  { %s1664_s16 = ssub.f32 %s3291_s27, %s3496_s14 }
 0x849   :  { %s1668_s12 = ssub.f32 %s3299_s19, %s3502_s3  ;;  %s3822_s3 = sld [smem:[#allocation23_spill]] }
 0x84a   :  { %v1685_v35 = vstv %s1664_s16 }
 0x84d   :  { %v2514_v44 = vpop.eup %2513 }
 0x84e   :  { %v1784_v43 = vmul.f32 %v2514_v44, %v1782_v7  ;;  %v1688_v44 = vstv %s3494_s24  ;;  %s3823_s24 = sld [smem:[#allocation25_spill]] }
 0x84f   :  { %v1689_v25 = vmul.f32 %v1688_v44, %v2810_v50 }
 0x850   :  { %v1786_v2 = vsel %vm1785_vm15, %v1782_v7, %v1784_v43 }
 0x851   :  { %v1789_v3 = vsel %vm1787_vm4, %v1788_v46, %v1786_v2 }
 0x852   :  { %2394 = vpush %v1789_v3 }
 0x883   :  { %s3504_s25 = spop %2394 }
 0x884   :  { %s1792_s29 = smul.f32 2.0, %s3504_s25  ;;  %s1807_s21 = sadd.f32 %s3504_s25, %s3472_s30 }
 0x885   :  { %s1809_s15 = sadd.f32 %s3504_s25, %s3462_s9 }
 0x886   :  { %s1793_s6 = sadd.f32 %s1792_s29, %s1791_s17 }
 0x888   :  { %v1794_v4 = vstv %s1793_s6 }
 0x889   :  { %2515 = vrsqrt.f32 %v1794_v4  ;;  %vm1797_vm6 = vcmp.eq.f32.partialorder %v1794_v4, inf  ;;  %v1800_v14 = vand.u32 2147483648, %v1794_v4  ;;  %vm1799_vm7 = vcmp.eq.f32.partialorder %v1794_v4, 0.0 }
 0x893   :  { %v2516_v17 = vpop.eup %2515 }
 0x894   :  { %v1796_v10 = vmul.f32 %v2516_v17, %v1794_v4 }
 0x896   :  { %v1798_v23 = vsel %vm1797_vm6, %v1794_v4, %v1796_v10 }
 0x897   :  { %v1801_v13 = vsel %vm1799_vm7, %v1800_v14, %v1798_v23 }
 0x898   :  { %2396 = vpush %v1801_v13 }
 0x8aa   :  { %v1678_v31 = vpop.permute.xlu0 %1677  ;;  %v1680_v32 = vpop.permute.xlu1 %1679 }
 0x8ab   :  { %v1683_v33 = vadd.f32 %v1678_v31, %v1670_v27  ;;  %v1684_v34 = vadd.f32 %v1680_v32, %v1671_v30 }
 0x8ad   :  { %v3514_v36 = vadd.f32 %v1685_v35, %v1683_v33  ;;  %v3516_v37 = vadd.f32 %v1685_v35, %v1684_v34 }
 0x8c9   :  { %s2397_s28 = spop %2396 }
 0x8ca   :  { %s1803_s13 = smul.f32 %s2397_s28, %s3504_s25 }
 0x8cc   :  { %v1804_v39 = vstv %s1803_s13 }
 0x8cd   :  { %2517 = vrcp.f32 %v1804_v39 }
 0x8ce   :  { %2519 = vtanh.f32 %v1170_v58 }
 0x8cf   :  { %2521 = vtanh.f32 %v1171_v26 }
 0x8d0   :  { %2523 = vtanh.f32 %v1180_v15 }
 0x8d1   :  { %2525 = vtanh.f32 %v1181_v19 }
 0x8d7   :  { %v2518_v40 = vpop.eup %2517 }
 0x8d8   :  { %2398 = vpush %v2518_v40  ;;  %v2520_v28 = vpop.eup %2519 }
 0x8d9   :  { %v2522_v21 = vpop.eup %2521  ;;  %v1174_v59 = vadd.f32 1.0, %v2520_v28 }
 0x8da   :  { %v1175_v24 = vadd.f32 1.0, %v2522_v21  ;;  %v2524_v12 = vpop.eup %2523 }
 0x8db   :  { %v2526_v16 = vpop.eup %2525  ;;  %v3568_v61 = vmul.f32 0.5, %v1174_v59  ;;  %v1184_v43 = vadd.f32 1.0, %v2524_v12 }
 0x8dc   :  { %v3570_v62 = vmul.f32 0.5, %v1175_v24  ;;  %v1185_v46 = vadd.f32 1.0, %v2526_v16 }
 0x8dd   :  { %v3585_v32 = vmul.f32 0.5, %v1184_v43 }
 0x909   :  { %s2399_s11 = spop %2398 }
 0x90a   :  { %s1808_s23 = smul.f32 %s2399_s11, %s1807_s21 }
 0x90b   :  { %s1810_s1 = smul.f32 %s2399_s11, %s1809_s15 }
 0x90c   :  { %s1812_s10 = smul.f32 %s2399_s11, %s1811_s7 }
 0x90d   :  { %s1813_s14 = smul.f32 %s1808_s23, %s3810_s20 }
 0x90e   :  { %s1814_s0 = smul.f32 %s3811_s4, %s1812_s10 }
 0x90f   :  { %s1816_s22 = smul.f32 %s1812_s10, %s3810_s20 }
 0x910   :  { %s1817_s17 = smul.f32 %s3811_s4, %s1810_s1  ;;  %s3528_s29 = sadd.f32 %s1814_s0, %s1813_s14 }
 0x911   :  { %s1819_s6 = smul.f32 %s3811_s4, %s1808_s23  ;;  %s3824_s23 = sld [smem:[#allocation18_spill]] }
 0x912   :  { %s1822_s16 = smul.f32 %s3011_s2, %s1810_s1  ;;  %s1818_s28 = sadd.f32 %s1817_s17, %s1816_s22  ;;  %v1832_v20 = vstv %s3528_s29 }
 0x913   :  { %s1824_s30 = smul.f32 %s3528_s29, %s3449_s18  ;;  %v1833_v63 = vmul.f32 %v1832_v20, %v2845_v9  ;;  %v1834_v22 = vmul.f32 %v1832_v20, %v2849_v11  ;;  %v1321_v20 = vstv %s3822_s3  ;;  %s3825_s1 = smov 64  }
 0x914   :  { %v1835_v45 = vstv %s1818_s28  ;;  %s1823_s5 = sadd.f32 %s1822_s16, %s1814_s0  ;;  %s1825_s9 = smul.f32 %s1818_s28, %s3451_s8 }
 0x915   :  { %v1836_v47 = vmul.f32 %v1835_v45, %v2845_v9  ;;  %v1837_v48 = vmul.f32 %v1835_v45, %v2849_v11  ;;  %s1820_s25 = smul.f32 %s3011_s2, %s1812_s10  ;;  %s3826_s10 = smov 32  }
 0x916   :  { %v1854_v49 = vstv %s1823_s5  ;;  %s3538_s13 = sadd.f32 %s1825_s9, %s1824_s30  ;;  %s1829_s11 = smul.f32 %s1823_s5, %s3451_s8 }
 0x917   :  { %1840 = vrot.lane.b32.xlu0 %v1836_v47, %s3819_s26  ;;  %1842 = vrot.lane.b32.xlu1 %v1837_v48, %s3819_s26  ;;  %s3542_s21 = sadd.f32 %s1820_s25, %s1819_s6  ;;  %v1855_v52 = vmul.f32 %v1854_v49, %v2845_v9  ;;  %v1856_v54 = vmul.f32 %v1854_v49, %v2849_v11  ;;  %s3827_s14 = sld [smem:[#allocation19_spill]] }
 0x918   :  { %s3828_s0 = sld [smem:[#allocation22_spill]]  ;;  %s3829_s22 = sld [smem:[#allocation26_spill]] }
 0x919   :  { %s1828_s15 = smul.f32 %s3542_s21, %s3449_s18  ;;  %s1827_s18 = ssub.f32 %s3291_s27, %s3538_s13  ;;  %v1851_v6 = vstv %s3542_s21 }
 0x91a   :  { %v1852_v2 = vmul.f32 %v1851_v6, %v2845_v9  ;;  %v1853_v4 = vmul.f32 %v1851_v6, %v2849_v11  ;;  %v1690_v9 = vmul.f32 %v1688_v44, %v2821_v56  ;;  %v3587_v11 = vmul.f32 0.5, %v1185_v46  ;;  %s3830_s17 = sld [smem:[#allocation27_spill]]  ;;  %s3831_s29 = sld [smem:[#allocation20_spill]] }
 0x91b   :  { %1859 = vrot.lane.b32.xlu0 %v1855_v52, %s3819_s26  ;;  %1861 = vrot.lane.b32.xlu1 %v1856_v54, %s3819_s26  ;;  %s3552_s7 = sadd.f32 %s1829_s11, %s1828_s15  ;;  %v1848_v29 = vstv %s1827_s18  ;;  %v1323_v6 = vmul.f32 %v1321_v20, %v2816_v53  ;;  %s3832_s16 = sld [smem:[#allocation21_spill]] }
 0x91c   :  { %s3833_s28 = sld [smem:[#allocation24_spill]]  ;;  %s3834_s5 = sld [smem:[#allocation28_spill]] }
 0x91d   :  { %s1831_s8 = ssub.f32 %s3299_s19, %s3552_s7  ;;  %v1508_v44 = vstv %s3827_s14  ;;  %s3835_s9 = sld [smem:[#allocation29_spill]] }
 0x91e   :  { %v1509_v43 = vmul.f32 %v1508_v44, %v2835_v1  ;;  %s1313_s6 = ssub.f32 %s3291_s27, %s3829_s22 }
 0x91f   :  { %1696 = vrot.lane.b32.xlu0 %v1692_v57, %s3819_s26  ;;  %1698 = vrot.lane.b32.xlu1 %v1693_v18, %s3819_s26  ;;  %v1867_v31 = vstv %s1831_s8 }
 0x920   :  { %s1317_s30 = ssub.f32 %s3299_s19, %s3831_s29 }
 0x922   :  { %s1481_s25 = ssub.f32 %s3291_s27, %s3833_s28 }
 0x923   :  { %s1485_s13 = ssub.f32 %s3299_s19, %s3835_s9 }
 0x989   :  { %v1841_v41 = vpop.permute.xlu0 %1840  ;;  %v1843_v0 = vpop.permute.xlu1 %1842 }
 0x98a   :  { %v1846_v60 = vadd.f32 %v1841_v41, %v1833_v63  ;;  %v1847_v8 = vadd.f32 %v1843_v0, %v1834_v22  ;;  %v1322_v0 = vmul.f32 %v1321_v20, %v2812_v51 }
 0x98c   :  { %v1849_v42 = vadd.f32 %v1848_v29, %v1846_v60  ;;  %v1850_v7 = vadd.f32 %v1848_v29, %v1847_v8  ;;  %v1340_v60 = vstv %s3823_s24  ;;  %v1489_v29 = vstv %s3824_s23 }
 0x98d   :  { %v1860_v3 = vpop.permute.xlu0 %1859  ;;  %v1862_v17 = vpop.permute.xlu1 %1861  ;;  %v1341_v8 = vmul.f32 %v1340_v60, %v2812_v51  ;;  %v1491_v46 = vmul.f32 %v1489_v29, %v2839_v5 }
 0x98e   :  { %v1870_v10 = vmul.f32 %v1849_v42, %v3568_v61  ;;  %v1871_v14 = vmul.f32 %v1850_v7, %v3570_v62  ;;  %v1865_v23 = vadd.f32 %v1860_v3, %v1852_v2  ;;  %v1866_v13 = vadd.f32 %v1862_v17, %v1853_v4 }
 0x98f   :  { %v1882_v55 = vmul.f32 %v1849_v42, %v3585_v32  ;;  %v1883_v57 = vmul.f32 %v1850_v7, %v3587_v11  ;;  %v1490_v42 = vmul.f32 %v1489_v29, %v2835_v1  ;;  %v1342_v7 = vmul.f32 %v1340_v60, %v2816_v53 }
 0x990   :  { %v1872_v27 = vadd.f32 %v1870_v10, %v3514_v36  ;;  %v1873_v30 = vadd.f32 %v1871_v14, %v3516_v37  ;;  %v1868_v33 = vadd.f32 %v1867_v31, %v1865_v23  ;;  %v1869_v34 = vadd.f32 %v1867_v31, %v1866_v13 }
 0x991   :  { %v1697_v35 = vpop.permute.xlu0 %1696  ;;  %v1699_v39 = vpop.permute.xlu1 %1698  ;;  %v1704_v36 = vstv %s1668_s12  ;;  %v1510_v2 = vmul.f32 %v1508_v44, %v2839_v5  ;;  %v1318_v4 = vstv %s3828_s0  ;;  %v1521_v44 = vstv %s1485_s13 }
 0x992   :  { %v1702_v40 = vadd.f32 %v1697_v35, %v1689_v25  ;;  %v1703_v45 = vadd.f32 %v1699_v39, %v1690_v9  ;;  %v1874_v47 = vmul.f32 %v1868_v33, %v3585_v32  ;;  %v1875_v50 = vmul.f32 %v1869_v34, %v3587_v11 }
 0x993   :  { %v1878_v37 = vmul.f32 %v1868_v33, %v3568_v61  ;;  %v1879_v56 = vmul.f32 %v1869_v34, %v3570_v62  ;;  %v1319_v23 = vmul.f32 %v1318_v4, %v2812_v51  ;;  %v1334_v35 = vstv %s1313_s6 }
 0x994   :  { %v1705_v48 = vadd.f32 %v1704_v36, %v1702_v40  ;;  %v1706_v49 = vadd.f32 %v1704_v36, %v1703_v45  ;;  %v3593_v52 = vsub.f32 %v1872_v27, %v1874_v47  ;;  %v3595_v54 = vsub.f32 %v1873_v30, %v1875_v50 }
 0x995   :  { %v1337_v30 = vstv %s3830_s17 }
 0x996   :  { %v1880_v18 = vadd.f32 %v1878_v37, %v1705_v48  ;;  %v1881_v58 = vadd.f32 %v1879_v56, %v1706_v49  ;;  %v1886_v26 = vmul.f32 %v3593_v52, %v3593_v52  ;;  %v1887_v15 = vmul.f32 %v3595_v54, %v3595_v54 }
 0x997   :  { %v1338_v36 = vmul.f32 %v1337_v30, %v2812_v51  ;;  %v1320_v49 = vmul.f32 %v1318_v4, %v2816_v53 }
 0x998   :  { %v3603_v19 = vadd.f32 %v1882_v55, %v1880_v18  ;;  %v3605_v28 = vadd.f32 %v1883_v57, %v1881_v58  ;;  %v2458_v21 = vpack.i.bf16 %v1887_v15, %v1886_v26  ;;  %v1486_v55 = vstv %s3832_s16 }
 0x999   :  { %v1353_v26 = vstv %s1317_s30  ;;  %v1487_v51 = vmul.f32 %v1486_v55, %v2835_v1  ;;  %v1488_v29 = vmul.f32 %v1486_v55, %v2839_v5 }
 0x99a   :  { %v2453_v59 = vpack.i.bf16 %v3605_v28, %v3603_v19  ;;  %v1890_v24 = vmul.f32 %v3603_v19, %v3593_v52  ;;  %v1891_v63 = vmul.f32 %v3605_v28, %v3595_v54  ;;  %v1888_v22 = vmul.f32 %v3603_v19, %v3603_v19  ;;  %2459 = vrot.lane.b32.xlu1 %v2458_v21, %s3825_s1 }
 0x99b   :  { %v1889_v12 = vmul.f32 %v3605_v28, %v3605_v28 }
 0x99c   :  { %2454 = vrot.lane.b32.xlu0 %v2453_v59, %s3826_s10  ;;  %v2300_v41 = vpack.c.bf16 %v1891_v63, %v1890_v24  ;;  %v1339_v24 = vmul.f32 %v1337_v30, %v2816_v53  ;;  %v1505_v63 = vstv %s3834_s5 }
 0x99d   :  { %v2463_v16 = vpack.i.bf16 %v1889_v12, %v1888_v22  ;;  %v1506_v60 = vmul.f32 %v1505_v63, %v2835_v1 }
 0x99e   :  { %2301 = vmatprep.subr.bf16.mxu0 %v2300_v41  ;;  %1326 = vrot.lane.b32.xlu1 %v1322_v0, %s3819_s26  ;;  %v1502_v41 = vstv %s1481_s25 }
 0x9a0   :  { %2464 = vrot.lane.b32.xlu0 %v2463_v16, %s3819_s26 }
 0x9a2   :  { %1345 = vrot.lane.b32.xlu1 %v1341_v8, %s3819_s26 }
 0x9a4   :  { %1328 = vrot.lane.b32.xlu0 %v1323_v6, %s3819_s26 }
 0x9a6   :  { %1494 = vrot.lane.b32.xlu1 %v1490_v42, %s3819_s26 }
 0x9a8   :  { %1347 = vrot.lane.b32.xlu0 %v1342_v7, %s3819_s26 }
 0x9aa   :  { %1513 = vrot.lane.b32.xlu1 %v1509_v43, %s3819_s26 }
 0x9ac   :  { %1496 = vrot.lane.b32.xlu0 %v1491_v46, %s3819_s26 }
 0x9b0   :  { %1515 = vrot.lane.b32.xlu0 %v1510_v2, %s3819_s26 }
 0xa0c   :  { %v2460_v3 = vpop.permute.xlu1 %2459 }
 0xa0d   :  { %v2462_v31 = vunpack.i.h.bf16 %v2460_v3  ;;  %v2461_v9 = vunpack.i.l.bf16 %v2460_v3  ;;  %v1507_v3 = vmul.f32 %v1505_v63, %v2839_v5 }
 0xa0e   :  { %v2455_v17 = vpop.permute.xlu0 %2454 }
 0xa0f   :  { %v2457_v10 = vunpack.i.h.bf16 %v2455_v17  ;;  %v2456_v14 = vunpack.i.l.bf16 %v2455_v17 }
 0xa10   :  { %v1327_v27 = vpop.permute.xlu1 %1326 }
 0xa11   :  { %v1917_v13 = vsel %vm117_vm0, %v3595_v54, %v2457_v10  ;;  %v1916_v25 = vsel %vm117_vm0, %v3593_v52, %v2456_v14  ;;  %v1332_v33 = vadd.f32 %v1327_v27, %v1319_v23 }
 0xa12   :  { %v2465_v34 = vpop.permute.xlu0 %2464  ;;  %v1918_v47 = vsel %vm232_vm1, %v1916_v25, %v2461_v9  ;;  %v1919_v50 = vsel %vm232_vm1, %v1917_v13, %v2462_v31 }
 0xa13   :  { %v2467_v39 = vunpack.i.h.bf16 %v2465_v34  ;;  %v2466_v40 = vunpack.i.l.bf16 %v2465_v34  ;;  %v1335_v45 = vadd.f32 %v1334_v35, %v1332_v33 }
 0xa14   :  { %v1346_v48 = vpop.permute.xlu1 %1345 }
 0xa15   :  { %v1920_v37 = vsel %vm328_vm2, %v1918_v47, %v2466_v40  ;;  %v1921_v56 = vsel %vm328_vm2, %v1919_v50, %v2467_v39  ;;  %v1351_v18 = vadd.f32 %v1346_v48, %v1338_v36  ;;  %v2468_v48 = vpack.i.bf16 %v3587_v11, %v3585_v32 }
 0xa16   :  { %v2302_v57 = vpack.c.bf16 %v1921_v56, %v1920_v37  ;;  %v1329_v58 = vpop.permute.xlu0 %1328 }
 0xa17   :  { %v1333_v15 = vadd.f32 %v1329_v58, %v1320_v49  ;;  %v1354_v21 = vadd.f32 %v1353_v26, %v1351_v18 }
 0xa18   :  { %2303 = vmatpush1.bf16.msra.mxu0 %v2302_v57  ;;  %v1495_v59 = vpop.permute.xlu1 %1494 }
 0xa19   :  { %v1336_v20 = vadd.f32 %v1334_v35, %v1333_v15  ;;  %v1500_v22 = vadd.f32 %v1495_v59, %v1487_v51 }
 0xa1a   :  { %v1348_v12 = vpop.permute.xlu0 %1347 }
 0xa1b   :  { %v1352_v0 = vadd.f32 %v1348_v12, %v1339_v24  ;;  %2229 = vmatmul.mubr.msk.f32.vlgmr.msra.gmra.mrb[12].mxu0 %vm363_vm3, %v2691_v38  ;;  %v1503_v16 = vadd.f32 %v1502_v41, %v1500_v22 }
 0xa1c   :  { %v1514_v6 = vpop.permute.xlu1 %1513 }
 0xa1d   :  { %v1355_v8 = vadd.f32 %v1353_v26, %v1352_v0  ;;  %v3669_v42 = vadd.f32 %v1503_v16, %v1335_v45  ;;  %v1519_v7 = vadd.f32 %v1514_v6, %v1506_v60 }
 0xa1e   :  { %v1497_v53 = vpop.permute.xlu0 %1496 }
 0xa1f   :  { %v1501_v43 = vadd.f32 %v1497_v53, %v1488_v29  ;;  %v1522_v46 = vadd.f32 %v1521_v44, %v1519_v7 }
 0xa21   :  { %v1504_v2 = vadd.f32 %v1502_v41, %v1501_v43  ;;  %v1534_v4 = vadd.f32 %v1522_v46, %v1354_v21 }
 0xa22   :  { %v1516_v38 = vpop.permute.xlu0 %1515 }
 0xa23   :  { %v3672_v17 = vadd.f32 %v1504_v2, %v1336_v20  ;;  %v1520_v10 = vadd.f32 %v1516_v38, %v1507_v3  ;;  %v1536_v1 = vmul.f32 0.5, %v1534_v4 }
 0xa25   :  { %v1523_v14 = vadd.f32 %v1521_v44, %v1520_v10  ;;  %2527 = vtanh.f32 %v1536_v1 }
 0xa27   :  { %v1535_v23 = vadd.f32 %v1523_v14, %v1355_v8 }
 0xa29   :  { %v1537_v13 = vmul.f32 0.5, %v1535_v23 }
 0xa2b   :  { %2529 = vtanh.f32 %v1537_v13 }
 0xa2f   :  { %v2528_v25 = vpop.eup %2527 }
 0xa30   :  { %v1540_v27 = vadd.f32 1.0, %v2528_v25 }
 0xa32   :  { %v1542_v9 = vmul.f32 0.5, %v1540_v27 }
 0xa35   :  { %v2530_v30 = vpop.eup %2529 }
 0xa36   :  { %v1541_v31 = vadd.f32 1.0, %v2530_v30 }
 0xa38   :  { %v1543_v33 = vmul.f32 0.5, %v1541_v31 }
 0xa3a   :  { %v2473_v34 = vpack.i.bf16 %v1543_v33, %v1542_v9 }
 0xaee   :  { %v1988_v35 = vpop.f32.mrb[12].mxu0 }
 0xaef   :  { %2017 = vrot.lane.b32.xlu1 %v1988_v35, %s3825_s1  ;;  %2004 = vrot.lane.b32.xlu0 %v1988_v35, %s3819_s26  ;;  %v1990_v5 = vpop.f32.mrb[13].mxu0  ;;  %v1993_v39 = vsel %vm837_vm5, %v1988_v35, 0.0 }
 0xaf0   :  { %v2043_v56 = vsel %vm837_vm5, %v1990_v5, 0.0 }
 0xaf3   :  { %2030 = vrot.lane.b32.xlu0 %v1988_v35, %s3826_s10 }
 0xb13   :  { %1994 = vadd.xlane.f32.xlu1 %v1993_v39 }
 0xb61   :  { %v2018_v40 = vpop.permute.xlu1 %2017  ;;  %v2005_v45 = vpop.permute.xlu0 %2004 }
 0xb62   :  { %v2007_v47 = vsel %vm837_vm5, %v2005_v45, 0.0  ;;  %v2020_v50 = vsel %vm837_vm5, %v2018_v40, 0.0 }
 0xb63   :  { %2008 = vadd.xlane.f32.xlu0 %v2007_v47  ;;  %2021 = vadd.xlane.f32.xlu1 %v2020_v50 }
 0xb65   :  { %v2031_v36 = vpop.permute.xlu0 %2030 }
 0xb66   :  { %v2033_v37 = vsel %vm837_vm5, %v2031_v36, 0.0 }
 0xb67   :  { %2034 = vadd.xlane.f32.xlu0 %v2033_v37  ;;  %2044 = vadd.xlane.f32.xlu1 %v2043_v56 }
 0xb78   :  { %2474 = vrot.lane.b32.xlu1 %v2473_v34, %s3826_s10 }
 0xb7d   :  { %2469 = vrot.lane.b32.xlu0 %v2468_v48, %s3826_s10 }
 0xba0   :  { %v1995_v49 = vpop.xlane.xlu1 %1994 }
 0xba1   :  { %v1996_v55 = vrot.slane %v1995_v49, 4 }
 0xba3   :  { %v1997_v57 = vadd.f32 %v1996_v55, %v1995_v49 }
 0xba5   :  { %v1998_v18 = vrot.slane %v1997_v57, 2 }
 0xba7   :  { %v1999_v58 = vadd.f32 %v1998_v18, %v1997_v57 }
 0xba9   :  { %v2000_v26 = vrot.slane %v1999_v58, 1 }
 0xbab   :  { %v2001_v15 = vadd.f32 %v2000_v26, %v1999_v58 }
 0xbad   :  { %2400 = vpush %v2001_v15 }
 0xbde   :  { %s2401_s26 = spop %2400 }
 0xbdf   :  { %s3686_s21 = smul.f32 0.001953125, %s2401_s26 }
 0xbe1   :  { %s2056_s15 = smul.f32 %s3686_s21, %s3686_s21 }
 0xbf0   :  { %v2009_v21 = vpop.xlane.xlu0 %2008  ;;  %v2022_v51 = vpop.xlane.xlu1 %2021 }
 0xbf1   :  { %v2010_v20 = vrot.slane %v2009_v21, 4  ;;  %v2023_v59 = vrot.slane %v2022_v51, 4 }
 0xbf3   :  { %v2011_v24 = vadd.f32 %v2010_v20, %v2009_v21  ;;  %v2024_v63 = vadd.f32 %v2023_v59, %v2022_v51 }
 0xbf4   :  { %v2035_v22 = vpop.xlane.xlu0 %2034  ;;  %v2045_v12 = vpop.xlane.xlu1 %2044 }
 0xbf5   :  { %v2012_v41 = vrot.slane %v2011_v24, 2  ;;  %v2025_v32 = vrot.slane %v2024_v63, 2  ;;  %v2036_v11 = vrot.slane %v2035_v22, 4  ;;  %v2046_v0 = vrot.slane %v2045_v12, 4 }
 0xbf7   :  { %v2037_v16 = vadd.f32 %v2036_v11, %v2035_v22  ;;  %v2047_v60 = vadd.f32 %v2046_v0, %v2045_v12  ;;  %v2013_v8 = vadd.f32 %v2012_v41, %v2011_v24  ;;  %v2026_v6 = vadd.f32 %v2025_v32, %v2024_v63 }
 0xbf8   :  { %v2470_v11 = vpop.permute.xlu0 %2469 }
 0xbf9   :  { %v2038_v29 = vrot.slane %v2037_v16, 2  ;;  %v2048_v7 = vrot.slane %v2047_v60, 2  ;;  %v2014_v53 = vrot.slane %v2013_v8, 1  ;;  %v2027_v44 = vrot.slane %v2026_v6, 1 }
 0xbfb   :  { %v2039_v43 = vadd.f32 %v2038_v29, %v2037_v16  ;;  %v2049_v46 = vadd.f32 %v2048_v7, %v2047_v60  ;;  %v2015_v2 = vadd.f32 %v2014_v53, %v2013_v8  ;;  %v2028_v3 = vadd.f32 %v2027_v44, %v2026_v6  ;;  %v2475_v29 = vpop.permute.xlu1 %2474 }
 0xbfc   :  { %v2472_v16 = vunpack.i.h.bf16 %v2470_v11  ;;  %v2471_v60 = vunpack.i.l.bf16 %v2470_v11 }
 0xbfd   :  { %v2040_v4 = vrot.slane %v2039_v43, 1  ;;  %v2050_v38 = vrot.slane %v2049_v46, 1  ;;  %2402 = vpush %v2015_v2 }
 0xbfe   :  { %2404 = vpush %v2028_v3  ;;  %v2170_v7 = vsel %vm117_vm0, %v3570_v62, %v2472_v16  ;;  %v2477_v3 = vunpack.i.h.bf16 %v2475_v29 }
 0xbff   :  { %v2041_v10 = vadd.f32 %v2040_v4, %v2039_v43  ;;  %v2051_v1 = vadd.f32 %v2050_v38, %v2049_v46  ;;  %v2476_v4 = vunpack.i.l.bf16 %v2475_v29 }
 0xc01   :  { %2406 = vpush %v2041_v10 }
 0xc02   :  { %2408 = vpush %v2051_v1 }
 0xc2e   :  { %s2403_s11 = spop %2402 }
 0xc2f   :  { %s3690_s7 = smul.f32 0.001953125, %s2403_s11  ;;  %s2405_s18 = spop %2404 }
 0xc30   :  { %s2055_s8 = smul.f32 0.001953125, %s2405_s18 }
 0xc31   :  { %s2060_s3 = smul.f32 %s3690_s7, %s3690_s7 }
 0xc32   :  { %s2407_s12 = spop %2406  ;;  %s2057_s24 = ssub.f32 %s2055_s8, %s2056_s15 }
 0xc33   :  { %s2059_s23 = smul.f32 0.001953125, %s2407_s12  ;;  %s2409_s1 = spop %2408 }
 0xc34   :  { %s2064_s14 = smul.f32 %s3690_s7, %s3686_s21  ;;  %s3696_s0 = sadd.f32 1e-05, %s2057_s24 }
 0xc35   :  { %s2063_s22 = smul.f32 0.001953125, %s2409_s1  ;;  %s2061_s17 = ssub.f32 %s2059_s23, %s2060_s3 }
 0xc37   :  { %s3698_s29 = ssub.f32 %s2063_s22, %s2064_s14 }
 0xc38   :  { %s3700_s6 = sadd.f32 1e-05, %s2061_s17 }
 0xc39   :  { %s2067_s16 = smul.f32 %s3698_s29, %s3698_s29  ;;  %s2098_s3 = ssub.f32 0.0, %s3698_s29 }
 0xc3a   :  { %s2066_s28 = smul.f32 %s3700_s6, %s3696_s0  ;;  %s2078_s9 = sadd.f32 %s3700_s6, %s3696_s0 }
 0xc3c   :  { %s2068_s30 = ssub.f32 %s2066_s28, %s2067_s16 }
 0xc3e   :  { %v2069_v14 = vstv %s2068_s30 }
 0xc3f   :  { %2531 = vrsqrt.f32 %v2069_v14  ;;  %vm2072_vm3 = vcmp.eq.f32.partialorder %v2069_v14, inf  ;;  %v2075_v25 = vand.u32 2147483648, %v2069_v14  ;;  %vm2074_vm5 = vcmp.eq.f32.partialorder %v2069_v14, 0.0 }
 0xc49   :  { %v2532_v23 = vpop.eup %2531 }
 0xc4a   :  { %v2071_v13 = vmul.f32 %v2532_v23, %v2069_v14 }
 0xc4c   :  { %v2073_v27 = vsel %vm2072_vm3, %v2069_v14, %v2071_v13 }
 0xc4d   :  { %v2076_v30 = vsel %vm2074_vm5, %v2075_v25, %v2073_v27 }
 0xc4e   :  { %2410 = vpush %v2076_v30 }
 0xc7f   :  { %s2411_s5 = spop %2410 }
 0xc80   :  { %s2079_s25 = smul.f32 2.0, %s2411_s5  ;;  %s2094_s15 = sadd.f32 %s2411_s5, %s3700_s6 }
 0xc81   :  { %s2096_s8 = sadd.f32 %s2411_s5, %s3696_s0 }
 0xc82   :  { %s2080_s13 = sadd.f32 %s2079_s25, %s2078_s9 }
 0xc84   :  { %v2081_v31 = vstv %s2080_s13 }
 0xc85   :  { %2533 = vrsqrt.f32 %v2081_v31  ;;  %vm2084_vm8 = vcmp.eq.f32.partialorder %v2081_v31, inf  ;;  %v2087_v34 = vand.u32 2147483648, %v2081_v31  ;;  %vm2086_vm9 = vcmp.eq.f32.partialorder %v2081_v31, 0.0 }
 0xc8f   :  { %v2534_v9 = vpop.eup %2533 }
 0xc90   :  { %v2083_v33 = vmul.f32 %v2534_v9, %v2081_v31 }
 0xc92   :  { %v2085_v35 = vsel %vm2084_vm8, %v2081_v31, %v2083_v33 }
 0xc93   :  { %v2088_v5 = vsel %vm2086_vm9, %v2087_v34, %v2085_v35 }
 0xc94   :  { %2412 = vpush %v2088_v5 }
 0xcc5   :  { %s2413_s26 = spop %2412 }
 0xcc6   :  { %s2090_s11 = smul.f32 %s2413_s26, %s2411_s5 }
 0xcc8   :  { %v2091_v39 = vstv %s2090_s11 }
 0xcc9   :  { %2535 = vrcp.f32 %v2091_v39 }
 0xcd3   :  { %v2536_v40 = vpop.eup %2535 }
 0xcd4   :  { %2414 = vpush %v2536_v40 }
 0xd05   :  { %s2415_s18 = spop %2414 }
 0xd06   :  { %s2095_s12 = smul.f32 %s2415_s18, %s2094_s15 }
 0xd07   :  { %s2097_s24 = smul.f32 %s2415_s18, %s2096_s8 }
 0xd08   :  { %s2099_s23 = smul.f32 %s2415_s18, %s2098_s3 }
 0xd09   :  { %s2100_s1 = smul.f32 %s2095_s12, %s3810_s20 }
 0xd0a   :  { %s2101_s14 = smul.f32 %s3811_s4, %s2099_s23 }
 0xd0b   :  { %s2103_s22 = smul.f32 %s2099_s23, %s3810_s20 }
 0xd0c   :  { %s2102_s17 = sadd.f32 %s2101_s14, %s2100_s1  ;;  %s2104_s16 = smul.f32 %s3811_s4, %s2097_s24 }
 0xd0d   :  { %s2106_s28 = smul.f32 %s3811_s4, %s2095_s12 }
 0xd0e   :  { %s2105_s30 = sadd.f32 %s2104_s16, %s2103_s22  ;;  %s2107_s9 = smul.f32 %s3011_s2, %s2099_s23  ;;  %v2119_v45 = vstv %s2102_s17 }
 0xd0f   :  { %s2109_s6 = smul.f32 %s3011_s2, %s2097_s24  ;;  %v2120_v47 = vmul.f32 %v2119_v45, %v3593_v52  ;;  %v2121_v50 = vmul.f32 %v2119_v45, %v3595_v54 }
 0xd10   :  { %s2108_s0 = sadd.f32 %s2107_s9, %s2106_s28  ;;  %s2111_s29 = smul.f32 %s2102_s17, %s3686_s21  ;;  %v2122_v36 = vstv %s2105_s30 }
 0xd11   :  { %s2110_s5 = sadd.f32 %s2109_s6, %s2101_s14  ;;  %s2112_s25 = smul.f32 %s2105_s30, %s3690_s7  ;;  %v2123_v37 = vmul.f32 %v2122_v36, %v3603_v19  ;;  %v2124_v56 = vmul.f32 %v2122_v36, %v3605_v28 }
 0xd12   :  { %s2115_s20 = smul.f32 %s2108_s0, %s3686_s21  ;;  %v2132_v48 = vstv %s2108_s0 }
 0xd13   :  { %s2113_s4 = sadd.f32 %s2112_s25, %s2111_s29  ;;  %s2116_s13 = smul.f32 %s2110_s5, %s3690_s7  ;;  %v2125_v49 = vadd.f32 %v2123_v37, %v2120_v47  ;;  %v2126_v55 = vadd.f32 %v2124_v56, %v2121_v50  ;;  %v2135_v57 = vstv %s2110_s5  ;;  %v2133_v18 = vmul.f32 %v2132_v48, %v3593_v52 }
 0xd14   :  { %v2134_v58 = vmul.f32 %v2132_v48, %v3595_v54  ;;  %v2136_v26 = vmul.f32 %v2135_v57, %v3603_v19  ;;  %v2137_v15 = vmul.f32 %v2135_v57, %v3605_v28  ;;  %v1526_v54 = vmul.f32 0.5, %v3669_v42 }
 0xd15   :  { %s2114_s2 = ssub.f32 %s3291_s27, %s2113_s4  ;;  %v1527_v19 = vmul.f32 0.5, %v3672_v17  ;;  %v2169_v42 = vsel %vm117_vm0, %v3568_v61, %v2471_v60  ;;  %s2695_s27 = smov [#allocation12]  }
 0xd16   :  { %s2117_s26 = sadd.f32 %s2116_s13, %s2115_s20  ;;  %v2138_v59 = vadd.f32 %v2136_v26, %v2133_v18  ;;  %v2139_v24 = vadd.f32 %v2137_v15, %v2134_v58 }
 0xd17   :  { %v2127_v21 = vstv %s2114_s2 }
 0xd18   :  { %s2118_s11 = ssub.f32 %s3299_s19, %s2117_s26  ;;  %v2128_v51 = vadd.f32 %v2127_v21, %v2125_v49  ;;  %v2129_v20 = vadd.f32 %v2127_v21, %v2126_v55  ;;  %s2199_s19 = sshll.u32 %s2695_s27, 4  ;;  %s2200_s19 = int_to_ptr.vmem [resolvable:$true] %s2199_s19 }
 0xd19   :  { %p2652_p8 = scmp.lt.s32.totalorder %s2200_s19, %s2200_s19 }
 0xd1a   :  { %v2140_v63 = vstv %s2118_s11 }
 0xd1b   :  { %v2141_v22 = vadd.f32 %v2140_v63, %v2138_v59  ;;  %v2142_v12 = vadd.f32 %v2140_v63, %v2139_v24 }
 0xd1d   :  { %2537 = vtanh.f32 %v2141_v22 }
 0xd1e   :  { %2539 = vtanh.f32 %v2142_v12 }
 0xd1f   :  { %2541 = vtanh.f32 %v1526_v54 }
 0xd20   :  { %2543 = vtanh.f32 %v1527_v19 }
 0xd21   :  { %2545 = vtanh.f32 %v2128_v51 }
 0xd22   :  { %2547 = vtanh.f32 %v2129_v20 }
 0xd27   :  { %v2538_v41 = vpop.eup %2537 }
 0xd28   :  { %v2540_v52 = vpop.eup %2539 }
 0xd29   :  { %v2478_v32 = vpack.i.bf16 %v2540_v52, %v2538_v41  ;;  %v2542_v28 = vpop.eup %2541 }
 0xd2a   :  { %v2544_v0 = vpop.eup %2543  ;;  %v1530_v8 = vadd.f32 1.0, %v2542_v28 }
 0xd2b   :  { %2479 = vrot.lane.b32.xlu1 %v2478_v32, %s3826_s10  ;;  %v1531_v6 = vadd.f32 1.0, %v2544_v0  ;;  %v2546_v2 = vpop.eup %2545  ;;  %s2647_s10 = scalar_lea.vmem %s2200_s19, 256 }
 0xd2c   :  { %v1532_v53 = vmul.f32 0.5, %v1530_v8  ;;  %v2548_v62 = vpop.eup %2547  ;;  %p2648_p7 = scmp.ne.s32.totalorder %s2200_s19, %s2647_s10  ;;  %p2653_p9 = scmp.lt.s32.totalorder %s2647_s10, %s2647_s10 }
 0xd2d   :  { %v1533_v17 = vmul.f32 0.5, %v1531_v6 }
 0xd2e   :  { %v2171_v43 = vsel %vm232_vm1, %v2169_v42, %v1532_v53  ;;  %p2654_p10 = por %p2653_p9, %p2652_p8 }
 0xd2f   :  { %v2172_v46 = vsel %vm232_vm1, %v2170_v7, %v1533_v17  ;;  %v2173_v1 = vsel %vm328_vm2, %v2171_v43, %v2476_v4 }
 0xd30   :  { %v2174_v61 = vsel %vm328_vm2, %v2172_v46, %v2477_v3  ;;  %p2655_p11 = pnand %p2654_p10, %p2648_p7 }
 0xd9d   :  { %v2480_v44 = vpop.permute.xlu1 %2479 }
 0xd9e   :  { %v2482_v38 = vunpack.i.h.bf16 %v2480_v44  ;;  %v2481_v10 = vunpack.i.l.bf16 %v2480_v44 }
 0xda0   :  { %v2175_v14 = vsel %vm117_vm0, %v2546_v2, %v2481_v10  ;;  %v2176_v23 = vsel %vm117_vm0, %v2548_v62, %v2482_v38 }
 0xda1   :  { %v2232_v13 = vpack.c.bf16 %v2175_v14, %v2173_v1  ;;  %v2233_v25 = vpack.c.bf16 %v2176_v23, %v2174_v61 }
 0xda3   :  { %2192 = vst.msk [vmem:[#allocation12] sm:$0xff] %vm2191_vm12, %v2232_v13  ;;  %2193 = vst.msk [vmem:[#allocation12 + $0x8] sm:$0xff] %vm2191_vm12, %v2233_v25 }
 0xda4   :  { %2658 = shalt.err (!%p2655_p11)
}
 0xda5   :  { %s3836_s15 = sld [smem:[#allocation30_spill]] }
 0xdab   :  { %s2659_s18 = scalar_lea.hbm %s3836_s15, 256 }
 0xdac   :  { %p2660_p12 = scmp.ne.s32.totalorder %s3836_s15, %s2659_s18  ;;  %p2663_p13 = scmp.lt.u32.totalorder %s2659_s18, %s3836_s15 }
 0xdae   :  { %p2665_p0 = pnand %p2663_p13, %p2660_p12 }
 0xdb0   :  { %2668 = shalt.err (!%p2665_p0)
}
 0xdb1   :  { %s3837_s23 = smov 8   ;;  %s3838_s1 = smov 128  }
 0xdb2   :  { %2205 = dma.vmem_to_hbm [thread:$0]  %s2200_s19, 256, %s3836_s15, [#allocation4], %s3838_s1, %s3838_s1, %s3837_s23  }
 0xdb3   :  { %2677 = dma.done.wait [#allocation4], 256  }
 0xdb4   :  { %2678 = vsyncadd [#allocation4], 4294967040 }
 0xdb5   :  { %2209 = vsyncpa [#allocation3], 1 }
 0xdb6   :  { %2210 = vsyncpa [#allocation8], 1 }
 0xdb7   :  { %2211 = vsyncpa [#allocation11], 1 }
 0xdb8   :  { %2212 = vsyncpa [#allocation4], 1 }
 0xdb9   :  { %2213 = vsyncpa [#allocation5], 1 }

</bundles_post_ra>
